<compile_context>
chip_gen: v7x
topology: tpu7x:2x2x1
jax: 0.10.0
libtpu: 0.0.40
codegen_flags: <defaults>
</compile_context>

<pallas_src>
import jax
import jax.numpy as jnp
from jax import lax
from jax.experimental import pallas as pl
from jax.experimental.pallas import tpu as pltpu

_NEG_SLOPE = 0.2     # LeakyReLU slope used throughout D_NET256
_BN_EPS = 1e-5


# --------------------------------------------------------------------------
# Pallas kernel: one (tm, tn) tile of  LeakyReLU(scale * (X @ W) + shift)
# --------------------------------------------------------------------------
def _fused_conv_gemm_kernel(x_ref, w_ref, scale_ref, shift_ref, o_ref, acc_ref):
    @pl.when(pl.program_id(2) == 0)
    def _():
        acc_ref[...] = jnp.zeros_like(acc_ref)

    acc_ref[...] += jnp.dot(x_ref[...], w_ref[...],
                            preferred_element_type=jnp.float32)

    @pl.when(pl.program_id(2) == pl.num_programs(2) - 1)
    def _():
        y = acc_ref[...] * scale_ref[...] + shift_ref[...]        # folded BN
        o_ref[...] = jnp.where(y >= 0.0, y, _NEG_SLOPE * y).astype(o_ref.dtype)


def _pick_tile(dim, max_tile, align):
    """Largest tile <= max_tile that is a multiple of `align` and divides `dim`
    exactly; falls back to the full extent (always legal).  Exact divisors mean
    no wrapper-side padding / slicing is ever needed."""
    if dim <= max_tile:
        return dim
    t = (max_tile // align) * align
    while t >= align:
        if dim % t == 0:
            return t
        t -= align
    return dim


def _fused_gemm(lhs, rhs, scale, shift):
    """LeakyReLU(scale * (lhs @ rhs) + shift); scale/shift are (1, N)."""
    m, k = lhs.shape
    _, n = rhs.shape
    tm = _pick_tile(m, 512, 8)      # sublane dim of LHS / out
    tk = _pick_tile(k, 512, 128)    # lane dim of LHS, sublane dim of RHS
    tn = _pick_tile(n, 256, 128)    # lane dim of RHS / out

    cost = pl.CostEstimate(
        flops=2 * m * k * n + 3 * m * n,
        transcendentals=0,
        bytes_accessed=4 * (m * k + k * n + 2 * m * n),
    )

    return pl.pallas_call(
        _fused_conv_gemm_kernel,
        out_shape=jax.ShapeDtypeStruct((m, n), lhs.dtype),
        grid_spec=pltpu.PrefetchScalarGridSpec(
            num_scalar_prefetch=0,
            grid=(m // tm, n // tn, k // tk),
            in_specs=[
                pl.BlockSpec((tm, tk), lambda i, j, kk: (i, kk)),   # patches
                pl.BlockSpec((tk, tn), lambda i, j, kk: (kk, j)),   # weights
                pl.BlockSpec((1, tn), lambda i, j, kk: (0, j)),     # BN scale
                pl.BlockSpec((1, tn), lambda i, j, kk: (0, j)),     # BN shift
            ],
            out_specs=pl.BlockSpec((tm, tn), lambda i, j, kk: (i, j)),
            scratch_shapes=[pltpu.VMEM((tm, tn), jnp.float32)],
        ),
        compiler_params=pltpu.CompilerParams(
            dimension_semantics=("parallel", "parallel", "arbitrary"),
        ),
        cost_estimate=cost,
    )(lhs, rhs, scale, shift)


# --------------------------------------------------------------------------
# Conv layer = im2col (XLA data movement) + fused Pallas GEMM epilogue
# --------------------------------------------------------------------------
def _im2col(x, kh, kw, stride, pad):
    """(N,C,H,W) -> (N*Ho*Wo, C*kh*kw). Feature order is (c, kh, kw), matching
    a PyTorch OIHW weight flattened as (Cout, C*kh*kw)."""
    n, c, h, w = x.shape
    xp = jnp.pad(x, ((0, 0), (0, 0), (pad, pad), (pad, pad)))
    ho = (h + 2 * pad - kh) // stride + 1
    wo = (w + 2 * pad - kw) // stride + 1
    cols = []
    for i in range(kh):
        for j in range(kw):
            cols.append(xp[:, :,
                           i:i + stride * (ho - 1) + 1:stride,
                           j:j + stride * (wo - 1) + 1:stride])
    patches = jnp.stack(cols, axis=2)                  # (N, C, kh*kw, Ho, Wo)
    patches = patches.reshape(n, c * kh * kw, ho, wo)
    lhs = patches.transpose(0, 2, 3, 1).reshape(n * ho * wo, c * kh * kw)
    return lhs, ho, wo


def _conv_bn_lrelu(x, layer):
    w, scale, shift = layer["w"], layer["scale"], layer["shift"]
    stride, pad = layer["stride"], layer["pad"]
    cout, cin, kh, kw = w.shape
    n = x.shape[0]
    lhs, ho, wo = _im2col(x, kh, kw, stride, pad)
    rhs = w.reshape(cout, cin * kh * kw).T             # (K, Cout)
    out = _fused_gemm(lhs, rhs, scale, shift)          # (N*Ho*Wo, Cout)
    return out.reshape(n, ho, wo, cout).transpose(0, 3, 1, 2)


def d_net256_forward(x, params):
    """x: (N, 3, H, W) -> x_code4: (N, ndf*8, H/64, W/64)."""
    h = x
    for layer in params:
        h = _conv_bn_lrelu(h, layer)
    return h


# --------------------------------------------------------------------------
# Parameter construction (folded inference-mode BatchNorm) + pure-JAX reference
# --------------------------------------------------------------------------
def _init_params(key, ndf):
    # (cin, cout, k, stride, pad, has_bn) for the D_NET256 tower.
    cfgs = [
        (3,        ndf,      4, 2, 1, False),   # encode_image_by_16times[0]
        (ndf,      ndf * 2,  4, 2, 1, True),
        (ndf * 2,  ndf * 4,  4, 2, 1, True),
        (ndf * 4,  ndf * 8,  4, 2, 1, True),
        (ndf * 8,  ndf * 16, 4, 2, 1, True),    # img_code_s32
        (ndf * 16, ndf * 32, 4, 2, 1, True),    # img_code_s64
        (ndf * 32, ndf * 16, 3, 1, 1, True),    # img_code_s64_1 (3x3)
        (ndf * 16, ndf * 8,  3, 1, 1, True),    # img_code_s64_2 (3x3)
    ]
    params = []
    for cin, cout, k, s, p, has_bn in cfgs:
        key, kw_, kg, kb, km, kv = jax.random.split(key, 6)
        w = jax.random.normal(kw_, (cout, cin, k, k), jnp.float32)
        w = w / jnp.sqrt(float(cin * k * k))
        if has_bn:
            gamma = 1.0 + 0.1 * jax.random.normal(kg, (cout,), jnp.float32)
            beta = 0.1 * jax.random.normal(kb, (cout,), jnp.float32)
            mean = 0.1 * jax.random.normal(km, (cout,), jnp.float32)
            var = 0.5 + jax.random.uniform(kv, (cout,), jnp.float32)
            scale = gamma * lax.rsqrt(var + _BN_EPS)
            shift = beta - mean * scale
        else:                                   # first block: conv + LeakyReLU only
            scale = jnp.ones((cout,), jnp.float32)
            shift = jnp.zeros((cout,), jnp.float32)
        params.append(dict(w=w, scale=scale.reshape(1, cout),
                           shift=shift.reshape(1, cout), stride=s, pad=p))
    return params


def _ref_forward(x, params):
    h = x
    for layer in params:
        y = lax.conv_general_dilated(
            h, layer["w"], window_strides=(layer["stride"],) * 2,
            padding=[(layer["pad"],) * 2] * 2,
            dimension_numbers=("NCHW", "OIHW", "NCHW"))
        y = y * layer["scale"].reshape(1, -1, 1, 1) + layer["shift"].reshape(1, -1, 1, 1)
        h = jnp.where(y >= 0.0, y, _NEG_SLOPE * y)
    return h


if __name__ == "__main__":
    key = jax.random.PRNGKey(0)
    kp, kx = jax.random.split(key)

    ndf = 4                                   # small stand-in for cfg.GAN.DF_DIM (64)
    params = _init_params(kp, ndf)
    # Small analogue of the 256x256 input (must be divisible by 64 for the tower).
    x = jax.random.normal(kx, (2, 3, 64, 64), jnp.float32)

    fwd = jax.jit(lambda inp: d_net256_forward(inp, params))
    out = fwd(x)
    jax.block_until_ready(out)

    assert out.shape == (2, ndf * 8, 1, 1), out.shape

    ref = _ref_forward(x, params)
    diff = jnp.linalg.norm((out - ref).ravel())
    denom = jnp.linalg.norm(ref.ravel()) + 1e-8
    rel_err = float(diff / denom)
    # Loose tolerance: both paths use default TPU matmul/conv precision.
    assert rel_err < 0.1, rel_err

    print("KERNEL_OK")
</pallas_src>

<mosaic_0001>
module attributes {stable_mosaic.version = 11 : i64} {
  func.func @_fused_conv_gemm_kernel(%arg0: i32, %arg1: i32, %arg2: i32, %arg3: memref<512x48xf32, #tpu.memory_space<vmem>>, %arg4: memref<48x4xf32, #tpu.memory_space<vmem>>, %arg5: memref<1x4xf32, #tpu.memory_space<vmem>>, %arg6: memref<1x4xf32, #tpu.memory_space<vmem>>, %arg7: memref<512x4xf32, #tpu.memory_space<vmem>>, %arg8: memref<512x4xf32, #tpu.memory_space<vmem>>) attributes {dimension_semantics = [#tpu.dimension_semantics<parallel>, #tpu.dimension_semantics<parallel>, #tpu.dimension_semantics<arbitrary>], iteration_bounds = array<i64: 4, 1, 1>, scalar_prefetch = 0 : i64, scratch_operands = 1 : i64, tpu.core_type = #tpu.core_type<tc>, window_params = [{transform_indices = @transform_0, window_bounds = array<i64: 512, 48>}, {transform_indices = @transform_1, window_bounds = array<i64: 48, 4>}, {transform_indices = @transform_2, window_bounds = array<i64: 1, 4>}, {transform_indices = @transform_3, window_bounds = array<i64: 1, 4>}, {transform_indices = @transform_4, window_bounds = array<i64: 512, 4>}]} {
    %c0_i32 = arith.constant 0 : i32
    %0 = arith.cmpi eq, %arg2, %c0_i32 : i32
    %1 = arith.extui %0 : i1 to i32
    %c0_i32_0 = arith.constant 0 : i32
    %2 = arith.cmpi ne, %1, %c0_i32_0 : i32
    scf.if %2 {
      %cst_10 = arith.constant 0.000000e+00 : f32
      %12 = vector.broadcast %cst_10 : f32 to vector<512x4xf32>
      %c0_11 = arith.constant 0 : index
      %c0_12 = arith.constant 0 : index
      %13 = vector.load %arg8[%c0_11, %c0_12] : memref<512x4xf32, #tpu.memory_space<vmem>>, vector<512x4xf32>
      tpu.vector_store %arg8[%c0_11, %c0_12], %12 {strides = array<i32>} : memref<512x4xf32, #tpu.memory_space<vmem>>, vector<512x4xf32>,
    } else {
    }
    %c0 = arith.constant 0 : index
    %c0_1 = arith.constant 0 : index
    %3 = vector.load %arg8[%c0, %c0_1] : memref<512x4xf32, #tpu.memory_space<vmem>>, vector<512x4xf32>
    %c0_2 = arith.constant 0 : index
    %c0_3 = arith.constant 0 : index
    %4 = vector.load %arg3[%c0_2, %c0_3] : memref<512x48xf32, #tpu.memory_space<vmem>>, vector<512x48xf32>
    %c0_4 = arith.constant 0 : index
    %c0_5 = arith.constant 0 : index
    %5 = vector.load %arg4[%c0_4, %c0_5] : memref<48x4xf32, #tpu.memory_space<vmem>>, vector<48x4xf32>
    %cst = arith.constant dense<0.000000e+00> : vector<512x4xf32>
    %6 = tpu.matmul %4, %5, %cst {dimension_numbers = #tpu.dot_dimension_numbers<[1], [0], [0], [1], [0, 0, 1, 1], [], []>} : vector<512x48xf32>, vector<48x4xf32>, vector<512x4xf32> -> vector<512x4xf32>
    %7 = arith.addf %3, %6 : vector<512x4xf32>
    %c0_6 = arith.constant 0 : index
    %c0_7 = arith.constant 0 : index
    %8 = vector.load %arg8[%c0_6, %c0_7] : memref<512x4xf32, #tpu.memory_space<vmem>>, vector<512x4xf32>
    tpu.vector_store %arg8[%c0_6, %c0_7], %7 {strides = array<i32>} : memref<512x4xf32, #tpu.memory_space<vmem>>, vector<512x4xf32>,
    %c0_i32_8 = arith.constant 0 : i32
    %9 = arith.cmpi eq, %arg2, %c0_i32_8 : i32
    %10 = arith.extui %9 : i1 to i32
    %c0_i32_9 = arith.constant 0 : i32
    %11 = arith.cmpi ne, %10, %c0_i32_9 : i32
    scf.if %11 {
      %c0_10 = arith.constant 0 : index
      %c0_11 = arith.constant 0 : index
      %12 = vector.load %arg8[%c0_10, %c0_11] : memref<512x4xf32, #tpu.memory_space<vmem>>, vector<512x4xf32>
      %c0_12 = arith.constant 0 : index
      %c0_13 = arith.constant 0 : index
      %13 = vector.load %arg5[%c0_12, %c0_13] : memref<1x4xf32, #tpu.memory_space<vmem>>, vector<1x4xf32>
      %14 = vector.broadcast %13 : vector<1x4xf32> to vector<512x4xf32>
      %15 = arith.mulf %12, %14 : vector<512x4xf32>
      %c0_14 = arith.constant 0 : index
      %c0_15 = arith.constant 0 : index
      %16 = vector.load %arg6[%c0_14, %c0_15] : memref<1x4xf32, #tpu.memory_space<vmem>>, vector<1x4xf32>
      %17 = vector.broadcast %16 : vector<1x4xf32> to vector<512x4xf32>
      %18 = arith.addf %15, %17 : vector<512x4xf32>
      %cst_16 = arith.constant 0.000000e+00 : f32
      %19 = vector.broadcast %cst_16 : f32 to vector<512x4xf32>
      %20 = arith.cmpf oge, %18, %19 : vector<512x4xf32>
      %cst_17 = arith.constant 2.000000e-01 : f32
      %21 = vector.broadcast %cst_17 : f32 to vector<512x4xf32>
      %22 = arith.mulf %21, %18 : vector<512x4xf32>
      %23 = arith.select %20, %18, %22 : vector<512x4xi1>, vector<512x4xf32>
      %c0_18 = arith.constant 0 : index
      %c0_19 = arith.constant 0 : index
      %24 = vector.load %arg7[%c0_18, %c0_19] : memref<512x4xf32, #tpu.memory_space<vmem>>, vector<512x4xf32>
      tpu.vector_store %arg7[%c0_18, %c0_19], %23 {strides = array<i32>} : memref<512x4xf32, #tpu.memory_space<vmem>>, vector<512x4xf32>,
    } else {
    }
    return
  }
  func.func @transform_0(%arg0: i32, %arg1: i32, %arg2: i32) -> (i32, i32) {
    %c0_i32 = arith.constant 0 : i32
    return %arg0, %arg2 : i32, i32
  }
  func.func @transform_1(%arg0: i32, %arg1: i32, %arg2: i32) -> (i32, i32) {
    %c0_i32 = arith.constant 0 : i32
    return %arg2, %arg1 : i32, i32
  }
  func.func @transform_2(%arg0: i32, %arg1: i32, %arg2: i32) -> (i32, i32) {
    %c0_i32 = arith.constant 0 : i32
    %c0_i32_0 = arith.constant 0 : i32
    return %c0_i32, %arg1 : i32, i32
  }
  func.func @transform_3(%arg0: i32, %arg1: i32, %arg2: i32) -> (i32, i32) {
    %c0_i32 = arith.constant 0 : i32
    %c0_i32_0 = arith.constant 0 : i32
    return %c0_i32, %arg1 : i32, i32
  }
  func.func @transform_4(%arg0: i32, %arg1: i32, %arg2: i32) -> (i32, i32) {
    %c0_i32 = arith.constant 0 : i32
    return %arg0, %arg1 : i32, i32
  }
}

module attributes {stable_mosaic.version = 11 : i64} {
  func.func @_fused_conv_gemm_kernel(%arg0: i32, %arg1: i32, %arg2: i32, %arg3: memref<512x64xf32, #tpu.memory_space<vmem>>, %arg4: memref<64x8xf32, #tpu.memory_space<vmem>>, %arg5: memref<1x8xf32, #tpu.memory_space<vmem>>, %arg6: memref<1x8xf32, #tpu.memory_space<vmem>>, %arg7: memref<512x8xf32, #tpu.memory_space<vmem>>, %arg8: memref<512x8xf32, #tpu.memory_space<vmem>>) attributes {dimension_semantics = [#tpu.dimension_semantics<parallel>, #tpu.dimension_semantics<parallel>, #tpu.dimension_semantics<arbitrary>], iteration_bounds = array<i64: 1, 1, 1>, scalar_prefetch = 0 : i64, scratch_operands = 1 : i64, tpu.core_type = #tpu.core_type<tc>, window_params = [{transform_indices = @transform_0, window_bounds = array<i64: 512, 64>}, {transform_indices = @transform_1, window_bounds = array<i64: 64, 8>}, {transform_indices = @transform_2, window_bounds = array<i64: 1, 8>}, {transform_indices = @transform_3, window_bounds = array<i64: 1, 8>}, {transform_indices = @transform_4, window_bounds = array<i64: 512, 8>}]} {
    %c0_i32 = arith.constant 0 : i32
    %0 = arith.cmpi eq, %arg2, %c0_i32 : i32
    %1 = arith.extui %0 : i1 to i32
    %c0_i32_0 = arith.constant 0 : i32
    %2 = arith.cmpi ne, %1, %c0_i32_0 : i32
    scf.if %2 {
      %cst_10 = arith.constant 0.000000e+00 : f32
      %12 = vector.broadcast %cst_10 : f32 to vector<512x8xf32>
      %c0_11 = arith.constant 0 : index
      %c0_12 = arith.constant 0 : index
      %13 = vector.load %arg8[%c0_11, %c0_12] : memref<512x8xf32, #tpu.memory_space<vmem>>, vector<512x8xf32>
      tpu.vector_store %arg8[%c0_11, %c0_12], %12 {strides = array<i32>} : memref<512x8xf32, #tpu.memory_space<vmem>>, vector<512x8xf32>,
    } else {
    }
    %c0 = arith.constant 0 : index
    %c0_1 = arith.constant 0 : index
    %3 = vector.load %arg8[%c0, %c0_1] : memref<512x8xf32, #tpu.memory_space<vmem>>, vector<512x8xf32>
    %c0_2 = arith.constant 0 : index
    %c0_3 = arith.constant 0 : index
    %4 = vector.load %arg3[%c0_2, %c0_3] : memref<512x64xf32, #tpu.memory_space<vmem>>, vector<512x64xf32>
    %c0_4 = arith.constant 0 : index
    %c0_5 = arith.constant 0 : index
    %5 = vector.load %arg4[%c0_4, %c0_5] : memref<64x8xf32, #tpu.memory_space<vmem>>, vector<64x8xf32>
    %cst = arith.constant dense<0.000000e+00> : vector<512x8xf32>
    %6 = tpu.matmul %4, %5, %cst {dimension_numbers = #tpu.dot_dimension_numbers<[1], [0], [0], [1], [0, 0, 1, 1], [], []>} : vector<512x64xf32>, vector<64x8xf32>, vector<512x8xf32> -> vector<512x8xf32>
    %7 = arith.addf %3, %6 : vector<512x8xf32>
    %c0_6 = arith.constant 0 : index
    %c0_7 = arith.constant 0 : index
    %8 = vector.load %arg8[%c0_6, %c0_7] : memref<512x8xf32, #tpu.memory_space<vmem>>, vector<512x8xf32>
    tpu.vector_store %arg8[%c0_6, %c0_7], %7 {strides = array<i32>} : memref<512x8xf32, #tpu.memory_space<vmem>>, vector<512x8xf32>,
    %c0_i32_8 = arith.constant 0 : i32
    %9 = arith.cmpi eq, %arg2, %c0_i32_8 : i32
    %10 = arith.extui %9 : i1 to i32
    %c0_i32_9 = arith.constant 0 : i32
    %11 = arith.cmpi ne, %10, %c0_i32_9 : i32
    scf.if %11 {
      %c0_10 = arith.constant 0 : index
      %c0_11 = arith.constant 0 : index
      %12 = vector.load %arg8[%c0_10, %c0_11] : memref<512x8xf32, #tpu.memory_space<vmem>>, vector<512x8xf32>
      %c0_12 = arith.constant 0 : index
      %c0_13 = arith.constant 0 : index
      %13 = vector.load %arg5[%c0_12, %c0_13] : memref<1x8xf32, #tpu.memory_space<vmem>>, vector<1x8xf32>
      %14 = vector.broadcast %13 : vector<1x8xf32> to vector<512x8xf32>
      %15 = arith.mulf %12, %14 : vector<512x8xf32>
      %c0_14 = arith.constant 0 : index
      %c0_15 = arith.constant 0 : index
      %16 = vector.load %arg6[%c0_14, %c0_15] : memref<1x8xf32, #tpu.memory_space<vmem>>, vector<1x8xf32>
      %17 = vector.broadcast %16 : vector<1x8xf32> to vector<512x8xf32>
      %18 = arith.addf %15, %17 : vector<512x8xf32>
      %cst_16 = arith.constant 0.000000e+00 : f32
      %19 = vector.broadcast %cst_16 : f32 to vector<512x8xf32>
      %20 = arith.cmpf oge, %18, %19 : vector<512x8xf32>
      %cst_17 = arith.constant 2.000000e-01 : f32
      %21 = vector.broadcast %cst_17 : f32 to vector<512x8xf32>
      %22 = arith.mulf %21, %18 : vector<512x8xf32>
      %23 = arith.select %20, %18, %22 : vector<512x8xi1>, vector<512x8xf32>
      %c0_18 = arith.constant 0 : index
      %c0_19 = arith.constant 0 : index
      %24 = vector.load %arg7[%c0_18, %c0_19] : memref<512x8xf32, #tpu.memory_space<vmem>>, vector<512x8xf32>
      tpu.vector_store %arg7[%c0_18, %c0_19], %23 {strides = array<i32>} : memref<512x8xf32, #tpu.memory_space<vmem>>, vector<512x8xf32>,
    } else {
    }
    return
  }
  func.func @transform_0(%arg0: i32, %arg1: i32, %arg2: i32) -> (i32, i32) {
    %c0_i32 = arith.constant 0 : i32
    return %arg0, %arg2 : i32, i32
  }
  func.func @transform_1(%arg0: i32, %arg1: i32, %arg2: i32) -> (i32, i32) {
    %c0_i32 = arith.constant 0 : i32
    return %arg2, %arg1 : i32, i32
  }
  func.func @transform_2(%arg0: i32, %arg1: i32, %arg2: i32) -> (i32, i32) {
    %c0_i32 = arith.constant 0 : i32
    %c0_i32_0 = arith.constant 0 : i32
    return %c0_i32, %arg1 : i32, i32
  }
  func.func @transform_3(%arg0: i32, %arg1: i32, %arg2: i32) -> (i32, i32) {
    %c0_i32 = arith.constant 0 : i32
    %c0_i32_0 = arith.constant 0 : i32
    return %c0_i32, %arg1 : i32, i32
  }
  func.func @transform_4(%arg0: i32, %arg1: i32, %arg2: i32) -> (i32, i32) {
    %c0_i32 = arith.constant 0 : i32
    return %arg0, %arg1 : i32, i32
  }
}

module attributes {stable_mosaic.version = 11 : i64} {
  func.func @_fused_conv_gemm_kernel(%arg0: i32, %arg1: i32, %arg2: i32, %arg3: memref<128x128xf32, #tpu.memory_space<vmem>>, %arg4: memref<128x16xf32, #tpu.memory_space<vmem>>, %arg5: memref<1x16xf32, #tpu.memory_space<vmem>>, %arg6: memref<1x16xf32, #tpu.memory_space<vmem>>, %arg7: memref<128x16xf32, #tpu.memory_space<vmem>>, %arg8: memref<128x16xf32, #tpu.memory_space<vmem>>) attributes {dimension_semantics = [#tpu.dimension_semantics<parallel>, #tpu.dimension_semantics<parallel>, #tpu.dimension_semantics<arbitrary>], iteration_bounds = array<i64: 1, 1, 1>, scalar_prefetch = 0 : i64, scratch_operands = 1 : i64, tpu.core_type = #tpu.core_type<tc>, window_params = [{transform_indices = @transform_0, window_bounds = array<i64: 128, 128>}, {transform_indices = @transform_1, window_bounds = array<i64: 128, 16>}, {transform_indices = @transform_2, window_bounds = array<i64: 1, 16>}, {transform_indices = @transform_3, window_bounds = array<i64: 1, 16>}, {transform_indices = @transform_4, window_bounds = array<i64: 128, 16>}]} {
    %c0_i32 = arith.constant 0 : i32
    %0 = arith.cmpi eq, %arg2, %c0_i32 : i32
    %1 = arith.extui %0 : i1 to i32
    %c0_i32_0 = arith.constant 0 : i32
    %2 = arith.cmpi ne, %1, %c0_i32_0 : i32
    scf.if %2 {
      %cst_10 = arith.constant 0.000000e+00 : f32
      %12 = vector.broadcast %cst_10 : f32 to vector<128x16xf32>
      %c0_11 = arith.constant 0 : index
      %c0_12 = arith.constant 0 : index
      %13 = vector.load %arg8[%c0_11, %c0_12] : memref<128x16xf32, #tpu.memory_space<vmem>>, vector<128x16xf32>
      tpu.vector_store %arg8[%c0_11, %c0_12], %12 {strides = array<i32>} : memref<128x16xf32, #tpu.memory_space<vmem>>, vector<128x16xf32>,
    } else {
    }
    %c0 = arith.constant 0 : index
    %c0_1 = arith.constant 0 : index
    %3 = vector.load %arg8[%c0, %c0_1] : memref<128x16xf32, #tpu.memory_space<vmem>>, vector<128x16xf32>
    %c0_2 = arith.constant 0 : index
    %c0_3 = arith.constant 0 : index
    %4 = vector.load %arg3[%c0_2, %c0_3] : memref<128x128xf32, #tpu.memory_space<vmem>>, vector<128x128xf32>
    %c0_4 = arith.constant 0 : index
    %c0_5 = arith.constant 0 : index
    %5 = vector.load %arg4[%c0_4, %c0_5] : memref<128x16xf32, #tpu.memory_space<vmem>>, vector<128x16xf32>
    %cst = arith.constant dense<0.000000e+00> : vector<128x16xf32>
    %6 = tpu.matmul %4, %5, %cst {dimension_numbers = #tpu.dot_dimension_numbers<[1], [0], [0], [1], [0, 0, 1, 1], [], []>} : vector<128x128xf32>, vector<128x16xf32>, vector<128x16xf32> -> vector<128x16xf32>
    %7 = arith.addf %3, %6 : vector<128x16xf32>
    %c0_6 = arith.constant 0 : index
    %c0_7 = arith.constant 0 : index
    %8 = vector.load %arg8[%c0_6, %c0_7] : memref<128x16xf32, #tpu.memory_space<vmem>>, vector<128x16xf32>
    tpu.vector_store %arg8[%c0_6, %c0_7], %7 {strides = array<i32>} : memref<128x16xf32, #tpu.memory_space<vmem>>, vector<128x16xf32>,
    %c0_i32_8 = arith.constant 0 : i32
    %9 = arith.cmpi eq, %arg2, %c0_i32_8 : i32
    %10 = arith.extui %9 : i1 to i32
    %c0_i32_9 = arith.constant 0 : i32
    %11 = arith.cmpi ne, %10, %c0_i32_9 : i32
    scf.if %11 {
      %c0_10 = arith.constant 0 : index
      %c0_11 = arith.constant 0 : index
      %12 = vector.load %arg8[%c0_10, %c0_11] : memref<128x16xf32, #tpu.memory_space<vmem>>, vector<128x16xf32>
      %c0_12 = arith.constant 0 : index
      %c0_13 = arith.constant 0 : index
      %13 = vector.load %arg5[%c0_12, %c0_13] : memref<1x16xf32, #tpu.memory_space<vmem>>, vector<1x16xf32>
      %14 = vector.broadcast %13 : vector<1x16xf32> to vector<128x16xf32>
      %15 = arith.mulf %12, %14 : vector<128x16xf32>
      %c0_14 = arith.constant 0 : index
      %c0_15 = arith.constant 0 : index
      %16 = vector.load %arg6[%c0_14, %c0_15] : memref<1x16xf32, #tpu.memory_space<vmem>>, vector<1x16xf32>
      %17 = vector.broadcast %16 : vector<1x16xf32> to vector<128x16xf32>
      %18 = arith.addf %15, %17 : vector<128x16xf32>
      %cst_16 = arith.constant 0.000000e+00 : f32
      %19 = vector.broadcast %cst_16 : f32 to vector<128x16xf32>
      %20 = arith.cmpf oge, %18, %19 : vector<128x16xf32>
      %cst_17 = arith.constant 2.000000e-01 : f32
      %21 = vector.broadcast %cst_17 : f32 to vector<128x16xf32>
      %22 = arith.mulf %21, %18 : vector<128x16xf32>
      %23 = arith.select %20, %18, %22 : vector<128x16xi1>, vector<128x16xf32>
      %c0_18 = arith.constant 0 : index
      %c0_19 = arith.constant 0 : index
      %24 = vector.load %arg7[%c0_18, %c0_19] : memref<128x16xf32, #tpu.memory_space<vmem>>, vector<128x16xf32>
      tpu.vector_store %arg7[%c0_18, %c0_19], %23 {strides = array<i32>} : memref<128x16xf32, #tpu.memory_space<vmem>>, vector<128x16xf32>,
    } else {
    }
    return
  }
  func.func @transform_0(%arg0: i32, %arg1: i32, %arg2: i32) -> (i32, i32) {
    %c0_i32 = arith.constant 0 : i32
    return %arg0, %arg2 : i32, i32
  }
  func.func @transform_1(%arg0: i32, %arg1: i32, %arg2: i32) -> (i32, i32) {
    %c0_i32 = arith.constant 0 : i32
    return %arg2, %arg1 : i32, i32
  }
  func.func @transform_2(%arg0: i32, %arg1: i32, %arg2: i32) -> (i32, i32) {
    %c0_i32 = arith.constant 0 : i32
    %c0_i32_0 = arith.constant 0 : i32
    return %c0_i32, %arg1 : i32, i32
  }
  func.func @transform_3(%arg0: i32, %arg1: i32, %arg2: i32) -> (i32, i32) {
    %c0_i32 = arith.constant 0 : i32
    %c0_i32_0 = arith.constant 0 : i32
    return %c0_i32, %arg1 : i32, i32
  }
  func.func @transform_4(%arg0: i32, %arg1: i32, %arg2: i32) -> (i32, i32) {
    %c0_i32 = arith.constant 0 : i32
    return %arg0, %arg1 : i32, i32
  }
}

module attributes {stable_mosaic.version = 11 : i64} {
  func.func @_fused_conv_gemm_kernel(%arg0: i32, %arg1: i32, %arg2: i32, %arg3: memref<32x256xf32, #tpu.memory_space<vmem>>, %arg4: memref<256x32xf32, #tpu.memory_space<vmem>>, %arg5: memref<1x32xf32, #tpu.memory_space<vmem>>, %arg6: memref<1x32xf32, #tpu.memory_space<vmem>>, %arg7: memref<32x32xf32, #tpu.memory_space<vmem>>, %arg8: memref<32x32xf32, #tpu.memory_space<vmem>>) attributes {dimension_semantics = [#tpu.dimension_semantics<parallel>, #tpu.dimension_semantics<parallel>, #tpu.dimension_semantics<arbitrary>], iteration_bounds = array<i64: 1, 1, 1>, scalar_prefetch = 0 : i64, scratch_operands = 1 : i64, tpu.core_type = #tpu.core_type<tc>, window_params = [{transform_indices = @transform_0, window_bounds = array<i64: 32, 256>}, {transform_indices = @transform_1, window_bounds = array<i64: 256, 32>}, {transform_indices = @transform_2, window_bounds = array<i64: 1, 32>}, {transform_indices = @transform_3, window_bounds = array<i64: 1, 32>}, {transform_indices = @transform_4, window_bounds = array<i64: 32, 32>}]} {
    %c0_i32 = arith.constant 0 : i32
    %0 = arith.cmpi eq, %arg2, %c0_i32 : i32
    %1 = arith.extui %0 : i1 to i32
    %c0_i32_0 = arith.constant 0 : i32
    %2 = arith.cmpi ne, %1, %c0_i32_0 : i32
    scf.if %2 {
      %cst_10 = arith.constant 0.000000e+00 : f32
      %12 = vector.broadcast %cst_10 : f32 to vector<32x32xf32>
      %c0_11 = arith.constant 0 : index
      %c0_12 = arith.constant 0 : index
      %13 = vector.load %arg8[%c0_11, %c0_12] : memref<32x32xf32, #tpu.memory_space<vmem>>, vector<32x32xf32>
      tpu.vector_store %arg8[%c0_11, %c0_12], %12 {strides = array<i32>} : memref<32x32xf32, #tpu.memory_space<vmem>>, vector<32x32xf32>,
    } else {
    }
    %c0 = arith.constant 0 : index
    %c0_1 = arith.constant 0 : index
    %3 = vector.load %arg8[%c0, %c0_1] : memref<32x32xf32, #tpu.memory_space<vmem>>, vector<32x32xf32>
    %c0_2 = arith.constant 0 : index
    %c0_3 = arith.constant 0 : index
    %4 = vector.load %arg3[%c0_2, %c0_3] : memref<32x256xf32, #tpu.memory_space<vmem>>, vector<32x256xf32>
    %c0_4 = arith.constant 0 : index
    %c0_5 = arith.constant 0 : index
    %5 = vector.load %arg4[%c0_4, %c0_5] : memref<256x32xf32, #tpu.memory_space<vmem>>, vector<256x32xf32>
    %cst = arith.constant dense<0.000000e+00> : vector<32x32xf32>
    %6 = tpu.matmul %4, %5, %cst {dimension_numbers = #tpu.dot_dimension_numbers<[1], [0], [0], [1], [0, 0, 1, 1], [], []>} : vector<32x256xf32>, vector<256x32xf32>, vector<32x32xf32> -> vector<32x32xf32>
    %7 = arith.addf %3, %6 : vector<32x32xf32>
    %c0_6 = arith.constant 0 : index
    %c0_7 = arith.constant 0 : index
    %8 = vector.load %arg8[%c0_6, %c0_7] : memref<32x32xf32, #tpu.memory_space<vmem>>, vector<32x32xf32>
    tpu.vector_store %arg8[%c0_6, %c0_7], %7 {strides = array<i32>} : memref<32x32xf32, #tpu.memory_space<vmem>>, vector<32x32xf32>,
    %c0_i32_8 = arith.constant 0 : i32
    %9 = arith.cmpi eq, %arg2, %c0_i32_8 : i32
    %10 = arith.extui %9 : i1 to i32
    %c0_i32_9 = arith.constant 0 : i32
    %11 = arith.cmpi ne, %10, %c0_i32_9 : i32
    scf.if %11 {
      %c0_10 = arith.constant 0 : index
      %c0_11 = arith.constant 0 : index
      %12 = vector.load %arg8[%c0_10, %c0_11] : memref<32x32xf32, #tpu.memory_space<vmem>>, vector<32x32xf32>
      %c0_12 = arith.constant 0 : index
      %c0_13 = arith.constant 0 : index
      %13 = vector.load %arg5[%c0_12, %c0_13] : memref<1x32xf32, #tpu.memory_space<vmem>>, vector<1x32xf32>
      %14 = vector.broadcast %13 : vector<1x32xf32> to vector<32x32xf32>
      %15 = arith.mulf %12, %14 : vector<32x32xf32>
      %c0_14 = arith.constant 0 : index
      %c0_15 = arith.constant 0 : index
      %16 = vector.load %arg6[%c0_14, %c0_15] : memref<1x32xf32, #tpu.memory_space<vmem>>, vector<1x32xf32>
      %17 = vector.broadcast %16 : vector<1x32xf32> to vector<32x32xf32>
      %18 = arith.addf %15, %17 : vector<32x32xf32>
      %cst_16 = arith.constant 0.000000e+00 : f32
      %19 = vector.broadcast %cst_16 : f32 to vector<32x32xf32>
      %20 = arith.cmpf oge, %18, %19 : vector<32x32xf32>
      %cst_17 = arith.constant 2.000000e-01 : f32
      %21 = vector.broadcast %cst_17 : f32 to vector<32x32xf32>
      %22 = arith.mulf %21, %18 : vector<32x32xf32>
      %23 = arith.select %20, %18, %22 : vector<32x32xi1>, vector<32x32xf32>
      %c0_18 = arith.constant 0 : index
      %c0_19 = arith.constant 0 : index
      %24 = vector.load %arg7[%c0_18, %c0_19] : memref<32x32xf32, #tpu.memory_space<vmem>>, vector<32x32xf32>
      tpu.vector_store %arg7[%c0_18, %c0_19], %23 {strides = array<i32>} : memref<32x32xf32, #tpu.memory_space<vmem>>, vector<32x32xf32>,
    } else {
    }
    return
  }
  func.func @transform_0(%arg0: i32, %arg1: i32, %arg2: i32) -> (i32, i32) {
    %c0_i32 = arith.constant 0 : i32
    return %arg0, %arg2 : i32, i32
  }
  func.func @transform_1(%arg0: i32, %arg1: i32, %arg2: i32) -> (i32, i32) {
    %c0_i32 = arith.constant 0 : i32
    return %arg2, %arg1 : i32, i32
  }
  func.func @transform_2(%arg0: i32, %arg1: i32, %arg2: i32) -> (i32, i32) {
    %c0_i32 = arith.constant 0 : i32
    %c0_i32_0 = arith.constant 0 : i32
    return %c0_i32, %arg1 : i32, i32
  }
  func.func @transform_3(%arg0: i32, %arg1: i32, %arg2: i32) -> (i32, i32) {
    %c0_i32 = arith.constant 0 : i32
    %c0_i32_0 = arith.constant 0 : i32
    return %c0_i32, %arg1 : i32, i32
  }
  func.func @transform_4(%arg0: i32, %arg1: i32, %arg2: i32) -> (i32, i32) {
    %c0_i32 = arith.constant 0 : i32
    return %arg0, %arg1 : i32, i32
  }
}

module attributes {stable_mosaic.version = 11 : i64} {
  func.func @_fused_conv_gemm_kernel(%arg0: i32, %arg1: i32, %arg2: i32, %arg3: memref<8x512xf32, #tpu.memory_space<vmem>>, %arg4: memref<512x64xf32, #tpu.memory_space<vmem>>, %arg5: memref<1x64xf32, #tpu.memory_space<vmem>>, %arg6: memref<1x64xf32, #tpu.memory_space<vmem>>, %arg7: memref<8x64xf32, #tpu.memory_space<vmem>>, %arg8: memref<8x64xf32, #tpu.memory_space<vmem>>) attributes {dimension_semantics = [#tpu.dimension_semantics<parallel>, #tpu.dimension_semantics<parallel>, #tpu.dimension_semantics<arbitrary>], iteration_bounds = array<i64: 1, 1, 1>, scalar_prefetch = 0 : i64, scratch_operands = 1 : i64, tpu.core_type = #tpu.core_type<tc>, window_params = [{transform_indices = @transform_0, window_bounds = array<i64: 8, 512>}, {transform_indices = @transform_1, window_bounds = array<i64: 512, 64>}, {transform_indices = @transform_2, window_bounds = array<i64: 1, 64>}, {transform_indices = @transform_3, window_bounds = array<i64: 1, 64>}, {transform_indices = @transform_4, window_bounds = array<i64: 8, 64>}]} {
    %c0_i32 = arith.constant 0 : i32
    %0 = arith.cmpi eq, %arg2, %c0_i32 : i32
    %1 = arith.extui %0 : i1 to i32
    %c0_i32_0 = arith.constant 0 : i32
    %2 = arith.cmpi ne, %1, %c0_i32_0 : i32
    scf.if %2 {
      %cst_10 = arith.constant 0.000000e+00 : f32
      %12 = vector.broadcast %cst_10 : f32 to vector<8x64xf32>
      %c0_11 = arith.constant 0 : index
      %c0_12 = arith.constant 0 : index
      %13 = vector.load %arg8[%c0_11, %c0_12] : memref<8x64xf32, #tpu.memory_space<vmem>>, vector<8x64xf32>
      tpu.vector_store %arg8[%c0_11, %c0_12], %12 {strides = array<i32>} : memref<8x64xf32, #tpu.memory_space<vmem>>, vector<8x64xf32>,
    } else {
    }
    %c0 = arith.constant 0 : index
    %c0_1 = arith.constant 0 : index
    %3 = vector.load %arg8[%c0, %c0_1] : memref<8x64xf32, #tpu.memory_space<vmem>>, vector<8x64xf32>
    %c0_2 = arith.constant 0 : index
    %c0_3 = arith.constant 0 : index
    %4 = vector.load %arg3[%c0_2, %c0_3] : memref<8x512xf32, #tpu.memory_space<vmem>>, vector<8x512xf32>
    %c0_4 = arith.constant 0 : index
    %c0_5 = arith.constant 0 : index
    %5 = vector.load %arg4[%c0_4, %c0_5] : memref<512x64xf32, #tpu.memory_space<vmem>>, vector<512x64xf32>
    %cst = arith.constant dense<0.000000e+00> : vector<8x64xf32>
    %6 = tpu.matmul %4, %5, %cst {dimension_numbers = #tpu.dot_dimension_numbers<[1], [0], [0], [1], [0, 0, 1, 1], [], []>} : vector<8x512xf32>, vector<512x64xf32>, vector<8x64xf32> -> vector<8x64xf32>
    %7 = arith.addf %3, %6 : vector<8x64xf32>
    %c0_6 = arith.constant 0 : index
    %c0_7 = arith.constant 0 : index
    %8 = vector.load %arg8[%c0_6, %c0_7] : memref<8x64xf32, #tpu.memory_space<vmem>>, vector<8x64xf32>
    tpu.vector_store %arg8[%c0_6, %c0_7], %7 {strides = array<i32>} : memref<8x64xf32, #tpu.memory_space<vmem>>, vector<8x64xf32>,
    %c0_i32_8 = arith.constant 0 : i32
    %9 = arith.cmpi eq, %arg2, %c0_i32_8 : i32
    %10 = arith.extui %9 : i1 to i32
    %c0_i32_9 = arith.constant 0 : i32
    %11 = arith.cmpi ne, %10, %c0_i32_9 : i32
    scf.if %11 {
      %c0_10 = arith.constant 0 : index
      %c0_11 = arith.constant 0 : index
      %12 = vector.load %arg8[%c0_10, %c0_11] : memref<8x64xf32, #tpu.memory_space<vmem>>, vector<8x64xf32>
      %c0_12 = arith.constant 0 : index
      %c0_13 = arith.constant 0 : index
      %13 = vector.load %arg5[%c0_12, %c0_13] : memref<1x64xf32, #tpu.memory_space<vmem>>, vector<1x64xf32>
      %14 = vector.broadcast %13 : vector<1x64xf32> to vector<8x64xf32>
      %15 = arith.mulf %12, %14 : vector<8x64xf32>
      %c0_14 = arith.constant 0 : index
      %c0_15 = arith.constant 0 : index
      %16 = vector.load %arg6[%c0_14, %c0_15] : memref<1x64xf32, #tpu.memory_space<vmem>>, vector<1x64xf32>
      %17 = vector.broadcast %16 : vector<1x64xf32> to vector<8x64xf32>
      %18 = arith.addf %15, %17 : vector<8x64xf32>
      %cst_16 = arith.constant 0.000000e+00 : f32
      %19 = vector.broadcast %cst_16 : f32 to vector<8x64xf32>
      %20 = arith.cmpf oge, %18, %19 : vector<8x64xf32>
      %cst_17 = arith.constant 2.000000e-01 : f32
      %21 = vector.broadcast %cst_17 : f32 to vector<8x64xf32>
      %22 = arith.mulf %21, %18 : vector<8x64xf32>
      %23 = arith.select %20, %18, %22 : vector<8x64xi1>, vector<8x64xf32>
      %c0_18 = arith.constant 0 : index
      %c0_19 = arith.constant 0 : index
      %24 = vector.load %arg7[%c0_18, %c0_19] : memref<8x64xf32, #tpu.memory_space<vmem>>, vector<8x64xf32>
      tpu.vector_store %arg7[%c0_18, %c0_19], %23 {strides = array<i32>} : memref<8x64xf32, #tpu.memory_space<vmem>>, vector<8x64xf32>,
    } else {
    }
    return
  }
  func.func @transform_0(%arg0: i32, %arg1: i32, %arg2: i32) -> (i32, i32) {
    %c0_i32 = arith.constant 0 : i32
    return %arg0, %arg2 : i32, i32
  }
  func.func @transform_1(%arg0: i32, %arg1: i32, %arg2: i32) -> (i32, i32) {
    %c0_i32 = arith.constant 0 : i32
    return %arg2, %arg1 : i32, i32
  }
  func.func @transform_2(%arg0: i32, %arg1: i32, %arg2: i32) -> (i32, i32) {
    %c0_i32 = arith.constant 0 : i32
    %c0_i32_0 = arith.constant 0 : i32
    return %c0_i32, %arg1 : i32, i32
  }
  func.func @transform_3(%arg0: i32, %arg1: i32, %arg2: i32) -> (i32, i32) {
    %c0_i32 = arith.constant 0 : i32
    %c0_i32_0 = arith.constant 0 : i32
    return %c0_i32, %arg1 : i32, i32
  }
  func.func @transform_4(%arg0: i32, %arg1: i32, %arg2: i32) -> (i32, i32) {
    %c0_i32 = arith.constant 0 : i32
    return %arg0, %arg1 : i32, i32
  }
}

module attributes {stable_mosaic.version = 11 : i64} {
  func.func @_fused_conv_gemm_kernel(%arg0: i32, %arg1: i32, %arg2: i32, %arg3: memref<2x512xf32, #tpu.memory_space<vmem>>, %arg4: memref<512x128xf32, #tpu.memory_space<vmem>>, %arg5: memref<1x128xf32, #tpu.memory_space<vmem>>, %arg6: memref<1x128xf32, #tpu.memory_space<vmem>>, %arg7: memref<2x128xf32, #tpu.memory_space<vmem>>, %arg8: memref<2x128xf32, #tpu.memory_space<vmem>>) attributes {dimension_semantics = [#tpu.dimension_semantics<parallel>, #tpu.dimension_semantics<parallel>, #tpu.dimension_semantics<arbitrary>], iteration_bounds = array<i64: 1, 1, 2>, scalar_prefetch = 0 : i64, scratch_operands = 1 : i64, tpu.core_type = #tpu.core_type<tc>, window_params = [{transform_indices = @transform_0, window_bounds = array<i64: 2, 512>}, {transform_indices = @transform_1, window_bounds = array<i64: 512, 128>}, {transform_indices = @transform_2, window_bounds = array<i64: 1, 128>}, {transform_indices = @transform_3, window_bounds = array<i64: 1, 128>}, {transform_indices = @transform_4, window_bounds = array<i64: 2, 128>}]} {
    %c0_i32 = arith.constant 0 : i32
    %0 = arith.cmpi eq, %arg2, %c0_i32 : i32
    %1 = arith.extui %0 : i1 to i32
    %c0_i32_0 = arith.constant 0 : i32
    %2 = arith.cmpi ne, %1, %c0_i32_0 : i32
    scf.if %2 {
      %cst_9 = arith.constant 0.000000e+00 : f32
      %12 = vector.broadcast %cst_9 : f32 to vector<2x128xf32>
      %c0_10 = arith.constant 0 : index
      %c0_11 = arith.constant 0 : index
      %13 = vector.load %arg8[%c0_10, %c0_11] : memref<2x128xf32, #tpu.memory_space<vmem>>, vector<2x128xf32>
      tpu.vector_store %arg8[%c0_10, %c0_11], %12 {strides = array<i32>} : memref<2x128xf32, #tpu.memory_space<vmem>>, vector<2x128xf32>,
    } else {
    }
    %c0 = arith.constant 0 : index
    %c0_1 = arith.constant 0 : index
    %3 = vector.load %arg8[%c0, %c0_1] : memref<2x128xf32, #tpu.memory_space<vmem>>, vector<2x128xf32>
    %c0_2 = arith.constant 0 : index
    %c0_3 = arith.constant 0 : index
    %4 = vector.load %arg3[%c0_2, %c0_3] : memref<2x512xf32, #tpu.memory_space<vmem>>, vector<2x512xf32>
    %c0_4 = arith.constant 0 : index
    %c0_5 = arith.constant 0 : index
    %5 = vector.load %arg4[%c0_4, %c0_5] : memref<512x128xf32, #tpu.memory_space<vmem>>, vector<512x128xf32>
    %cst = arith.constant dense<0.000000e+00> : vector<2x128xf32>
    %6 = tpu.matmul %4, %5, %cst {dimension_numbers = #tpu.dot_dimension_numbers<[1], [0], [0], [1], [0, 0, 1, 1], [], []>} : vector<2x512xf32>, vector<512x128xf32>, vector<2x128xf32> -> vector<2x128xf32>
    %7 = arith.addf %3, %6 : vector<2x128xf32>
    %c0_6 = arith.constant 0 : index
    %c0_7 = arith.constant 0 : index
    %8 = vector.load %arg8[%c0_6, %c0_7] : memref<2x128xf32, #tpu.memory_space<vmem>>, vector<2x128xf32>
    tpu.vector_store %arg8[%c0_6, %c0_7], %7 {strides = array<i32>} : memref<2x128xf32, #tpu.memory_space<vmem>>, vector<2x128xf32>,
    %c1_i32 = arith.constant 1 : i32
    %9 = arith.cmpi eq, %arg2, %c1_i32 : i32
    %10 = arith.extui %9 : i1 to i32
    %c0_i32_8 = arith.constant 0 : i32
    %11 = arith.cmpi ne, %10, %c0_i32_8 : i32
    scf.if %11 {
      %c0_9 = arith.constant 0 : index
      %c0_10 = arith.constant 0 : index
      %12 = vector.load %arg8[%c0_9, %c0_10] : memref<2x128xf32, #tpu.memory_space<vmem>>, vector<2x128xf32>
      %c0_11 = arith.constant 0 : index
      %c0_12 = arith.constant 0 : index
      %13 = vector.load %arg5[%c0_11, %c0_12] : memref<1x128xf32, #tpu.memory_space<vmem>>, vector<1x128xf32>
      %14 = vector.broadcast %13 : vector<1x128xf32> to vector<2x128xf32>
      %15 = arith.mulf %12, %14 : vector<2x128xf32>
      %c0_13 = arith.constant 0 : index
      %c0_14 = arith.constant 0 : index
      %16 = vector.load %arg6[%c0_13, %c0_14] : memref<1x128xf32, #tpu.memory_space<vmem>>, vector<1x128xf32>
      %17 = vector.broadcast %16 : vector<1x128xf32> to vector<2x128xf32>
      %18 = arith.addf %15, %17 : vector<2x128xf32>
      %cst_15 = arith.constant 0.000000e+00 : f32
      %19 = vector.broadcast %cst_15 : f32 to vector<2x128xf32>
      %20 = arith.cmpf oge, %18, %19 : vector<2x128xf32>
      %cst_16 = arith.constant 2.000000e-01 : f32
      %21 = vector.broadcast %cst_16 : f32 to vector<2x128xf32>
      %22 = arith.mulf %21, %18 : vector<2x128xf32>
      %23 = arith.select %20, %18, %22 : vector<2x128xi1>, vector<2x128xf32>
      %c0_17 = arith.constant 0 : index
      %c0_18 = arith.constant 0 : index
      %24 = vector.load %arg7[%c0_17, %c0_18] : memref<2x128xf32, #tpu.memory_space<vmem>>, vector<2x128xf32>
      tpu.vector_store %arg7[%c0_17, %c0_18], %23 {strides = array<i32>} : memref<2x128xf32, #tpu.memory_space<vmem>>, vector<2x128xf32>,
    } else {
    }
    return
  }
  func.func @transform_0(%arg0: i32, %arg1: i32, %arg2: i32) -> (i32, i32) {
    %c0_i32 = arith.constant 0 : i32
    return %arg0, %arg2 : i32, i32
  }
  func.func @transform_1(%arg0: i32, %arg1: i32, %arg2: i32) -> (i32, i32) {
    %c0_i32 = arith.constant 0 : i32
    return %arg2, %arg1 : i32, i32
  }
  func.func @transform_2(%arg0: i32, %arg1: i32, %arg2: i32) -> (i32, i32) {
    %c0_i32 = arith.constant 0 : i32
    %c0_i32_0 = arith.constant 0 : i32
    return %c0_i32, %arg1 : i32, i32
  }
  func.func @transform_3(%arg0: i32, %arg1: i32, %arg2: i32) -> (i32, i32) {
    %c0_i32 = arith.constant 0 : i32
    %c0_i32_0 = arith.constant 0 : i32
    return %c0_i32, %arg1 : i32, i32
  }
  func.func @transform_4(%arg0: i32, %arg1: i32, %arg2: i32) -> (i32, i32) {
    %c0_i32 = arith.constant 0 : i32
    return %arg0, %arg1 : i32, i32
  }
}

module attributes {stable_mosaic.version = 11 : i64} {
  func.func @_fused_conv_gemm_kernel(%arg0: i32, %arg1: i32, %arg2: i32, %arg3: memref<2x384xf32, #tpu.memory_space<vmem>>, %arg4: memref<384x64xf32, #tpu.memory_space<vmem>>, %arg5: memref<1x64xf32, #tpu.memory_space<vmem>>, %arg6: memref<1x64xf32, #tpu.memory_space<vmem>>, %arg7: memref<2x64xf32, #tpu.memory_space<vmem>>, %arg8: memref<2x64xf32, #tpu.memory_space<vmem>>) attributes {dimension_semantics = [#tpu.dimension_semantics<parallel>, #tpu.dimension_semantics<parallel>, #tpu.dimension_semantics<arbitrary>], iteration_bounds = array<i64: 1, 1, 3>, scalar_prefetch = 0 : i64, scratch_operands = 1 : i64, tpu.core_type = #tpu.core_type<tc>, window_params = [{transform_indices = @transform_0, window_bounds = array<i64: 2, 384>}, {transform_indices = @transform_1, window_bounds = array<i64: 384, 64>}, {transform_indices = @transform_2, window_bounds = array<i64: 1, 64>}, {transform_indices = @transform_3, window_bounds = array<i64: 1, 64>}, {transform_indices = @transform_4, window_bounds = array<i64: 2, 64>}]} {
    %c0_i32 = arith.constant 0 : i32
    %0 = arith.cmpi eq, %arg2, %c0_i32 : i32
    %1 = arith.extui %0 : i1 to i32
    %c0_i32_0 = arith.constant 0 : i32
    %2 = arith.cmpi ne, %1, %c0_i32_0 : i32
    scf.if %2 {
      %cst_9 = arith.constant 0.000000e+00 : f32
      %12 = vector.broadcast %cst_9 : f32 to vector<2x64xf32>
      %c0_10 = arith.constant 0 : index
      %c0_11 = arith.constant 0 : index
      %13 = vector.load %arg8[%c0_10, %c0_11] : memref<2x64xf32, #tpu.memory_space<vmem>>, vector<2x64xf32>
      tpu.vector_store %arg8[%c0_10, %c0_11], %12 {strides = array<i32>} : memref<2x64xf32, #tpu.memory_space<vmem>>, vector<2x64xf32>,
    } else {
    }
    %c0 = arith.constant 0 : index
    %c0_1 = arith.constant 0 : index
    %3 = vector.load %arg8[%c0, %c0_1] : memref<2x64xf32, #tpu.memory_space<vmem>>, vector<2x64xf32>
    %c0_2 = arith.constant 0 : index
    %c0_3 = arith.constant 0 : index
    %4 = vector.load %arg3[%c0_2, %c0_3] : memref<2x384xf32, #tpu.memory_space<vmem>>, vector<2x384xf32>
    %c0_4 = arith.constant 0 : index
    %c0_5 = arith.constant 0 : index
    %5 = vector.load %arg4[%c0_4, %c0_5] : memref<384x64xf32, #tpu.memory_space<vmem>>, vector<384x64xf32>
    %cst = arith.constant dense<0.000000e+00> : vector<2x64xf32>
    %6 = tpu.matmul %4, %5, %cst {dimension_numbers = #tpu.dot_dimension_numbers<[1], [0], [0], [1], [0, 0, 1, 1], [], []>} : vector<2x384xf32>, vector<384x64xf32>, vector<2x64xf32> -> vector<2x64xf32>
    %7 = arith.addf %3, %6 : vector<2x64xf32>
    %c0_6 = arith.constant 0 : index
    %c0_7 = arith.constant 0 : index
    %8 = vector.load %arg8[%c0_6, %c0_7] : memref<2x64xf32, #tpu.memory_space<vmem>>, vector<2x64xf32>
    tpu.vector_store %arg8[%c0_6, %c0_7], %7 {strides = array<i32>} : memref<2x64xf32, #tpu.memory_space<vmem>>, vector<2x64xf32>,
    %c2_i32 = arith.constant 2 : i32
    %9 = arith.cmpi eq, %arg2, %c2_i32 : i32
    %10 = arith.extui %9 : i1 to i32
    %c0_i32_8 = arith.constant 0 : i32
    %11 = arith.cmpi ne, %10, %c0_i32_8 : i32
    scf.if %11 {
      %c0_9 = arith.constant 0 : index
      %c0_10 = arith.constant 0 : index
      %12 = vector.load %arg8[%c0_9, %c0_10] : memref<2x64xf32, #tpu.memory_space<vmem>>, vector<2x64xf32>
      %c0_11 = arith.constant 0 : index
      %c0_12 = arith.constant 0 : index
      %13 = vector.load %arg5[%c0_11, %c0_12] : memref<1x64xf32, #tpu.memory_space<vmem>>, vector<1x64xf32>
      %14 = vector.broadcast %13 : vector<1x64xf32> to vector<2x64xf32>
      %15 = arith.mulf %12, %14 : vector<2x64xf32>
      %c0_13 = arith.constant 0 : index
      %c0_14 = arith.constant 0 : index
      %16 = vector.load %arg6[%c0_13, %c0_14] : memref<1x64xf32, #tpu.memory_space<vmem>>, vector<1x64xf32>
      %17 = vector.broadcast %16 : vector<1x64xf32> to vector<2x64xf32>
      %18 = arith.addf %15, %17 : vector<2x64xf32>
      %cst_15 = arith.constant 0.000000e+00 : f32
      %19 = vector.broadcast %cst_15 : f32 to vector<2x64xf32>
      %20 = arith.cmpf oge, %18, %19 : vector<2x64xf32>
      %cst_16 = arith.constant 2.000000e-01 : f32
      %21 = vector.broadcast %cst_16 : f32 to vector<2x64xf32>
      %22 = arith.mulf %21, %18 : vector<2x64xf32>
      %23 = arith.select %20, %18, %22 : vector<2x64xi1>, vector<2x64xf32>
      %c0_17 = arith.constant 0 : index
      %c0_18 = arith.constant 0 : index
      %24 = vector.load %arg7[%c0_17, %c0_18] : memref<2x64xf32, #tpu.memory_space<vmem>>, vector<2x64xf32>
      tpu.vector_store %arg7[%c0_17, %c0_18], %23 {strides = array<i32>} : memref<2x64xf32, #tpu.memory_space<vmem>>, vector<2x64xf32>,
    } else {
    }
    return
  }
  func.func @transform_0(%arg0: i32, %arg1: i32, %arg2: i32) -> (i32, i32) {
    %c0_i32 = arith.constant 0 : i32
    return %arg0, %arg2 : i32, i32
  }
  func.func @transform_1(%arg0: i32, %arg1: i32, %arg2: i32) -> (i32, i32) {
    %c0_i32 = arith.constant 0 : i32
    return %arg2, %arg1 : i32, i32
  }
  func.func @transform_2(%arg0: i32, %arg1: i32, %arg2: i32) -> (i32, i32) {
    %c0_i32 = arith.constant 0 : i32
    %c0_i32_0 = arith.constant 0 : i32
    return %c0_i32, %arg1 : i32, i32
  }
  func.func @transform_3(%arg0: i32, %arg1: i32, %arg2: i32) -> (i32, i32) {
    %c0_i32 = arith.constant 0 : i32
    %c0_i32_0 = arith.constant 0 : i32
    return %c0_i32, %arg1 : i32, i32
  }
  func.func @transform_4(%arg0: i32, %arg1: i32, %arg2: i32) -> (i32, i32) {
    %c0_i32 = arith.constant 0 : i32
    return %arg0, %arg1 : i32, i32
  }
}

module attributes {stable_mosaic.version = 11 : i64} {
  func.func @_fused_conv_gemm_kernel(%arg0: i32, %arg1: i32, %arg2: i32, %arg3: memref<2x576xf32, #tpu.memory_space<vmem>>, %arg4: memref<576x32xf32, #tpu.memory_space<vmem>>, %arg5: memref<1x32xf32, #tpu.memory_space<vmem>>, %arg6: memref<1x32xf32, #tpu.memory_space<vmem>>, %arg7: memref<2x32xf32, #tpu.memory_space<vmem>>, %arg8: memref<2x32xf32, #tpu.memory_space<vmem>>) attributes {dimension_semantics = [#tpu.dimension_semantics<parallel>, #tpu.dimension_semantics<parallel>, #tpu.dimension_semantics<arbitrary>], iteration_bounds = array<i64: 1, 1, 1>, scalar_prefetch = 0 : i64, scratch_operands = 1 : i64, tpu.core_type = #tpu.core_type<tc>, window_params = [{transform_indices = @transform_0, window_bounds = array<i64: 2, 576>}, {transform_indices = @transform_1, window_bounds = array<i64: 576, 32>}, {transform_indices = @transform_2, window_bounds = array<i64: 1, 32>}, {transform_indices = @transform_3, window_bounds = array<i64: 1, 32>}, {transform_indices = @transform_4, window_bounds = array<i64: 2, 32>}]} {
    %c0_i32 = arith.constant 0 : i32
    %0 = arith.cmpi eq, %arg2, %c0_i32 : i32
    %1 = arith.extui %0 : i1 to i32
    %c0_i32_0 = arith.constant 0 : i32
    %2 = arith.cmpi ne, %1, %c0_i32_0 : i32
    scf.if %2 {
      %cst_10 = arith.constant 0.000000e+00 : f32
      %12 = vector.broadcast %cst_10 : f32 to vector<2x32xf32>
      %c0_11 = arith.constant 0 : index
      %c0_12 = arith.constant 0 : index
      %13 = vector.load %arg8[%c0_11, %c0_12] : memref<2x32xf32, #tpu.memory_space<vmem>>, vector<2x32xf32>
      tpu.vector_store %arg8[%c0_11, %c0_12], %12 {strides = array<i32>} : memref<2x32xf32, #tpu.memory_space<vmem>>, vector<2x32xf32>,
    } else {
    }
    %c0 = arith.constant 0 : index
    %c0_1 = arith.constant 0 : index
    %3 = vector.load %arg8[%c0, %c0_1] : memref<2x32xf32, #tpu.memory_space<vmem>>, vector<2x32xf32>
    %c0_2 = arith.constant 0 : index
    %c0_3 = arith.constant 0 : index
    %4 = vector.load %arg3[%c0_2, %c0_3] : memref<2x576xf32, #tpu.memory_space<vmem>>, vector<2x576xf32>
    %c0_4 = arith.constant 0 : index
    %c0_5 = arith.constant 0 : index
    %5 = vector.load %arg4[%c0_4, %c0_5] : memref<576x32xf32, #tpu.memory_space<vmem>>, vector<576x32xf32>
    %cst = arith.constant dense<0.000000e+00> : vector<2x32xf32>
    %6 = tpu.matmul %4, %5, %cst {dimension_numbers = #tpu.dot_dimension_numbers<[1], [0], [0], [1], [0, 0, 1, 1], [], []>} : vector<2x576xf32>, vector<576x32xf32>, vector<2x32xf32> -> vector<2x32xf32>
    %7 = arith.addf %3, %6 : vector<2x32xf32>
    %c0_6 = arith.constant 0 : index
    %c0_7 = arith.constant 0 : index
    %8 = vector.load %arg8[%c0_6, %c0_7] : memref<2x32xf32, #tpu.memory_space<vmem>>, vector<2x32xf32>
    tpu.vector_store %arg8[%c0_6, %c0_7], %7 {strides = array<i32>} : memref<2x32xf32, #tpu.memory_space<vmem>>, vector<2x32xf32>,
    %c0_i32_8 = arith.constant 0 : i32
    %9 = arith.cmpi eq, %arg2, %c0_i32_8 : i32
    %10 = arith.extui %9 : i1 to i32
    %c0_i32_9 = arith.constant 0 : i32
    %11 = arith.cmpi ne, %10, %c0_i32_9 : i32
    scf.if %11 {
      %c0_10 = arith.constant 0 : index
      %c0_11 = arith.constant 0 : index
      %12 = vector.load %arg8[%c0_10, %c0_11] : memref<2x32xf32, #tpu.memory_space<vmem>>, vector<2x32xf32>
      %c0_12 = arith.constant 0 : index
      %c0_13 = arith.constant 0 : index
      %13 = vector.load %arg5[%c0_12, %c0_13] : memref<1x32xf32, #tpu.memory_space<vmem>>, vector<1x32xf32>
      %14 = vector.broadcast %13 : vector<1x32xf32> to vector<2x32xf32>
      %15 = arith.mulf %12, %14 : vector<2x32xf32>
      %c0_14 = arith.constant 0 : index
      %c0_15 = arith.constant 0 : index
      %16 = vector.load %arg6[%c0_14, %c0_15] : memref<1x32xf32, #tpu.memory_space<vmem>>, vector<1x32xf32>
      %17 = vector.broadcast %16 : vector<1x32xf32> to vector<2x32xf32>
      %18 = arith.addf %15, %17 : vector<2x32xf32>
      %cst_16 = arith.constant 0.000000e+00 : f32
      %19 = vector.broadcast %cst_16 : f32 to vector<2x32xf32>
      %20 = arith.cmpf oge, %18, %19 : vector<2x32xf32>
      %cst_17 = arith.constant 2.000000e-01 : f32
      %21 = vector.broadcast %cst_17 : f32 to vector<2x32xf32>
      %22 = arith.mulf %21, %18 : vector<2x32xf32>
      %23 = arith.select %20, %18, %22 : vector<2x32xi1>, vector<2x32xf32>
      %c0_18 = arith.constant 0 : index
      %c0_19 = arith.constant 0 : index
      %24 = vector.load %arg7[%c0_18, %c0_19] : memref<2x32xf32, #tpu.memory_space<vmem>>, vector<2x32xf32>
      tpu.vector_store %arg7[%c0_18, %c0_19], %23 {strides = array<i32>} : memref<2x32xf32, #tpu.memory_space<vmem>>, vector<2x32xf32>,
    } else {
    }
    return
  }
  func.func @transform_0(%arg0: i32, %arg1: i32, %arg2: i32) -> (i32, i32) {
    %c0_i32 = arith.constant 0 : i32
    return %arg0, %arg2 : i32, i32
  }
  func.func @transform_1(%arg0: i32, %arg1: i32, %arg2: i32) -> (i32, i32) {
    %c0_i32 = arith.constant 0 : i32
    return %arg2, %arg1 : i32, i32
  }
  func.func @transform_2(%arg0: i32, %arg1: i32, %arg2: i32) -> (i32, i32) {
    %c0_i32 = arith.constant 0 : i32
    %c0_i32_0 = arith.constant 0 : i32
    return %c0_i32, %arg1 : i32, i32
  }
  func.func @transform_3(%arg0: i32, %arg1: i32, %arg2: i32) -> (i32, i32) {
    %c0_i32 = arith.constant 0 : i32
    %c0_i32_0 = arith.constant 0 : i32
    return %c0_i32, %arg1 : i32, i32
  }
  func.func @transform_4(%arg0: i32, %arg1: i32, %arg2: i32) -> (i32, i32) {
    %c0_i32 = arith.constant 0 : i32
    return %arg0, %arg1 : i32, i32
  }
}

</mosaic_0001>

<bundles_post_ra>
// kernel: _lambda_.10
= control target key start
LH: loop header
LB: loop body
LE: loop exit
PB: predicated region body
PF: predicated region fallthrough
CT: control target
= control target key end

     0   :  { %s2151_s15 = smov 0   ;;  %s2153_s16 = smov 0   ;;  %s2947_s0 = inlined_call_operand.vmem [shape: f32[2048,48], index: 0, kind: input, shape index: {}]   ;;  %s2948_s1 = inlined_call_operand.vmem [shape: f32[48,4], index: 1, kind: input, shape index: {}]   ;;  %s2949_s2 = inlined_call_operand.vmem [shape: f32[1,4], index: 2, kind: input, shape index: {}]   ;;  %s2950_s3 = inlined_call_operand.vmem [shape: f32[1,4], index: 3, kind: input, shape index: {}]   ;;  %s2951_s4 = inlined_call_operand.vmem [shape: f32[2048,4], index: 4, kind: output, shape index: {}]  }
   0x1   :  { %s2155_s17 = smov 0  }
   0x2 LB: > { %s33_s18 = sadd.s32 1, %s2119_s16  ;;  %p1805_p0 = scmp.ge.s32.totalorder %s2123_s17, 1  ;;  %s2123_s17 = sphi %s2155_s17, %s14_s17   ;;  %s2119_s16 = sphi %s2153_s16, %s2954_s16   ;;  %s2115_s15 = sphi %s2151_s15, %s2953_s15  }
   0x3   : > { %p35_p1 = scmp.ge.s32.totalorder %s33_s18, 4  ;;  %p221_p2 = scmp.lt.s32.totalorder %s2123_s17, 5 }
   0x5   : > { %s2956_s18 = smov (%p35_p1, %s33_s18), 0  ;;  %p222_p3 = pnand %p1805_p0, %p221_p2 }
   0x6   : > { %v497_v0 = vld [vmem:[%s2948_s1] sm:$0xff] (!%p222_p3)  ;;  %v498_v1 = vld [vmem:[%s2948_s1 + $0x8] sm:$0xff] (!%p222_p3)  ;;  %v499_v2 = vld [vmem:[%s2948_s1 + $0x10] sm:$0xff] (!%p222_p3)  ;;  %s1806_s25 = sshll.u32 (!%p222_p3), %s2115_s15, 6  ;;  %vm304_vm0 = vcmask (!%p222_p3), 31744   ;;  %v2125_v8 = vmov (!%p222_p3), 0.0  }
   0x7   : > { %225 = sbr.rel (%p222_p3) target bundleno = 351 (0x15f), region = 36  ;;  %v2181_v3 = vpack.c.bf16 (!%p222_p3), %v498_v1, %v497_v0  ;;  %v500_v4 = vld [vmem:[%s2948_s1 + $0x18] sm:$0xff] (!%p222_p3)  ;;  %p2188_p4 = scmp.lt.s32.totalorder (!%p222_p3), %s1806_s25, 255  ;;  %v2197_v6 = vld [vmem:[%s2948_s1 + $0x20] sm:$0xff] (!%p222_p3)  ;;  %v2202_v7 = vld [vmem:[%s2948_s1 + $0x28] sm:$0xff] (!%p222_p3)  ;;  %306 = vst.msk [vmem:[#allocation2 + $0x8] sm:$0xff] (!%p222_p3), %vm304_vm0, %v2125_v8 }
   0x8   : > { %v2192_v5 = vpack.c.bf16 (!%p222_p3), %v500_v4, %v499_v2  ;;  %305 = vst.msk [vmem:[#allocation2] sm:$0xff] (!%p222_p3), %vm304_vm0, %v2125_v8  ;;  %307 = vst.msk [vmem:[#allocation2 + $0x10] sm:$0xff] (!%p222_p3), %vm304_vm0, %v2125_v8  ;;  %v2064_v9 = vpack.c.bf16 (!%p222_p3), %v2202_v7, %v2197_v6  ;;  %vm503_vm1 = vcmask (!%p222_p3), 392192  }
   0x9   : > { %308 = vst.msk [vmem:[#allocation2 + $0x18] sm:$0xff] (!%p222_p3), %vm304_vm0, %v2125_v8  ;;  %309 = vst.msk [vmem:[#allocation2 + $0x20] sm:$0xff] (!%p222_p3), %vm304_vm0, %v2125_v8  ;;  %2057 = vmatprep.subr.bf16.mxu0 (!%p222_p3), %v2181_v3  ;;  %2068 = vmatprep.subr.bf16.mxu1 (!%p222_p3), %v2181_v3 }
   0xa   : > { %310 = vst.msk [vmem:[#allocation2 + $0x28] sm:$0xff] (!%p222_p3), %vm304_vm0, %v2125_v8  ;;  %311 = vst.msk [vmem:[#allocation2 + $0x30] sm:$0xff] (!%p222_p3), %vm304_vm0, %v2125_v8  ;;  %2059 = vmatpush3.bf16.msra.mxu0 (!%p222_p3), %v2181_v3  ;;  %2071 = vmatpush3.bf16.msra.mxu1 (!%p222_p3), %v2181_v3 }
   0xb   : > { %312 = vst.msk [vmem:[#allocation2 + $0x38] sm:$0xff] (!%p222_p3), %vm304_vm0, %v2125_v8  ;;  %313 = vst.msk [vmem:[#allocation2 + $0x40] sm:$0xff] (!%p222_p3), %vm304_vm0, %v2125_v8  ;;  %2061 = vmatprep.subr.bf16.mxu0 (!%p222_p3), %v2192_v5  ;;  %2069 = vmatprep.subr.bf16.mxu1 (!%p222_p3), %v2192_v5 }
   0xc   : > { %314 = vst.msk [vmem:[#allocation2 + $0x48] sm:$0xff] (!%p222_p3), %vm304_vm0, %v2125_v8  ;;  %315 = vst.msk [vmem:[#allocation2 + $0x50] sm:$0xff] (!%p222_p3), %vm304_vm0, %v2125_v8 }
   0xd   : > { %316 = vst.msk [vmem:[#allocation2 + $0x58] sm:$0xff] (!%p222_p3), %vm304_vm0, %v2125_v8  ;;  %317 = vst.msk [vmem:[#allocation2 + $0x60] sm:$0xff] (!%p222_p3), %vm304_vm0, %v2125_v8 }
   0xe   : > { %318 = vst.msk [vmem:[#allocation2 + $0x68] sm:$0xff] %vm304_vm0, %v2125_v8  ;;  %319 = vst.msk [vmem:[#allocation2 + $0x70] sm:$0xff] %vm304_vm0, %v2125_v8  ;;  %s2958_s25 = smov (!%p2188_p4, %s1806_s25), 255  ;;  %2063 = vmatpush3.bf16.msra.mxu0 %v2192_v5  ;;  %2072 = vmatpush3.bf16.msra.mxu1 %v2192_v5 }
   0xf   : > { %320 = vst.msk [vmem:[#allocation2 + $0x78] sm:$0xff] %vm304_vm0, %v2125_v8  ;;  %321 = vst.msk [vmem:[#allocation2 + $0x80] sm:$0xff] %vm304_vm0, %v2125_v8  ;;  %s1807_s7 = sshll.u32 %s2958_s25, 3  ;;  %2065 = vmatprep.subr.bf16.mxu0 %v2064_v9  ;;  %2070 = vmatprep.subr.bf16.mxu1 %v2064_v9 }
  0x10   : > { %322 = vst.msk [vmem:[#allocation2 + $0x88] sm:$0xff] %vm304_vm0, %v2125_v8  ;;  %323 = vst.msk [vmem:[#allocation2 + $0x90] sm:$0xff] %vm304_vm0, %v2125_v8  ;;  %s2352_s10 = scalar_lea.vmem %s2947_s0, %s1807_s7  ;;  %s2519_s20 = scalar_lea.vmem %s2951_s4, %s1807_s7 }
  0x11   : > { %324 = vst.msk [vmem:[#allocation2 + $0x98] sm:$0xff] %vm304_vm0, %v2125_v8  ;;  %325 = vst.msk [vmem:[#allocation2 + $0xa0] sm:$0xff] %vm304_vm0, %v2125_v8  ;;  %v433_v10 = vld [vmem:[%s2352_s10] sm:$0xff]  ;;  %v434_v12 = vld [vmem:[%s2352_s10 + $0x8] sm:$0xff] }
  0x12   : > { %326 = vst.msk [vmem:[#allocation2 + $0xa8] sm:$0xff] %vm304_vm0, %v2125_v8  ;;  %327 = vst.msk [vmem:[#allocation2 + $0xb0] sm:$0xff] %vm304_vm0, %v2125_v8  ;;  %v465_v11 = vld [vmem:[%s2352_s10 + $0x100] sm:$0xff]  ;;  %1960 = vmatprep.mubr.msk.f32.mxu0 %vm503_vm1, %v433_v10  ;;  %2067 = vmatpush3.bf16.msra.mxu0 %v2064_v9  ;;  %v466_v13 = vld [vmem:[%s2352_s10 + $0x108] sm:$0xff] }
  0x13   : > { %328 = vst.msk [vmem:[#allocation2 + $0xb8] sm:$0xff] %vm304_vm0, %v2125_v8  ;;  %329 = vst.msk [vmem:[#allocation2 + $0xc0] sm:$0xff] %vm304_vm0, %v2125_v8  ;;  %2008 = vmatprep.mubr.msk.f32.mxu1 %vm503_vm1, %v465_v11  ;;  %2073 = vmatpush3.bf16.msra.mxu1 %v2064_v9  ;;  %v435_v14 = vld [vmem:[%s2352_s10 + $0x10] sm:$0xff]  ;;  %v436_v16 = vld [vmem:[%s2352_s10 + $0x18] sm:$0xff] }
  0x14   : > { %330 = vst.msk [vmem:[#allocation2 + $0xc8] sm:$0xff] %vm304_vm0, %v2125_v8  ;;  %331 = vst.msk [vmem:[#allocation2 + $0xd0] sm:$0xff] %vm304_vm0, %v2125_v8  ;;  %v467_v15 = vld [vmem:[%s2352_s10 + $0x110] sm:$0xff]  ;;  %v468_v17 = vld [vmem:[%s2352_s10 + $0x118] sm:$0xff] }
  0x15   : > { %332 = vst.msk [vmem:[#allocation2 + $0xd8] sm:$0xff] %vm304_vm0, %v2125_v8  ;;  %333 = vst.msk [vmem:[#allocation2 + $0xe0] sm:$0xff] %vm304_vm0, %v2125_v8  ;;  %1961 = vmatmul.mubr.msk.f32.vlgmr.msra.gmra.mrb[0].mxu0 %vm503_vm1, %v434_v12  ;;  %v437_v18 = vld [vmem:[%s2352_s10 + $0x20] sm:$0xff]  ;;  %v438_v20 = vld [vmem:[%s2352_s10 + $0x28] sm:$0xff] }
  0x16   : > { %334 = vst.msk [vmem:[#allocation2 + $0xe8] sm:$0xff] %vm304_vm0, %v2125_v8  ;;  %335 = vst.msk [vmem:[#allocation2 + $0xf0] sm:$0xff] %vm304_vm0, %v2125_v8  ;;  %2009 = vmatmul.mubr.msk.f32.vlgmr.msra.gmra.mrb[0].mxu1 %vm503_vm1, %v466_v13  ;;  %1963 = vmatprep.mubr.msk.f32.mxu0 %vm503_vm1, %v435_v14  ;;  %v469_v19 = vld [vmem:[%s2352_s10 + $0x120] sm:$0xff]  ;;  %v470_v21 = vld [vmem:[%s2352_s10 + $0x128] sm:$0xff] }
  0x17   : > { %336 = vst.msk [vmem:[#allocation2 + $0xf8] sm:$0xff] %vm304_vm0, %v2125_v8  ;;  %337 = vst.msk [vmem:[#allocation2 + $0x100] sm:$0xff] %vm304_vm0, %v2125_v8  ;;  %2011 = vmatprep.mubr.msk.f32.mxu1 %vm503_vm1, %v467_v15  ;;  %v439_v22 = vld [vmem:[%s2352_s10 + $0x30] sm:$0xff]  ;;  %v440_v24 = vld [vmem:[%s2352_s10 + $0x38] sm:$0xff] }
  0x18   : > { %338 = vst.msk [vmem:[#allocation2 + $0x108] sm:$0xff] %vm304_vm0, %v2125_v8  ;;  %339 = vst.msk [vmem:[#allocation2 + $0x110] sm:$0xff] %vm304_vm0, %v2125_v8  ;;  %v471_v23 = vld [vmem:[%s2352_s10 + $0x130] sm:$0xff]  ;;  %v472_v25 = vld [vmem:[%s2352_s10 + $0x138] sm:$0xff] }
  0x19   : > { %340 = vst.msk [vmem:[#allocation2 + $0x118] sm:$0xff] %vm304_vm0, %v2125_v8  ;;  %341 = vst.msk [vmem:[#allocation2 + $0x120] sm:$0xff] %vm304_vm0, %v2125_v8  ;;  %1964 = vmatmul.mubr.msk.f32.gmra.mrb[2].mxu0 %vm503_vm1, %v436_v16  ;;  %v441_v26 = vld [vmem:[%s2352_s10 + $0x40] sm:$0xff]  ;;  %v442_v28 = vld [vmem:[%s2352_s10 + $0x48] sm:$0xff] }
  0x1a   : > { %342 = vst.msk [vmem:[#allocation2 + $0x128] sm:$0xff] %vm304_vm0, %v2125_v8  ;;  %343 = vst.msk [vmem:[#allocation2 + $0x130] sm:$0xff] %vm304_vm0, %v2125_v8  ;;  %2012 = vmatmul.mubr.msk.f32.gmra.mrb[2].mxu1 %vm503_vm1, %v468_v17  ;;  %1966 = vmatprep.mubr.msk.f32.mxu0 %vm503_vm1, %v437_v18  ;;  %v473_v27 = vld [vmem:[%s2352_s10 + $0x140] sm:$0xff]  ;;  %v474_v29 = vld [vmem:[%s2352_s10 + $0x148] sm:$0xff] }
  0x1b   : > { %344 = vst.msk [vmem:[#allocation2 + $0x138] sm:$0xff] %vm304_vm0, %v2125_v8  ;;  %345 = vst.msk [vmem:[#allocation2 + $0x140] sm:$0xff] %vm304_vm0, %v2125_v8  ;;  %2014 = vmatprep.mubr.msk.f32.mxu1 %vm503_vm1, %v469_v19  ;;  %v443_v30 = vld [vmem:[%s2352_s10 + $0x50] sm:$0xff]  ;;  %v444_v32 = vld [vmem:[%s2352_s10 + $0x58] sm:$0xff] }
  0x1c   : > { %346 = vst.msk [vmem:[#allocation2 + $0x148] sm:$0xff] %vm304_vm0, %v2125_v8  ;;  %347 = vst.msk [vmem:[#allocation2 + $0x150] sm:$0xff] %vm304_vm0, %v2125_v8  ;;  %v475_v31 = vld [vmem:[%s2352_s10 + $0x150] sm:$0xff]  ;;  %v476_v33 = vld [vmem:[%s2352_s10 + $0x158] sm:$0xff] }
  0x1d   : > { %348 = vst.msk [vmem:[#allocation2 + $0x158] sm:$0xff] %vm304_vm0, %v2125_v8  ;;  %349 = vst.msk [vmem:[#allocation2 + $0x160] sm:$0xff] %vm304_vm0, %v2125_v8  ;;  %1967 = vmatmul.mubr.msk.f32.gmra.mrb[4].mxu0 %vm503_vm1, %v438_v20  ;;  %v445_v34 = vld [vmem:[%s2352_s10 + $0x60] sm:$0xff]  ;;  %v446_v36 = vld [vmem:[%s2352_s10 + $0x68] sm:$0xff] }
  0x1e   : > { %350 = vst.msk [vmem:[#allocation2 + $0x168] sm:$0xff] %vm304_vm0, %v2125_v8  ;;  %351 = vst.msk [vmem:[#allocation2 + $0x170] sm:$0xff] %vm304_vm0, %v2125_v8  ;;  %2015 = vmatmul.mubr.msk.f32.gmra.mrb[4].mxu1 %vm503_vm1, %v470_v21  ;;  %1969 = vmatprep.mubr.msk.f32.mxu0 %vm503_vm1, %v439_v22  ;;  %v477_v35 = vld [vmem:[%s2352_s10 + $0x160] sm:$0xff]  ;;  %v478_v37 = vld [vmem:[%s2352_s10 + $0x168] sm:$0xff] }
  0x1f   : > { %352 = vst.msk [vmem:[#allocation2 + $0x178] sm:$0xff] %vm304_vm0, %v2125_v8  ;;  %353 = vst.msk [vmem:[#allocation2 + $0x180] sm:$0xff] %vm304_vm0, %v2125_v8  ;;  %2017 = vmatprep.mubr.msk.f32.mxu1 %vm503_vm1, %v471_v23  ;;  %v447_v38 = vld [vmem:[%s2352_s10 + $0x70] sm:$0xff]  ;;  %v448_v40 = vld [vmem:[%s2352_s10 + $0x78] sm:$0xff] }
  0x20   : > { %354 = vst.msk [vmem:[#allocation2 + $0x188] sm:$0xff] %vm304_vm0, %v2125_v8  ;;  %355 = vst.msk [vmem:[#allocation2 + $0x190] sm:$0xff] %vm304_vm0, %v2125_v8  ;;  %v479_v39 = vld [vmem:[%s2352_s10 + $0x170] sm:$0xff]  ;;  %v480_v41 = vld [vmem:[%s2352_s10 + $0x178] sm:$0xff] }
  0x21   : > { %356 = vst.msk [vmem:[#allocation2 + $0x198] sm:$0xff] %vm304_vm0, %v2125_v8  ;;  %357 = vst.msk [vmem:[#allocation2 + $0x1a0] sm:$0xff] %vm304_vm0, %v2125_v8  ;;  %1970 = vmatmul.mubr.msk.f32.gmra.mrb[6].mxu0 %vm503_vm1, %v440_v24  ;;  %v449_v42 = vld [vmem:[%s2352_s10 + $0x80] sm:$0xff]  ;;  %v450_v44 = vld [vmem:[%s2352_s10 + $0x88] sm:$0xff] }
  0x22   : > { %358 = vst.msk [vmem:[#allocation2 + $0x1a8] sm:$0xff] %vm304_vm0, %v2125_v8  ;;  %359 = vst.msk [vmem:[#allocation2 + $0x1b0] sm:$0xff] %vm304_vm0, %v2125_v8  ;;  %2018 = vmatmul.mubr.msk.f32.gmra.mrb[6].mxu1 %vm503_vm1, %v472_v25  ;;  %1972 = vmatprep.mubr.msk.f32.mxu0 %vm503_vm1, %v441_v26  ;;  %v481_v43 = vld [vmem:[%s2352_s10 + $0x180] sm:$0xff]  ;;  %v482_v45 = vld [vmem:[%s2352_s10 + $0x188] sm:$0xff] }
  0x23   : > { %360 = vst.msk [vmem:[#allocation2 + $0x1b8] sm:$0xff] %vm304_vm0, %v2125_v8  ;;  %361 = vst.msk [vmem:[#allocation2 + $0x1c0] sm:$0xff] %vm304_vm0, %v2125_v8  ;;  %2020 = vmatprep.mubr.msk.f32.mxu1 %vm503_vm1, %v473_v27  ;;  %v451_v46 = vld [vmem:[%s2352_s10 + $0x90] sm:$0xff]  ;;  %v452_v48 = vld [vmem:[%s2352_s10 + $0x98] sm:$0xff] }
  0x24   : > { %362 = vst.msk [vmem:[#allocation2 + $0x1c8] sm:$0xff] %vm304_vm0, %v2125_v8  ;;  %363 = vst.msk [vmem:[#allocation2 + $0x1d0] sm:$0xff] %vm304_vm0, %v2125_v8  ;;  %v483_v47 = vld [vmem:[%s2352_s10 + $0x190] sm:$0xff]  ;;  %v484_v49 = vld [vmem:[%s2352_s10 + $0x198] sm:$0xff] }
  0x25   : > { %364 = vst.msk [vmem:[#allocation2 + $0x1d8] sm:$0xff] %vm304_vm0, %v2125_v8  ;;  %365 = vst.msk [vmem:[#allocation2 + $0x1e0] sm:$0xff] %vm304_vm0, %v2125_v8  ;;  %1973 = vmatmul.mubr.msk.f32.gmra.mrb[8].mxu0 %vm503_vm1, %v442_v28  ;;  %v453_v50 = vld [vmem:[%s2352_s10 + $0xa0] sm:$0xff]  ;;  %v454_v52 = vld [vmem:[%s2352_s10 + $0xa8] sm:$0xff] }
  0x26   : > { %366 = vst.msk [vmem:[#allocation2 + $0x1e8] sm:$0xff] %vm304_vm0, %v2125_v8  ;;  %367 = vst.msk [vmem:[#allocation2 + $0x1f0] sm:$0xff] %vm304_vm0, %v2125_v8  ;;  %2021 = vmatmul.mubr.msk.f32.gmra.mrb[8].mxu1 %vm503_vm1, %v474_v29  ;;  %1975 = vmatprep.mubr.msk.f32.mxu0 %vm503_vm1, %v443_v30  ;;  %v485_v51 = vld [vmem:[%s2352_s10 + $0x1a0] sm:$0xff]  ;;  %v486_v53 = vld [vmem:[%s2352_s10 + $0x1a8] sm:$0xff] }
  0x27   : > { %368 = vst.msk [vmem:[#allocation2 + $0x1f8] sm:$0xff] %vm304_vm0, %v2125_v8  ;;  %2023 = vmatprep.mubr.msk.f32.mxu1 %vm503_vm1, %v475_v31  ;;  %v455_v54 = vld [vmem:[%s2352_s10 + $0xb0] sm:$0xff]  ;;  %v456_v56 = vld [vmem:[%s2352_s10 + $0xb8] sm:$0xff]  ;;  %v457_v58 = vld [vmem:[%s2352_s10 + $0xc0] sm:$0xff] }
  0x28   : > { %v487_v55 = vld [vmem:[%s2352_s10 + $0x1b0] sm:$0xff]  ;;  %v488_v57 = vld [vmem:[%s2352_s10 + $0x1b8] sm:$0xff]  ;;  %v489_v59 = vld [vmem:[%s2352_s10 + $0x1c0] sm:$0xff] }
  0x29   : > { %1976 = vmatmul.mubr.msk.f32.gmra.mrb[10].mxu0 %vm503_vm1, %v444_v32  ;;  %v458_v60 = vld [vmem:[%s2352_s10 + $0xc8] sm:$0xff]  ;;  %v459_v62 = vld [vmem:[%s2352_s10 + $0xd0] sm:$0xff]  ;;  %v460_v0 = vld [vmem:[%s2352_s10 + $0xd8] sm:$0xff] }
  0x2a   : > { %2024 = vmatmul.mubr.msk.f32.gmra.mrb[10].mxu1 %vm503_vm1, %v476_v33  ;;  %1978 = vmatprep.mubr.msk.f32.mxu0 %vm503_vm1, %v445_v34  ;;  %v490_v61 = vld [vmem:[%s2352_s10 + $0x1c8] sm:$0xff]  ;;  %v491_v63 = vld [vmem:[%s2352_s10 + $0x1d0] sm:$0xff]  ;;  %v492_v1 = vld [vmem:[%s2352_s10 + $0x1d8] sm:$0xff] }
  0x2b   : > { %2026 = vmatprep.mubr.msk.f32.mxu1 %vm503_vm1, %v477_v35  ;;  %v461_v2 = vld [vmem:[%s2352_s10 + $0xe0] sm:$0xff]  ;;  %v462_v4 = vld [vmem:[%s2352_s10 + $0xe8] sm:$0xff]  ;;  %v463_v6 = vld [vmem:[%s2352_s10 + $0xf0] sm:$0xff] }
  0x2c   : > { %v493_v3 = vld [vmem:[%s2352_s10 + $0x1e0] sm:$0xff]  ;;  %v494_v5 = vld [vmem:[%s2352_s10 + $0x1e8] sm:$0xff]  ;;  %v495_v7 = vld [vmem:[%s2352_s10 + $0x1f0] sm:$0xff] }
  0x2d   : > { %1979 = vmatmul.mubr.msk.f32.gmra.mrb[12].mxu0 %vm503_vm1, %v446_v36  ;;  %v464_v8 = vld [vmem:[%s2352_s10 + $0xf8] sm:$0xff]  ;;  %v370_v10 = vld [vmem:[#allocation2 + $0x8] sm:$0xff]  ;;  %v369_v12 = vld [vmem:[#allocation2] sm:$0xff] }
  0x2e   : > { %2027 = vmatmul.mubr.msk.f32.gmra.mrb[12].mxu1 %vm503_vm1, %v478_v37  ;;  %1981 = vmatprep.mubr.msk.f32.mxu0 %vm503_vm1, %v447_v38  ;;  %v496_v9 = vld [vmem:[%s2352_s10 + $0x1f8] sm:$0xff]  ;;  %v402_v11 = vld [vmem:[#allocation2 + $0x108] sm:$0xff]  ;;  %v401_v13 = vld [vmem:[#allocation2 + $0x100] sm:$0xff] }
  0x2f   : > { %2029 = vmatprep.mubr.msk.f32.mxu1 %vm503_vm1, %v479_v39  ;;  %v372_v22 = vld [vmem:[#allocation2 + $0x18] sm:$0xff]  ;;  %v371_v24 = vld [vmem:[#allocation2 + $0x10] sm:$0xff]  ;;  %v374_v34 = vld [vmem:[#allocation2 + $0x28] sm:$0xff] }
  0x30   : > { %v404_v23 = vld [vmem:[#allocation2 + $0x118] sm:$0xff]  ;;  %v403_v25 = vld [vmem:[#allocation2 + $0x110] sm:$0xff]  ;;  %v406_v35 = vld [vmem:[#allocation2 + $0x128] sm:$0xff] }
  0x31   : > { %1982 = vmatmul.mubr.msk.f32.gmra.mrb[14].mxu0 %vm503_vm1, %v448_v40  ;;  %v373_v36 = vld [vmem:[#allocation2 + $0x20] sm:$0xff] }
  0x32   : > { %2030 = vmatmul.mubr.msk.f32.gmra.mrb[14].mxu1 %vm503_vm1, %v480_v41  ;;  %1984 = vmatprep.mubr.msk.f32.mxu0 %vm503_vm1, %v449_v42  ;;  %v405_v37 = vld [vmem:[#allocation2 + $0x120] sm:$0xff] }
  0x33   : > { %2032 = vmatprep.mubr.msk.f32.mxu1 %vm503_vm1, %v481_v43  ;;  %v2493_v38 = vld [vmem:[%s2949_s2] ss:$0 sm:$0xff] }
  0x34   : > { %v2500_v41 = vld [vmem:[%s2950_s3] ss:$0 sm:$0xff] }
  0x35   : > { %1985 = vmatmul.mubr.msk.f32.gmra.mrb[16].mxu0 %vm503_vm1, %v450_v44 }
  0x36   : > { %2033 = vmatmul.mubr.msk.f32.gmra.mrb[16].mxu1 %vm503_vm1, %v482_v45  ;;  %1987 = vmatprep.mubr.msk.f32.mxu0 %vm503_vm1, %v451_v46  ;;  %v376_v46 = vld [vmem:[#allocation2 + $0x38] sm:$0xff] }
  0x37   : > { %2035 = vmatprep.mubr.msk.f32.mxu1 %vm503_vm1, %v483_v47  ;;  %v408_v47 = vld [vmem:[#allocation2 + $0x138] sm:$0xff] }
  0x39   : > { %1988 = vmatmul.mubr.msk.f32.gmra.mrb[18].mxu0 %vm503_vm1, %v452_v48 }
  0x3a   : > { %2036 = vmatmul.mubr.msk.f32.gmra.mrb[18].mxu1 %vm503_vm1, %v484_v49  ;;  %1990 = vmatprep.mubr.msk.f32.mxu0 %vm503_vm1, %v453_v50 }
  0x3b   : > { %2038 = vmatprep.mubr.msk.f32.mxu1 %vm503_vm1, %v485_v51 }
  0x3d   : > { %1991 = vmatmul.mubr.msk.f32.gmra.mrb[20].mxu0 %vm503_vm1, %v454_v52  ;;  %v375_v52 = vld [vmem:[#allocation2 + $0x30] sm:$0xff] }
  0x3e   : > { %2039 = vmatmul.mubr.msk.f32.gmra.mrb[20].mxu1 %vm503_vm1, %v486_v53  ;;  %1993 = vmatprep.mubr.msk.f32.mxu0 %vm503_vm1, %v455_v54 }
  0x3f   : > { %2041 = vmatprep.mubr.msk.f32.mxu1 %vm503_vm1, %v487_v55 }
  0x41   : > { %1994 = vmatmul.mubr.msk.f32.gmra.mrb[22].mxu0 %vm503_vm1, %v456_v56 }
  0x42   : > { %2042 = vmatmul.mubr.msk.f32.gmra.mrb[22].mxu1 %vm503_vm1, %v488_v57  ;;  %1996 = vmatprep.mubr.msk.f32.mxu0 %vm503_vm1, %v457_v58  ;;  %v407_v57 = vld [vmem:[#allocation2 + $0x130] sm:$0xff] }
  0x43   : > { %2044 = vmatprep.mubr.msk.f32.mxu1 %vm503_vm1, %v489_v59 }
  0x45   : > { %1997 = vmatmul.mubr.msk.f32.gmra.mrb[24].mxu0 %vm503_vm1, %v458_v60 }
  0x46   : > { %2045 = vmatmul.mubr.msk.f32.gmra.mrb[24].mxu1 %vm503_vm1, %v490_v61  ;;  %1999 = vmatprep.mubr.msk.f32.mxu0 %vm503_vm1, %v459_v62 }
  0x47   : > { %2047 = vmatprep.mubr.msk.f32.mxu1 %vm503_vm1, %v491_v63 }
  0x49   : > { %2000 = vmatmul.mubr.msk.f32.gmra.mrb[26].mxu0 %vm503_vm1, %v460_v0 }
  0x4a   : > { %2048 = vmatmul.mubr.msk.f32.gmra.mrb[26].mxu1 %vm503_vm1, %v492_v1  ;;  %2002 = vmatprep.mubr.msk.f32.mxu0 %vm503_vm1, %v461_v2 }
  0x4b   : > { %2050 = vmatprep.mubr.msk.f32.mxu1 %vm503_vm1, %v493_v3 }
  0x4d   : > { %2003 = vmatmul.mubr.msk.f32.gmra.mrb[28].mxu0 %vm503_vm1, %v462_v4 }
  0x4e   : > { %2051 = vmatmul.mubr.msk.f32.gmra.mrb[28].mxu1 %vm503_vm1, %v494_v5  ;;  %2005 = vmatprep.mubr.msk.f32.mxu0 %vm503_vm1, %v463_v6 }
  0x4f   : > { %2053 = vmatprep.mubr.msk.f32.mxu1 %vm503_vm1, %v495_v7 }
  0x51   : > { %2006 = vmatmul.mubr.msk.f32.gmra.mrb[30].mxu0 %vm503_vm1, %v464_v8 }
  0x52   : > { %2054 = vmatmul.mubr.msk.f32.gmra.mrb[30].mxu1 %vm503_vm1, %v496_v9 }
  0xe8   : > { %v1962_v14 = vpop.f32.mrb[0].mxu0 }
  0xe9   : > { %v2010_v15 = vpop.f32.mrb[0].mxu1  ;;  %v1082_v16 = vadd.f32 %v1962_v14, %v370_v10  ;;  %v762_v18 = vpop.f32.mrb[1].mxu0 }
  0xea   : > { %v1114_v17 = vadd.f32 %v2010_v15, %v402_v11  ;;  %v922_v19 = vpop.f32.mrb[1].mxu1  ;;  %v1081_v20 = vadd.f32 %v762_v18, %v369_v12 }
  0xeb   : > { %v1113_v21 = vadd.f32 %v922_v19, %v401_v13  ;;  %1147 = vst.msk [vmem:[#allocation2 + $0x8] sm:$0xff] %vm304_vm0, %v1082_v16 }
  0xec   : > { %1179 = vst.msk [vmem:[#allocation2 + $0x108] sm:$0xff] %vm304_vm0, %v1114_v17  ;;  %1146 = vst.msk [vmem:[#allocation2] sm:$0xff] %vm304_vm0, %v1081_v20  ;;  %v1965_v26 = vpop.f32.mrb[2].mxu0 }
  0xed   : > { %1178 = vst.msk [vmem:[#allocation2 + $0x100] sm:$0xff] %vm304_vm0, %v1113_v21  ;;  %v2013_v27 = vpop.f32.mrb[2].mxu1  ;;  %v1084_v28 = vadd.f32 %v1965_v26, %v372_v22  ;;  %v772_v30 = vpop.f32.mrb[3].mxu0 }
  0xee   : > { %v1116_v29 = vadd.f32 %v2013_v27, %v404_v23  ;;  %v932_v31 = vpop.f32.mrb[3].mxu1  ;;  %v1083_v32 = vadd.f32 %v772_v30, %v371_v24 }
  0xef   : > { %v1115_v33 = vadd.f32 %v932_v31, %v403_v25  ;;  %1149 = vst.msk [vmem:[#allocation2 + $0x18] sm:$0xff] %vm304_vm0, %v1084_v28 }
  0xf0   : > { %1181 = vst.msk [vmem:[#allocation2 + $0x118] sm:$0xff] %vm304_vm0, %v1116_v29  ;;  %1148 = vst.msk [vmem:[#allocation2 + $0x10] sm:$0xff] %vm304_vm0, %v1083_v32  ;;  %v1968_v39 = vpop.f32.mrb[4].mxu0 }
  0xf1   : > { %1180 = vst.msk [vmem:[#allocation2 + $0x110] sm:$0xff] %vm304_vm0, %v1115_v33  ;;  %v2016_v40 = vpop.f32.mrb[4].mxu1  ;;  %v1086_v42 = vadd.f32 %v1968_v39, %v374_v34  ;;  %v782_v44 = vpop.f32.mrb[5].mxu0 }
  0xf2   : > { %v1118_v43 = vadd.f32 %v2016_v40, %v406_v35  ;;  %v942_v45 = vpop.f32.mrb[5].mxu1  ;;  %v1214_v48 = vld [vmem:[#allocation2 + $0x8] sm:$0xff]  ;;  %v1085_v50 = vadd.f32 %v782_v44, %v373_v36 }
  0xf3   : > { %v1246_v49 = vld [vmem:[#allocation2 + $0x108] sm:$0xff]  ;;  %v1117_v51 = vadd.f32 %v942_v45, %v405_v37  ;;  %v1285_v53 = vmul.f32 %v2493_v38, %v1214_v48  ;;  %v1213_v55 = vld [vmem:[#allocation2] sm:$0xff]  ;;  %1151 = vst.msk [vmem:[#allocation2 + $0x28] sm:$0xff] %vm304_vm0, %v1086_v42 }
  0xf4   : > { %v1317_v54 = vmul.f32 %v2493_v38, %v1246_v49  ;;  %v1245_v56 = vld [vmem:[#allocation2 + $0x100] sm:$0xff]  ;;  %1183 = vst.msk [vmem:[#allocation2 + $0x128] sm:$0xff] %vm304_vm0, %v1118_v43  ;;  %v1284_v58 = vmul.f32 %v2493_v38, %v1213_v55  ;;  %1150 = vst.msk [vmem:[#allocation2 + $0x20] sm:$0xff] %vm304_vm0, %v1085_v50  ;;  %v1971_v60 = vpop.f32.mrb[6].mxu0 }
  0xf5   : > { %v1316_v59 = vmul.f32 %v2493_v38, %v1245_v56  ;;  %1182 = vst.msk [vmem:[#allocation2 + $0x120] sm:$0xff] %vm304_vm0, %v1117_v51  ;;  %v2019_v61 = vpop.f32.mrb[6].mxu1  ;;  %v1356_v62 = vadd.f32 %v2500_v41, %v1285_v53  ;;  %v1088_v0 = vadd.f32 %v1971_v60, %v376_v46  ;;  %v792_v2 = vpop.f32.mrb[7].mxu0 }
  0xf6   : > { %v1388_v63 = vadd.f32 %v2500_v41, %v1317_v54  ;;  %v1120_v1 = vadd.f32 %v2019_v61, %v408_v47  ;;  %v952_v3 = vpop.f32.mrb[7].mxu1  ;;  %v1355_v4 = vadd.f32 %v2500_v41, %v1284_v58  ;;  %v1216_v6 = vld [vmem:[#allocation2 + $0x18] sm:$0xff]  ;;  %v1087_v8 = vadd.f32 %v792_v2, %v375_v52 }
  0xf7   : > { %v1387_v5 = vadd.f32 %v2500_v41, %v1316_v59  ;;  %v1248_v7 = vld [vmem:[#allocation2 + $0x118] sm:$0xff]  ;;  %v1119_v9 = vadd.f32 %v952_v3, %v407_v57  ;;  %vm1420_vm2 = vcmp.ge.f32.partialorder %v1356_v62, 0.0  ;;  %v1484_v10 = vmul.f32 0.2, %v1356_v62  ;;  %1153 = vst.msk [vmem:[#allocation2 + $0x38] sm:$0xff] %vm304_vm0, %v1088_v0  ;;  %v1215_v18 = vld [vmem:[#allocation2 + $0x10] sm:$0xff] }
  0xf8   : > { %vm1452_vm3 = vcmp.ge.f32.partialorder %v1388_v63, 0.0  ;;  %v1516_v11 = vmul.f32 0.2, %v1388_v63  ;;  %1185 = vst.msk [vmem:[#allocation2 + $0x138] sm:$0xff] %vm304_vm0, %v1120_v1  ;;  %vm1419_vm4 = vcmp.ge.f32.partialorder %v1355_v4, 0.0  ;;  %1152 = vst.msk [vmem:[#allocation2 + $0x30] sm:$0xff] %vm304_vm0, %v1087_v8  ;;  %v1287_v16 = vmul.f32 %v2493_v38, %v1216_v6 }
  0xf9   : > { %v1483_v12 = vmul.f32 0.2, %v1355_v4  ;;  %vm1451_vm5 = vcmp.ge.f32.partialorder %v1387_v5, 0.0  ;;  %v1515_v13 = vmul.f32 0.2, %v1387_v5  ;;  %1184 = vst.msk [vmem:[#allocation2 + $0x130] sm:$0xff] %vm304_vm0, %v1119_v9  ;;  %v1548_v14 = vsel %vm1420_vm2, %v1356_v62, %v1484_v10 }
  0xfa   : > { %v1580_v15 = vsel %vm1452_vm3, %v1388_v63, %v1516_v11  ;;  %v1319_v17 = vmul.f32 %v2493_v38, %v1248_v7  ;;  %v1247_v19 = vld [vmem:[#allocation2 + $0x110] sm:$0xff]  ;;  %v2527_v20 = vpop.f32.mrb[8].mxu0  ;;  %v2529_v21 = vpop.f32.mrb[8].mxu1  ;;  %1612 = vst.msk [vmem:[%s2519_s20 + $0x8] sm:$0xff] %vm304_vm0, %v1548_v14  ;;  %v1286_v24 = vmul.f32 %v2493_v38, %v1215_v18  ;;  %v1218_v26 = vld [vmem:[#allocation2 + $0x28] sm:$0xff]  ;;  %v1358_v30 = vadd.f32 %v2500_v41, %v1287_v16  ;;  %v377_v10 = vld [vmem:[#allocation2 + $0x40] sm:$0xff] }
  0xfb   : > { %1644 = vst.msk [vmem:[%s2519_s20 + $0x108] sm:$0xff] %vm304_vm0, %v1580_v15  ;;  %v1547_v22 = vsel %vm1419_vm4, %v1355_v4, %v1483_v12  ;;  %v1579_v23 = vsel %vm1451_vm5, %v1387_v5, %v1515_v13  ;;  %v1318_v25 = vmul.f32 %v2493_v38, %v1247_v19  ;;  %v1250_v27 = vld [vmem:[#allocation2 + $0x128] sm:$0xff]  ;;  %v2538_v28 = vpop.f32.mrb[9].mxu0  ;;  %v2540_v29 = vpop.f32.mrb[9].mxu1  ;;  %v1289_v32 = vmul.f32 %v2493_v38, %v1218_v26  ;;  %v1217_v34 = vld [vmem:[#allocation2 + $0x20] sm:$0xff]  ;;  %v380_v18 = vld [vmem:[#allocation2 + $0x58] sm:$0xff] }
  0xfc   : > { %1611 = vst.msk [vmem:[%s2519_s20] sm:$0xff] %vm304_vm0, %v1547_v22  ;;  %1643 = vst.msk [vmem:[%s2519_s20 + $0x100] sm:$0xff] %vm304_vm0, %v1579_v23  ;;  %v1390_v31 = vadd.f32 %v2500_v41, %v1319_v17  ;;  %v1321_v33 = vmul.f32 %v2493_v38, %v1250_v27  ;;  %v1249_v35 = vld [vmem:[#allocation2 + $0x120] sm:$0xff]  ;;  %v1357_v36 = vadd.f32 %v2500_v41, %v1286_v24  ;;  %v2554_v42 = vpop.f32.mrb[10].mxu0  ;;  %vm1422_vm6 = vcmp.ge.f32.partialorder %v1358_v30, 0.0  ;;  %v378_v62 = vld [vmem:[#allocation2 + $0x48] sm:$0xff] }
  0xfd   : > { %v1389_v37 = vadd.f32 %v2500_v41, %v1318_v25  ;;  %v1288_v39 = vmul.f32 %v2493_v38, %v1217_v34  ;;  %v1320_v40 = vmul.f32 %v2493_v38, %v1249_v35  ;;  %v2556_v43 = vpop.f32.mrb[10].mxu1  ;;  %v1486_v44 = vmul.f32 0.2, %v1358_v30  ;;  %v2560_v53 = vpop.f32.mrb[11].mxu0  ;;  %v410_v63 = vld [vmem:[#allocation2 + $0x148] sm:$0xff]  ;;  %v409_v11 = vld [vmem:[#allocation2 + $0x140] sm:$0xff] }
  0xfe   : > { %vm1454_vm7 = vcmp.ge.f32.partialorder %v1390_v31, 0.0  ;;  %v1518_v45 = vmul.f32 0.2, %v1390_v31  ;;  %vm1421_vm8 = vcmp.ge.f32.partialorder %v1357_v36, 0.0  ;;  %v1485_v46 = vmul.f32 0.2, %v1357_v36 }
  0xff   : > { %vm1453_vm9 = vcmp.ge.f32.partialorder %v1389_v37, 0.0  ;;  %v1517_v47 = vmul.f32 0.2, %v1389_v37  ;;  %v1550_v48 = vsel %vm1422_vm6, %v1358_v30, %v1486_v44  ;;  %v1360_v50 = vadd.f32 %v2500_v41, %v1289_v32  ;;  %v1220_v52 = vld [vmem:[#allocation2 + $0x38] sm:$0xff]  ;;  %v2562_v54 = vpop.f32.mrb[11].mxu1  ;;  %v1219_v60 = vld [vmem:[#allocation2 + $0x30] sm:$0xff] }
 0x100   : > { %v1582_v49 = vsel %vm1454_vm7, %v1390_v31, %v1518_v45  ;;  %v1392_v51 = vadd.f32 %v2500_v41, %v1321_v33  ;;  %1614 = vst.msk [vmem:[%s2519_s20 + $0x18] sm:$0xff] %vm304_vm0, %v1550_v48  ;;  %v1549_v55 = vsel %vm1421_vm8, %v1357_v36, %v1485_v46  ;;  %v1359_v57 = vadd.f32 %v2500_v41, %v1288_v39  ;;  %v1252_v59 = vld [vmem:[#allocation2 + $0x138] sm:$0xff]  ;;  %v1251_v61 = vld [vmem:[#allocation2 + $0x130] sm:$0xff]  ;;  %v2570_v0 = vpop.f32.mrb[12].mxu0  ;;  %v382_v39 = vld [vmem:[#allocation2 + $0x68] sm:$0xff] }
 0x101   : > { %1646 = vst.msk [vmem:[%s2519_s20 + $0x118] sm:$0xff] %vm304_vm0, %v1582_v49  ;;  %v1581_v56 = vsel %vm1453_vm9, %v1389_v37, %v1517_v47  ;;  %v1391_v58 = vadd.f32 %v2500_v41, %v1320_v40  ;;  %v2572_v1 = vpop.f32.mrb[12].mxu1  ;;  %1613 = vst.msk [vmem:[%s2519_s20 + $0x10] sm:$0xff] %vm304_vm0, %v1549_v55  ;;  %vm1424_vm10 = vcmp.ge.f32.partialorder %v1360_v50, 0.0  ;;  %v1488_v2 = vmul.f32 0.2, %v1360_v50 }
 0x102   : > { %1645 = vst.msk [vmem:[%s2519_s20 + $0x110] sm:$0xff] %vm304_vm0, %v1581_v56  ;;  %vm1456_vm11 = vcmp.ge.f32.partialorder %v1392_v51, 0.0  ;;  %v1520_v3 = vmul.f32 0.2, %v1392_v51  ;;  %vm1423_vm12 = vcmp.ge.f32.partialorder %v1359_v57, 0.0  ;;  %v1291_v8 = vmul.f32 %v2493_v38, %v1220_v52  ;;  %v2580_v12 = vpop.f32.mrb[13].mxu0 }
 0x103   : > { %v1487_v4 = vmul.f32 0.2, %v1359_v57  ;;  %vm1455_vm13 = vcmp.ge.f32.partialorder %v1391_v58, 0.0  ;;  %v1519_v5 = vmul.f32 0.2, %v1391_v58  ;;  %v1552_v6 = vsel %vm1424_vm10, %v1360_v50, %v1488_v2  ;;  %v2582_v13 = vpop.f32.mrb[13].mxu1 }
 0x104   : > { %v1584_v7 = vsel %vm1456_vm11, %v1392_v51, %v1520_v3  ;;  %v1323_v9 = vmul.f32 %v2493_v38, %v1252_v59  ;;  %1616 = vst.msk [vmem:[%s2519_s20 + $0x28] sm:$0xff] %vm304_vm0, %v1552_v6  ;;  %v1290_v16 = vmul.f32 %v2493_v38, %v1219_v60  ;;  %v1322_v17 = vmul.f32 %v2493_v38, %v1251_v61  ;;  %v2590_v19 = vpop.f32.mrb[14].mxu0  ;;  %v412_v27 = vld [vmem:[#allocation2 + $0x158] sm:$0xff]  ;;  %v379_v30 = vld [vmem:[#allocation2 + $0x50] sm:$0xff]  ;;  %v414_v40 = vld [vmem:[#allocation2 + $0x168] sm:$0xff] }
 0x105   : > { %1648 = vst.msk [vmem:[%s2519_s20 + $0x128] sm:$0xff] %vm304_vm0, %v1584_v7  ;;  %v1551_v14 = vsel %vm1423_vm12, %v1359_v57, %v1487_v4  ;;  %v1583_v15 = vsel %vm1455_vm13, %v1391_v58, %v1519_v5  ;;  %v2592_v22 = vpop.f32.mrb[14].mxu1  ;;  %v1362_v23 = vadd.f32 %v2500_v41, %v1291_v8  ;;  %v1090_v25 = vadd.f32 %v2527_v20, %v378_v62  ;;  %v411_v31 = vld [vmem:[#allocation2 + $0x150] sm:$0xff]  ;;  %v832_v32 = vpop.f32.mrb[15].mxu0  ;;  %v381_v44 = vld [vmem:[#allocation2 + $0x60] sm:$0xff]  ;;  %v384_v46 = vld [vmem:[#allocation2 + $0x78] sm:$0xff] }
 0x106   : > { %1615 = vst.msk [vmem:[%s2519_s20 + $0x20] sm:$0xff] %vm304_vm0, %v1551_v14  ;;  %1647 = vst.msk [vmem:[%s2519_s20 + $0x120] sm:$0xff] %vm304_vm0, %v1583_v15  ;;  %v1394_v24 = vadd.f32 %v2500_v41, %v1323_v9  ;;  %v1122_v26 = vadd.f32 %v2529_v21, %v410_v63  ;;  %v992_v33 = vpop.f32.mrb[15].mxu1  ;;  %v1361_v34 = vadd.f32 %v2500_v41, %v1290_v16  ;;  %v413_v45 = vld [vmem:[#allocation2 + $0x160] sm:$0xff]  ;;  %v416_v47 = vld [vmem:[#allocation2 + $0x178] sm:$0xff] }
 0x107   : > { %v1393_v35 = vadd.f32 %v2500_v41, %v1322_v17  ;;  %v1089_v36 = vadd.f32 %v2538_v28, %v377_v10  ;;  %v1121_v37 = vadd.f32 %v2540_v29, %v409_v11  ;;  %vm1426_vm14 = vcmp.ge.f32.partialorder %v1362_v23, 0.0  ;;  %1155 = vst.msk [vmem:[#allocation2 + $0x48] sm:$0xff] %vm304_vm0, %v1090_v25  ;;  %v383_v48 = vld [vmem:[#allocation2 + $0x70] sm:$0xff]  ;;  %v386_v56 = vld [vmem:[#allocation2 + $0x88] sm:$0xff]  ;;  %v417_v2 = vld [vmem:[#allocation2 + $0x180] sm:$0xff] }
 0x108   : > { %v1490_v20 = vmul.f32 0.2, %v1362_v23  ;;  %vm1458_vm15 = vcmp.ge.f32.partialorder %v1394_v24, 0.0  ;;  %v1522_v21 = vmul.f32 0.2, %v1394_v24  ;;  %1187 = vst.msk [vmem:[#allocation2 + $0x148] sm:$0xff] %vm304_vm0, %v1122_v26  ;;  %v1092_v51 = vadd.f32 %v2554_v42, %v380_v18 }
 0x109   : > { %vm1425_vm1 = vcmp.ge.f32.partialorder %v1361_v34, 0.0  ;;  %v1489_v28 = vmul.f32 0.2, %v1361_v34  ;;  %vm1457_vm2 = vcmp.ge.f32.partialorder %v1393_v35, 0.0  ;;  %v1521_v29 = vmul.f32 0.2, %v1393_v35 }
 0x10a   : > { %1154 = vst.msk [vmem:[#allocation2 + $0x40] sm:$0xff] %vm304_vm0, %v1089_v36  ;;  %1186 = vst.msk [vmem:[#allocation2 + $0x140] sm:$0xff] %vm304_vm0, %v1121_v37  ;;  %v1554_v49 = vsel %vm1426_vm14, %v1362_v23, %v1490_v20  ;;  %v1586_v50 = vsel %vm1458_vm15, %v1394_v24, %v1522_v21  ;;  %v1124_v52 = vadd.f32 %v2556_v43, %v412_v27  ;;  %v415_v55 = vld [vmem:[#allocation2 + $0x170] sm:$0xff]  ;;  %v1986_v57 = vpop.f32.mrb[16].mxu0  ;;  %v418_v58 = vld [vmem:[#allocation2 + $0x188] sm:$0xff]  ;;  %v2034_v59 = vpop.f32.mrb[16].mxu1 }
 0x10b   : > { %1618 = vst.msk [vmem:[%s2519_s20 + $0x38] sm:$0xff] %vm304_vm0, %v1554_v49  ;;  %1650 = vst.msk [vmem:[%s2519_s20 + $0x138] sm:$0xff] %vm304_vm0, %v1586_v50  ;;  %v1553_v60 = vsel %vm1425_vm1, %v1361_v34, %v1489_v28  ;;  %v1585_v61 = vsel %vm1457_vm2, %v1393_v35, %v1521_v29  ;;  %v1091_v62 = vadd.f32 %v2560_v53, %v379_v30  ;;  %v385_v43 = vld [vmem:[#allocation2 + $0x80] sm:$0xff]  ;;  %v842_v63 = vpop.f32.mrb[17].mxu0  ;;  %v1002_v3 = vpop.f32.mrb[17].mxu1  ;;  %v388_v4 = vld [vmem:[#allocation2 + $0x98] sm:$0xff] }
 0x10c   : > { %v1123_v42 = vadd.f32 %v2562_v54, %v411_v31  ;;  %1617 = vst.msk [vmem:[%s2519_s20 + $0x30] sm:$0xff] %vm304_vm0, %v1553_v60  ;;  %1649 = vst.msk [vmem:[%s2519_s20 + $0x130] sm:$0xff] %vm304_vm0, %v1585_v61  ;;  %v1094_v5 = vadd.f32 %v2570_v0, %v382_v39  ;;  %v1126_v6 = vadd.f32 %v2572_v1, %v414_v40  ;;  %v420_v7 = vld [vmem:[#allocation2 + $0x198] sm:$0xff]  ;;  %v387_v8 = vld [vmem:[#allocation2 + $0x90] sm:$0xff]  ;;  %v1989_v0 = vpop.f32.mrb[18].mxu0 }
 0x10d   : > { %1157 = vst.msk [vmem:[#allocation2 + $0x58] sm:$0xff] %vm304_vm0, %v1092_v51  ;;  %1189 = vst.msk [vmem:[#allocation2 + $0x158] sm:$0xff] %vm304_vm0, %v1124_v52  ;;  %v1093_v53 = vadd.f32 %v2580_v12, %v381_v44  ;;  %v1125_v54 = vadd.f32 %v2582_v13, %v413_v45  ;;  %v419_v9 = vld [vmem:[#allocation2 + $0x190] sm:$0xff]  ;;  %v1096_v10 = vadd.f32 %v2590_v19, %v384_v46  ;;  %v2037_v16 = vpop.f32.mrb[18].mxu1  ;;  %v852_v18 = vpop.f32.mrb[19].mxu0  ;;  %v390_v23 = vld [vmem:[#allocation2 + $0xa8] sm:$0xff] }
 0x10e   : > { %1156 = vst.msk [vmem:[#allocation2 + $0x50] sm:$0xff] %vm304_vm0, %v1091_v62  ;;  %1188 = vst.msk [vmem:[#allocation2 + $0x150] sm:$0xff] %vm304_vm0, %v1123_v42  ;;  %v1128_v11 = vadd.f32 %v2592_v22, %v416_v47  ;;  %v1095_v14 = vadd.f32 %v832_v32, %v383_v48  ;;  %v1127_v15 = vadd.f32 %v992_v33, %v415_v55  ;;  %v1012_v19 = vpop.f32.mrb[19].mxu1  ;;  %v422_v22 = vld [vmem:[#allocation2 + $0x1a8] sm:$0xff]  ;;  %v389_v32 = vld [vmem:[#allocation2 + $0xa0] sm:$0xff] }
 0x10f   : > { %1159 = vst.msk [vmem:[#allocation2 + $0x68] sm:$0xff] %vm304_vm0, %v1094_v5  ;;  %1191 = vst.msk [vmem:[#allocation2 + $0x168] sm:$0xff] %vm304_vm0, %v1126_v6  ;;  %v1098_v1 = vadd.f32 %v1986_v57, %v386_v56  ;;  %v1130_v12 = vadd.f32 %v2034_v59, %v418_v58  ;;  %v1097_v13 = vadd.f32 %v842_v63, %v385_v43  ;;  %v1222_v24 = vld [vmem:[#allocation2 + $0x48] sm:$0xff]  ;;  %v421_v37 = vld [vmem:[#allocation2 + $0x1a0] sm:$0xff] }
 0x110   : > { %1158 = vst.msk [vmem:[#allocation2 + $0x60] sm:$0xff] %vm304_vm0, %v1093_v53  ;;  %1190 = vst.msk [vmem:[#allocation2 + $0x160] sm:$0xff] %vm304_vm0, %v1125_v54  ;;  %v1129_v17 = vadd.f32 %v1002_v3, %v417_v2  ;;  %v1254_v25 = vld [vmem:[#allocation2 + $0x148] sm:$0xff]  ;;  %v1100_v26 = vadd.f32 %v1989_v0, %v388_v4  ;;  %v1132_v27 = vadd.f32 %v2037_v16, %v420_v7  ;;  %v1992_v44 = vpop.f32.mrb[20].mxu0 }
 0x111   : > { %1161 = vst.msk [vmem:[#allocation2 + $0x78] sm:$0xff] %vm304_vm0, %v1096_v10  ;;  %1193 = vst.msk [vmem:[#allocation2 + $0x178] sm:$0xff] %vm304_vm0, %v1128_v11  ;;  %v1099_v30 = vadd.f32 %v852_v18, %v387_v8  ;;  %v1131_v31 = vadd.f32 %v1012_v19, %v419_v9  ;;  %v1293_v33 = vmul.f32 %v2493_v38, %v1222_v24  ;;  %v1221_v35 = vld [vmem:[#allocation2 + $0x40] sm:$0xff]  ;;  %v2040_v45 = vpop.f32.mrb[20].mxu1  ;;  %v862_v48 = vpop.f32.mrb[21].mxu0 }
 0x112   : > { %1160 = vst.msk [vmem:[#allocation2 + $0x70] sm:$0xff] %vm304_vm0, %v1095_v14  ;;  %1192 = vst.msk [vmem:[#allocation2 + $0x170] sm:$0xff] %vm304_vm0, %v1127_v15  ;;  %v1325_v34 = vmul.f32 %v2493_v38, %v1254_v25  ;;  %v1253_v36 = vld [vmem:[#allocation2 + $0x140] sm:$0xff]  ;;  %v1292_v39 = vmul.f32 %v2493_v38, %v1221_v35  ;;  %v1102_v46 = vadd.f32 %v1992_v44, %v390_v23  ;;  %v1022_v28 = vpop.f32.mrb[21].mxu1 }
 0x113   : > { %1163 = vst.msk [vmem:[#allocation2 + $0x88] sm:$0xff] %vm304_vm0, %v1098_v1  ;;  %1195 = vst.msk [vmem:[#allocation2 + $0x188] sm:$0xff] %vm304_vm0, %v1130_v12  ;;  %v1324_v40 = vmul.f32 %v2493_v38, %v1253_v36  ;;  %v1364_v20 = vadd.f32 %v2500_v41, %v1293_v33  ;;  %v1134_v47 = vadd.f32 %v2040_v45, %v422_v22 }
 0x114   : > { %1162 = vst.msk [vmem:[#allocation2 + $0x80] sm:$0xff] %vm304_vm0, %v1097_v13  ;;  %1194 = vst.msk [vmem:[#allocation2 + $0x180] sm:$0xff] %vm304_vm0, %v1129_v17  ;;  %v1396_v21 = vadd.f32 %v2500_v41, %v1325_v34  ;;  %v1363_v29 = vadd.f32 %v2500_v41, %v1292_v39  ;;  %v1224_v50 = vld [vmem:[#allocation2 + $0x58] sm:$0xff]  ;;  %v1101_v52 = vadd.f32 %v862_v48, %v389_v32  ;;  %v2664_v3 = vpop.f32.mrb[22].mxu0 }
 0x115   : > { %1165 = vst.msk [vmem:[#allocation2 + $0x98] sm:$0xff] %vm304_vm0, %v1100_v26  ;;  %1197 = vst.msk [vmem:[#allocation2 + $0x198] sm:$0xff] %vm304_vm0, %v1132_v27  ;;  %v1395_v49 = vadd.f32 %v2500_v41, %v1324_v40  ;;  %v1256_v51 = vld [vmem:[#allocation2 + $0x158] sm:$0xff]  ;;  %v1133_v55 = vadd.f32 %v1022_v28, %v421_v37  ;;  %vm1428_vm3 = vcmp.ge.f32.partialorder %v1364_v20, 0.0  ;;  %v1492_v56 = vmul.f32 0.2, %v1364_v20 }
 0x116   : > { %1164 = vst.msk [vmem:[#allocation2 + $0x90] sm:$0xff] %vm304_vm0, %v1099_v30  ;;  %1196 = vst.msk [vmem:[#allocation2 + $0x190] sm:$0xff] %vm304_vm0, %v1131_v31  ;;  %vm1460_vm4 = vcmp.ge.f32.partialorder %v1396_v21, 0.0  ;;  %v1524_v57 = vmul.f32 0.2, %v1396_v21  ;;  %vm1427_vm5 = vcmp.ge.f32.partialorder %v1363_v29, 0.0  ;;  %v1295_v62 = vmul.f32 %v2493_v38, %v1224_v50 }
 0x117   : > { %1167 = vst.msk [vmem:[#allocation2 + $0xa8] sm:$0xff] %vm304_vm0, %v1102_v46  ;;  %1199 = vst.msk [vmem:[#allocation2 + $0x1a8] sm:$0xff] %vm304_vm0, %v1134_v47  ;;  %v1491_v58 = vmul.f32 0.2, %v1363_v29  ;;  %vm1459_vm6 = vcmp.ge.f32.partialorder %v1395_v49, 0.0  ;;  %v1556_v60 = vsel %vm1428_vm3, %v1364_v20, %v1492_v56  ;;  %v1327_v42 = vmul.f32 %v2493_v38, %v1256_v51  ;;  %v1223_v43 = vld [vmem:[#allocation2 + $0x50] sm:$0xff] }
 0x118   : > { %v1523_v59 = vmul.f32 0.2, %v1395_v49  ;;  %1166 = vst.msk [vmem:[#allocation2 + $0xa0] sm:$0xff] %vm304_vm0, %v1101_v52  ;;  %1198 = vst.msk [vmem:[#allocation2 + $0x1a0] sm:$0xff] %vm304_vm0, %v1133_v55  ;;  %v1588_v61 = vsel %vm1460_vm4, %v1396_v21, %v1524_v57  ;;  %v1255_v63 = vld [vmem:[#allocation2 + $0x150] sm:$0xff]  ;;  %v1226_v2 = vld [vmem:[#allocation2 + $0x68] sm:$0xff]  ;;  %v1294_v53 = vmul.f32 %v2493_v38, %v1223_v43  ;;  %v1366_v14 = vadd.f32 %v2500_v41, %v1295_v62 }
 0x119   : > { %v2666_v4 = vpop.f32.mrb[22].mxu1  ;;  %1620 = vst.msk [vmem:[%s2519_s20 + $0x48] sm:$0xff] %vm304_vm0, %v1556_v60  ;;  %1652 = vst.msk [vmem:[%s2519_s20 + $0x148] sm:$0xff] %vm304_vm0, %v1588_v61  ;;  %v1555_v5 = vsel %vm1427_vm5, %v1363_v29, %v1491_v58  ;;  %v1326_v54 = vmul.f32 %v2493_v38, %v1255_v63  ;;  %v1258_v7 = vld [vmem:[#allocation2 + $0x168] sm:$0xff]  ;;  %v1225_v8 = vld [vmem:[#allocation2 + $0x60] sm:$0xff]  ;;  %v2676_v10 = vpop.f32.mrb[23].mxu0  ;;  %v1398_v15 = vadd.f32 %v2500_v41, %v1327_v42 }
 0x11a   : > { %v1587_v6 = vsel %vm1459_vm6, %v1395_v49, %v1523_v59  ;;  %v1257_v9 = vld [vmem:[#allocation2 + $0x160] sm:$0xff]  ;;  %v2678_v11 = vpop.f32.mrb[23].mxu1  ;;  %1619 = vst.msk [vmem:[%s2519_s20 + $0x40] sm:$0xff] %vm304_vm0, %v1555_v5  ;;  %v1297_v0 = vmul.f32 %v2493_v38, %v1226_v2  ;;  %v1329_v16 = vmul.f32 %v2493_v38, %v1258_v7  ;;  %v1365_v1 = vadd.f32 %v2500_v41, %v1294_v53  ;;  %v2692_v18 = vpop.f32.mrb[24].mxu0  ;;  %v1228_v32 = vld [vmem:[#allocation2 + $0x78] sm:$0xff]  ;;  %v1227_v34 = vld [vmem:[#allocation2 + $0x70] sm:$0xff] }
 0x11b   : > { %1651 = vst.msk [vmem:[%s2519_s20 + $0x140] sm:$0xff] %vm304_vm0, %v1587_v6  ;;  %v1397_v12 = vadd.f32 %v2500_v41, %v1326_v54  ;;  %v1296_v13 = vmul.f32 %v2493_v38, %v1225_v8  ;;  %v1328_v17 = vmul.f32 %v2493_v38, %v1257_v9  ;;  %v2694_v19 = vpop.f32.mrb[24].mxu1  ;;  %vm1430_vm7 = vcmp.ge.f32.partialorder %v1366_v14, 0.0  ;;  %v1260_v33 = vld [vmem:[#allocation2 + $0x178] sm:$0xff]  ;;  %v2698_v35 = vpop.f32.mrb[25].mxu0  ;;  %v1259_v45 = vld [vmem:[#allocation2 + $0x170] sm:$0xff] }
 0x11c   : > { %v1494_v23 = vmul.f32 0.2, %v1366_v14  ;;  %vm1462_vm8 = vcmp.ge.f32.partialorder %v1398_v15, 0.0  ;;  %v1526_v22 = vmul.f32 0.2, %v1398_v15  ;;  %vm1429_vm9 = vcmp.ge.f32.partialorder %v1365_v1, 0.0 }
 0x11d   : > { %v1493_v24 = vmul.f32 0.2, %v1365_v1  ;;  %vm1461_vm10 = vcmp.ge.f32.partialorder %v1397_v12, 0.0  ;;  %v1525_v25 = vmul.f32 0.2, %v1397_v12  ;;  %v1368_v30 = vadd.f32 %v2500_v41, %v1297_v0  ;;  %v2700_v36 = vpop.f32.mrb[25].mxu1 }
 0x11e   : > { %v1558_v26 = vsel %vm1430_vm7, %v1366_v14, %v1494_v23  ;;  %v1590_v27 = vsel %vm1462_vm8, %v1398_v15, %v1526_v22  ;;  %v1400_v31 = vadd.f32 %v2500_v41, %v1329_v16  ;;  %v1367_v40 = vadd.f32 %v2500_v41, %v1296_v13  ;;  %v1230_v20 = vld [vmem:[#allocation2 + $0x88] sm:$0xff]  ;;  %v2708_v46 = vpop.f32.mrb[26].mxu0  ;;  %v2710_v47 = vpop.f32.mrb[26].mxu1  ;;  %v1229_v56 = vld [vmem:[#allocation2 + $0x80] sm:$0xff] }
 0x11f   : > { %1622 = vst.msk [vmem:[%s2519_s20 + $0x58] sm:$0xff] %vm304_vm0, %v1558_v26  ;;  %1654 = vst.msk [vmem:[%s2519_s20 + $0x158] sm:$0xff] %vm304_vm0, %v1590_v27  ;;  %v1557_v37 = vsel %vm1429_vm9, %v1365_v1, %v1493_v24  ;;  %v1589_v39 = vsel %vm1461_vm10, %v1397_v12, %v1525_v25  ;;  %v1399_v44 = vadd.f32 %v2500_v41, %v1328_v17  ;;  %v1262_v21 = vld [vmem:[#allocation2 + $0x188] sm:$0xff]  ;;  %vm1432_vm11 = vcmp.ge.f32.partialorder %v1368_v30, 0.0  ;;  %v1261_v57 = vld [vmem:[#allocation2 + $0x180] sm:$0xff]  ;;  %v2718_v58 = vpop.f32.mrb[27].mxu0 }
 0x120   : > { %1621 = vst.msk [vmem:[%s2519_s20 + $0x50] sm:$0xff] %vm304_vm0, %v1557_v37  ;;  %1653 = vst.msk [vmem:[%s2519_s20 + $0x150] sm:$0xff] %vm304_vm0, %v1589_v39  ;;  %v1496_v48 = vmul.f32 0.2, %v1368_v30  ;;  %vm1464_vm12 = vcmp.ge.f32.partialorder %v1400_v31, 0.0  ;;  %vm1431_vm13 = vcmp.ge.f32.partialorder %v1367_v40, 0.0  ;;  %v1299_v52 = vmul.f32 %v2493_v38, %v1228_v32 }
 0x121   : > { %v1528_v28 = vmul.f32 0.2, %v1400_v31  ;;  %v1495_v29 = vmul.f32 0.2, %v1367_v40  ;;  %vm1463_vm14 = vcmp.ge.f32.partialorder %v1399_v44, 0.0  ;;  %v1331_v55 = vmul.f32 %v2493_v38, %v1260_v33  ;;  %v2720_v59 = vpop.f32.mrb[27].mxu1 }
 0x122   : > { %v1527_v49 = vmul.f32 0.2, %v1399_v44  ;;  %v1560_v50 = vsel %vm1432_vm11, %v1368_v30, %v1496_v48  ;;  %v1298_v62 = vmul.f32 %v2493_v38, %v1227_v34  ;;  %v1330_v42 = vmul.f32 %v2493_v38, %v1259_v45  ;;  %v2728_v43 = vpop.f32.mrb[28].mxu0  ;;  %v2730_v63 = vpop.f32.mrb[28].mxu1  ;;  %v1232_v24 = vld [vmem:[#allocation2 + $0x98] sm:$0xff]  ;;  %v1231_v26 = vld [vmem:[#allocation2 + $0x90] sm:$0xff] }
 0x123   : > { %v1592_v51 = vsel %vm1464_vm12, %v1400_v31, %v1528_v28  ;;  %1624 = vst.msk [vmem:[%s2519_s20 + $0x68] sm:$0xff] %vm304_vm0, %v1560_v50  ;;  %v1559_v60 = vsel %vm1431_vm13, %v1367_v40, %v1495_v29  ;;  %v1370_v2 = vadd.f32 %v2500_v41, %v1299_v52  ;;  %v1402_v5 = vadd.f32 %v2500_v41, %v1331_v55  ;;  %v2740_v54 = vpop.f32.mrb[29].mxu0  ;;  %v2742_v7 = vpop.f32.mrb[29].mxu1  ;;  %v1264_v25 = vld [vmem:[#allocation2 + $0x198] sm:$0xff]  ;;  %v1263_v37 = vld [vmem:[#allocation2 + $0x190] sm:$0xff]  ;;  %v1234_v39 = vld [vmem:[#allocation2 + $0xa8] sm:$0xff] }
 0x124   : > { %1656 = vst.msk [vmem:[%s2519_s20 + $0x168] sm:$0xff] %vm304_vm0, %v1592_v51  ;;  %v1591_v61 = vsel %vm1463_vm14, %v1399_v44, %v1527_v49  ;;  %1623 = vst.msk [vmem:[%s2519_s20 + $0x60] sm:$0xff] %vm304_vm0, %v1559_v60  ;;  %v1301_v6 = vmul.f32 %v2493_v38, %v1230_v20  ;;  %v1333_v53 = vmul.f32 %v2493_v38, %v1262_v21  ;;  %v2750_v27 = vpop.f32.mrb[30].mxu0  ;;  %v1266_v40 = vld [vmem:[#allocation2 + $0x1a8] sm:$0xff]  ;;  %v1233_v52 = vld [vmem:[#allocation2 + $0xa0] sm:$0xff] }
 0x125   : > { %1655 = vst.msk [vmem:[%s2519_s20 + $0x160] sm:$0xff] %vm304_vm0, %v1591_v61  ;;  %v1369_v8 = vadd.f32 %v2500_v41, %v1298_v62  ;;  %v1401_v9 = vadd.f32 %v2500_v41, %v1330_v42  ;;  %v1300_v14 = vmul.f32 %v2493_v38, %v1229_v56  ;;  %v1332_v15 = vmul.f32 %v2493_v38, %v1261_v57  ;;  %v2752_v30 = vpop.f32.mrb[30].mxu1  ;;  %v2760_v44 = vpop.f32.mrb[31].mxu0  ;;  %v1265_v55 = vld [vmem:[#allocation2 + $0x1a0] sm:$0xff] }
 0x126   : > { %vm1434_vm15 = vcmp.ge.f32.partialorder %v1370_v2, 0.0  ;;  %v1498_v0 = vmul.f32 0.2, %v1370_v2  ;;  %vm1466_vm1 = vcmp.ge.f32.partialorder %v1402_v5, 0.0  ;;  %v1530_v16 = vmul.f32 0.2, %v1402_v5 }
 0x127   : > { %vm1433_vm2 = vcmp.ge.f32.partialorder %v1369_v8, 0.0  ;;  %v1497_v1 = vmul.f32 0.2, %v1369_v8  ;;  %vm1465_vm3 = vcmp.ge.f32.partialorder %v1401_v9, 0.0  ;;  %v1529_v12 = vmul.f32 0.2, %v1401_v9 }
 0x128   : > { %v1562_v13 = vsel %vm1434_vm15, %v1370_v2, %v1498_v0  ;;  %v1594_v17 = vsel %vm1466_vm1, %v1402_v5, %v1530_v16  ;;  %v1372_v23 = vadd.f32 %v2500_v41, %v1301_v6  ;;  %v1404_v22 = vadd.f32 %v2500_v41, %v1333_v53  ;;  %v2762_v45 = vpop.f32.mrb[31].mxu1 }
 0x129   : > { %1626 = vst.msk [vmem:[%s2519_s20 + $0x78] sm:$0xff] %vm304_vm0, %v1562_v13  ;;  %1658 = vst.msk [vmem:[%s2519_s20 + $0x178] sm:$0xff] %vm304_vm0, %v1594_v17  ;;  %v1561_v31 = vsel %vm1433_vm2, %v1369_v8, %v1497_v1  ;;  %v1593_v32 = vsel %vm1465_vm3, %v1401_v9, %v1529_v12  ;;  %v1371_v33 = vadd.f32 %v2500_v41, %v1300_v14  ;;  %v392_v1 = vld [vmem:[#allocation2 + $0xb8] sm:$0xff] }
 0x12a   : > { %v1403_v34 = vadd.f32 %v2500_v41, %v1332_v15  ;;  %1625 = vst.msk [vmem:[%s2519_s20 + $0x70] sm:$0xff] %vm304_vm0, %v1561_v31  ;;  %1657 = vst.msk [vmem:[%s2519_s20 + $0x170] sm:$0xff] %vm304_vm0, %v1593_v32  ;;  %vm1436_vm4 = vcmp.ge.f32.partialorder %v1372_v23, 0.0  ;;  %v1500_v20 = vmul.f32 0.2, %v1372_v23  ;;  %vm1468_vm5 = vcmp.ge.f32.partialorder %v1404_v22, 0.0 }
 0x12b   : > { %v1532_v21 = vmul.f32 0.2, %v1404_v22  ;;  %vm1435_vm6 = vcmp.ge.f32.partialorder %v1371_v33, 0.0  ;;  %v1499_v48 = vmul.f32 0.2, %v1371_v33  ;;  %v1303_v50 = vmul.f32 %v2493_v38, %v1232_v24  ;;  %v423_v24 = vld [vmem:[#allocation2 + $0x1b0] sm:$0xff] }
 0x12c   : > { %vm1467_vm7 = vcmp.ge.f32.partialorder %v1403_v34, 0.0  ;;  %v1531_v28 = vmul.f32 0.2, %v1403_v34  ;;  %v1564_v29 = vsel %vm1436_vm4, %v1372_v23, %v1500_v20  ;;  %v1335_v51 = vmul.f32 %v2493_v38, %v1264_v25 }
 0x12d   : > { %v1596_v49 = vsel %vm1468_vm5, %v1404_v22, %v1532_v21  ;;  %1628 = vst.msk [vmem:[%s2519_s20 + $0x88] sm:$0xff] %vm304_vm0, %v1564_v29  ;;  %v1563_v56 = vsel %vm1435_vm6, %v1371_v33, %v1499_v48  ;;  %v1302_v60 = vmul.f32 %v2493_v38, %v1231_v26  ;;  %v1334_v61 = vmul.f32 %v2493_v38, %v1263_v37  ;;  %v391_v22 = vld [vmem:[#allocation2 + $0xb0] sm:$0xff]  ;;  %v394_v33 = vld [vmem:[#allocation2 + $0xc8] sm:$0xff]  ;;  %v393_v37 = vld [vmem:[#allocation2 + $0xc0] sm:$0xff] }
 0x12e   : > { %1660 = vst.msk [vmem:[%s2519_s20 + $0x188] sm:$0xff] %vm304_vm0, %v1596_v49  ;;  %v1595_v57 = vsel %vm1467_vm7, %v1403_v34, %v1531_v28  ;;  %1627 = vst.msk [vmem:[%s2519_s20 + $0x80] sm:$0xff] %vm304_vm0, %v1563_v56  ;;  %v1374_v62 = vadd.f32 %v2500_v41, %v1303_v50  ;;  %v1406_v42 = vadd.f32 %v2500_v41, %v1335_v51  ;;  %v426_v34 = vld [vmem:[#allocation2 + $0x1c8] sm:$0xff]  ;;  %v396_v21 = vld [vmem:[#allocation2 + $0xd8] sm:$0xff] }
 0x12f   : > { %1659 = vst.msk [vmem:[%s2519_s20 + $0x180] sm:$0xff] %vm304_vm0, %v1595_v57  ;;  %v1305_v2 = vmul.f32 %v2493_v38, %v1234_v39  ;;  %v1337_v5 = vmul.f32 %v2493_v38, %v1266_v40  ;;  %v1373_v6 = vadd.f32 %v2500_v41, %v1302_v60  ;;  %v1405_v53 = vadd.f32 %v2500_v41, %v1334_v61  ;;  %v425_v39 = vld [vmem:[#allocation2 + $0x1c0] sm:$0xff]  ;;  %v428_v48 = vld [vmem:[#allocation2 + $0x1d8] sm:$0xff]  ;;  %v395_v28 = vld [vmem:[#allocation2 + $0xd0] sm:$0xff] }
 0x130   : > { %v1304_v8 = vmul.f32 %v2493_v38, %v1233_v52  ;;  %v1336_v9 = vmul.f32 %v2493_v38, %v1265_v55  ;;  %vm1438_vm8 = vcmp.ge.f32.partialorder %v1374_v62, 0.0  ;;  %v1502_v14 = vmul.f32 0.2, %v1374_v62  ;;  %v424_v38 = vld [vmem:[#allocation2 + $0x1b8] sm:$0xff]  ;;  %v427_v55 = vld [vmem:[#allocation2 + $0x1d0] sm:$0xff]  ;;  %v398_v56 = vld [vmem:[#allocation2 + $0xe8] sm:$0xff] }
 0x131   : > { %vm1470_vm9 = vcmp.ge.f32.partialorder %v1406_v42, 0.0  ;;  %v1534_v15 = vmul.f32 0.2, %v1406_v42  ;;  %vm1437_vm10 = vcmp.ge.f32.partialorder %v1373_v6, 0.0  ;;  %v1501_v0 = vmul.f32 0.2, %v1373_v6 }
 0x132   : > { %vm1469_vm11 = vcmp.ge.f32.partialorder %v1405_v53, 0.0  ;;  %v1533_v16 = vmul.f32 0.2, %v1405_v53  ;;  %v1566_v12 = vsel %vm1438_vm8, %v1374_v62, %v1502_v14  ;;  %v1376_v17 = vadd.f32 %v2500_v41, %v1305_v2  ;;  %v430_v57 = vld [vmem:[#allocation2 + $0x1e8] sm:$0xff]  ;;  %v397_v2 = vld [vmem:[#allocation2 + $0xe0] sm:$0xff] }
 0x133   : > { %v1598_v13 = vsel %vm1470_vm9, %v1406_v42, %v1534_v15  ;;  %v1408_v23 = vadd.f32 %v2500_v41, %v1337_v5  ;;  %1630 = vst.msk [vmem:[%s2519_s20 + $0x98] sm:$0xff] %vm304_vm0, %v1566_v12  ;;  %v1565_v25 = vsel %vm1437_vm10, %v1373_v6, %v1501_v0  ;;  %v1375_v31 = vadd.f32 %v2500_v41, %v1304_v8  ;;  %v429_v5 = vld [vmem:[#allocation2 + $0x1e0] sm:$0xff]  ;;  %v400_v6 = vld [vmem:[#allocation2 + $0xf8] sm:$0xff]  ;;  %v399_v8 = vld [vmem:[#allocation2 + $0xf0] sm:$0xff] }
 0x134   : > { %1662 = vst.msk [vmem:[%s2519_s20 + $0x198] sm:$0xff] %vm304_vm0, %v1598_v13  ;;  %v1597_v26 = vsel %vm1469_vm11, %v1405_v53, %v1533_v16  ;;  %v1407_v32 = vadd.f32 %v2500_v41, %v1336_v9  ;;  %1629 = vst.msk [vmem:[%s2519_s20 + $0x90] sm:$0xff] %vm304_vm0, %v1565_v25  ;;  %vm1440_vm12 = vcmp.ge.f32.partialorder %v1376_v17, 0.0  ;;  %v1504_v40 = vmul.f32 0.2, %v1376_v17  ;;  %v431_v9 = vld [vmem:[#allocation2 + $0x1f0] sm:$0xff] }
 0x135   : > { %1661 = vst.msk [vmem:[%s2519_s20 + $0x190] sm:$0xff] %vm304_vm0, %v1597_v26  ;;  %vm1472_vm13 = vcmp.ge.f32.partialorder %v1408_v23, 0.0  ;;  %v1536_v20 = vmul.f32 0.2, %v1408_v23  ;;  %vm1439_vm14 = vcmp.ge.f32.partialorder %v1375_v31, 0.0  ;;  %v1104_v51 = vadd.f32 %v2664_v3, %v392_v1 }
 0x136   : > { %v1503_v29 = vmul.f32 0.2, %v1375_v31  ;;  %vm1471_vm15 = vcmp.ge.f32.partialorder %v1407_v32, 0.0  ;;  %v1535_v41 = vmul.f32 0.2, %v1407_v32  ;;  %v1568_v49 = vsel %vm1440_vm12, %v1376_v17, %v1504_v40 }
 0x137   : > { %v1600_v50 = vsel %vm1472_vm13, %v1408_v23, %v1536_v20  ;;  %v1136_v52 = vadd.f32 %v2666_v4, %v424_v38  ;;  %1632 = vst.msk [vmem:[%s2519_s20 + $0xa8] sm:$0xff] %vm304_vm0, %v1568_v49  ;;  %v1103_v62 = vadd.f32 %v2676_v10, %v391_v22  ;;  %v1135_v42 = vadd.f32 %v2678_v11, %v423_v24  ;;  %v432_v11 = vld [vmem:[#allocation2 + $0x1f8] sm:$0xff]  ;;  %v2860_v23 = vld [vmem:[%s2950_s3] ss:$0 sm:$0xff] }
 0x138   : > { %1664 = vst.msk [vmem:[%s2519_s20 + $0x1a8] sm:$0xff] %vm304_vm0, %v1600_v50  ;;  %v1567_v60 = vsel %vm1439_vm14, %v1375_v31, %v1503_v29  ;;  %v1599_v61 = vsel %vm1471_vm15, %v1407_v32, %v1535_v41  ;;  %1169 = vst.msk [vmem:[#allocation2 + $0xb8] sm:$0xff] %vm304_vm0, %v1104_v51  ;;  %v1106_v3 = vadd.f32 %v2692_v18, %v394_v33 }
 0x139   : > { %1631 = vst.msk [vmem:[%s2519_s20 + $0xa0] sm:$0xff] %vm304_vm0, %v1567_v60  ;;  %1663 = vst.msk [vmem:[%s2519_s20 + $0x1a0] sm:$0xff] %vm304_vm0, %v1599_v61  ;;  %v1138_v4 = vadd.f32 %v2694_v19, %v426_v34  ;;  %v1105_v53 = vadd.f32 %v2698_v35, %v393_v37  ;;  %v1137_v10 = vadd.f32 %v2700_v36, %v425_v39 }
 0x13a   : > { %1201 = vst.msk [vmem:[#allocation2 + $0x1b8] sm:$0xff] %vm304_vm0, %v1136_v52  ;;  %1168 = vst.msk [vmem:[#allocation2 + $0xb0] sm:$0xff] %vm304_vm0, %v1103_v62  ;;  %v1108_v14 = vadd.f32 %v2708_v46, %v396_v21  ;;  %v1140_v15 = vadd.f32 %v2710_v47, %v428_v48  ;;  %v1107_v0 = vadd.f32 %v2718_v58, %v395_v28 }
 0x13b   : > { %1200 = vst.msk [vmem:[#allocation2 + $0x1b0] sm:$0xff] %vm304_vm0, %v1135_v42  ;;  %v1139_v18 = vadd.f32 %v2720_v59, %v427_v55  ;;  %1171 = vst.msk [vmem:[#allocation2 + $0xc8] sm:$0xff] %vm304_vm0, %v1106_v3  ;;  %v1110_v19 = vadd.f32 %v2728_v43, %v398_v56  ;;  %v1142_v35 = vadd.f32 %v2730_v63, %v430_v57 }
 0x13c   : > { %1203 = vst.msk [vmem:[#allocation2 + $0x1c8] sm:$0xff] %vm304_vm0, %v1138_v4  ;;  %1170 = vst.msk [vmem:[#allocation2 + $0xc0] sm:$0xff] %vm304_vm0, %v1105_v53  ;;  %v1109_v36 = vadd.f32 %v2740_v54, %v397_v2  ;;  %v1141_v46 = vadd.f32 %v2742_v7, %v429_v5  ;;  %v1112_v47 = vadd.f32 %v2750_v27, %v400_v6  ;;  %v2851_v7 = vld [vmem:[%s2949_s2] ss:$0 sm:$0xff] }
 0x13d   : > { %1202 = vst.msk [vmem:[#allocation2 + $0x1c0] sm:$0xff] %vm304_vm0, %v1137_v10  ;;  %1173 = vst.msk [vmem:[#allocation2 + $0xd8] sm:$0xff] %vm304_vm0, %v1108_v14  ;;  %v1144_v58 = vadd.f32 %v2752_v30, %v432_v11  ;;  %v1111_v59 = vadd.f32 %v2760_v44, %v399_v8  ;;  %v1143_v43 = vadd.f32 %v2762_v45, %v431_v9 }
 0x13e   : > { %1205 = vst.msk [vmem:[#allocation2 + $0x1d8] sm:$0xff] %vm304_vm0, %v1140_v15  ;;  %1172 = vst.msk [vmem:[#allocation2 + $0xd0] sm:$0xff] %vm304_vm0, %v1107_v0 }
 0x13f   : > { %1204 = vst.msk [vmem:[#allocation2 + $0x1d0] sm:$0xff] %vm304_vm0, %v1139_v18  ;;  %1175 = vst.msk [vmem:[#allocation2 + $0xe8] sm:$0xff] %vm304_vm0, %v1110_v19  ;;  %v1236_v63 = vld [vmem:[#allocation2 + $0xb8] sm:$0xff] }
 0x140   : > { %1207 = vst.msk [vmem:[#allocation2 + $0x1e8] sm:$0xff] %vm304_vm0, %v1142_v35  ;;  %1174 = vst.msk [vmem:[#allocation2 + $0xe0] sm:$0xff] %vm304_vm0, %v1109_v36  ;;  %v1307_v27 = vmul.f32 %v2851_v7, %v1236_v63 }
 0x141   : > { %1206 = vst.msk [vmem:[#allocation2 + $0x1e0] sm:$0xff] %vm304_vm0, %v1141_v46  ;;  %1177 = vst.msk [vmem:[#allocation2 + $0xf8] sm:$0xff] %vm304_vm0, %v1112_v47  ;;  %v1268_v54 = vld [vmem:[#allocation2 + $0x1b8] sm:$0xff]  ;;  %v1235_v44 = vld [vmem:[#allocation2 + $0xb0] sm:$0xff] }
 0x142   : > { %1209 = vst.msk [vmem:[#allocation2 + $0x1f8] sm:$0xff] %vm304_vm0, %v1144_v58  ;;  %1176 = vst.msk [vmem:[#allocation2 + $0xf0] sm:$0xff] %vm304_vm0, %v1111_v59  ;;  %v1339_v30 = vmul.f32 %v2851_v7, %v1268_v54  ;;  %v1267_v45 = vld [vmem:[#allocation2 + $0x1b0] sm:$0xff]  ;;  %v1306_v16 = vmul.f32 %v2851_v7, %v1235_v44  ;;  %v1238_v12 = vld [vmem:[#allocation2 + $0xc8] sm:$0xff]  ;;  %v1378_v38 = vadd.f32 %v2860_v23, %v1307_v27 }
 0x143   : > { %1208 = vst.msk [vmem:[#allocation2 + $0x1f0] sm:$0xff] %vm304_vm0, %v1143_v43  ;;  %v1338_v1 = vmul.f32 %v2851_v7, %v1267_v45  ;;  %v1270_v13 = vld [vmem:[#allocation2 + $0x1c8] sm:$0xff]  ;;  %v1237_v17 = vld [vmem:[#allocation2 + $0xc0] sm:$0xff]  ;;  %v1309_v24 = vmul.f32 %v2851_v7, %v1238_v12 }
 0x144   : > { %v1410_v22 = vadd.f32 %v2860_v23, %v1339_v30  ;;  %v1341_v25 = vmul.f32 %v2851_v7, %v1270_v13  ;;  %v1269_v26 = vld [vmem:[#allocation2 + $0x1c0] sm:$0xff]  ;;  %v1377_v31 = vadd.f32 %v2860_v23, %v1306_v16  ;;  %v1308_v33 = vmul.f32 %v2851_v7, %v1237_v17  ;;  %v1240_v41 = vld [vmem:[#allocation2 + $0xd8] sm:$0xff] }
 0x145   : > { %v1409_v32 = vadd.f32 %v2860_v23, %v1338_v1  ;;  %v1340_v34 = vmul.f32 %v2851_v7, %v1269_v26  ;;  %vm1442_vm1 = vcmp.ge.f32.partialorder %v1378_v38, 0.0  ;;  %v1506_v37 = vmul.f32 0.2, %v1378_v38  ;;  %v1272_v49 = vld [vmem:[#allocation2 + $0x1d8] sm:$0xff]  ;;  %v1239_v50 = vld [vmem:[#allocation2 + $0xd0] sm:$0xff] }
 0x146   : > { %vm1474_vm2 = vcmp.ge.f32.partialorder %v1410_v22, 0.0  ;;  %v1538_v39 = vmul.f32 0.2, %v1410_v22  ;;  %vm1441_vm3 = vcmp.ge.f32.partialorder %v1377_v31, 0.0  ;;  %v1505_v40 = vmul.f32 0.2, %v1377_v31 }
 0x147   : > { %vm1473_vm4 = vcmp.ge.f32.partialorder %v1409_v32, 0.0  ;;  %v1537_v20 = vmul.f32 0.2, %v1409_v32  ;;  %v1570_v21 = vsel %vm1442_vm1, %v1378_v38, %v1506_v37  ;;  %v1380_v28 = vadd.f32 %v2860_v23, %v1309_v24  ;;  %v1271_v57 = vld [vmem:[#allocation2 + $0x1d0] sm:$0xff]  ;;  %v1242_v60 = vld [vmem:[#allocation2 + $0xe8] sm:$0xff]  ;;  %v1241_v10 = vld [vmem:[#allocation2 + $0xe0] sm:$0xff] }
 0x148   : > { %v1602_v48 = vsel %vm1474_vm2, %v1410_v22, %v1538_v39  ;;  %v1412_v29 = vadd.f32 %v2860_v23, %v1341_v25  ;;  %1634 = vst.msk [vmem:[%s2519_s20 + $0xb8] sm:$0xff] %vm304_vm0, %v1570_v21  ;;  %v1569_v51 = vsel %vm1441_vm3, %v1377_v31, %v1505_v40  ;;  %v1379_v55 = vadd.f32 %v2860_v23, %v1308_v33  ;;  %v1274_v61 = vld [vmem:[#allocation2 + $0x1e8] sm:$0xff]  ;;  %v1273_v11 = vld [vmem:[#allocation2 + $0x1e0] sm:$0xff]  ;;  %v1244_v16 = vld [vmem:[#allocation2 + $0xf8] sm:$0xff] }
 0x149   : > { %1666 = vst.msk [vmem:[%s2519_s20 + $0x1b8] sm:$0xff] %vm304_vm0, %v1602_v48  ;;  %v1601_v52 = vsel %vm1473_vm4, %v1409_v32, %v1537_v20  ;;  %v1411_v56 = vadd.f32 %v2860_v23, %v1340_v34  ;;  %1633 = vst.msk [vmem:[%s2519_s20 + $0xb0] sm:$0xff] %vm304_vm0, %v1569_v51  ;;  %vm1444_vm5 = vcmp.ge.f32.partialorder %v1380_v28, 0.0  ;;  %v1508_v62 = vmul.f32 0.2, %v1380_v28  ;;  %v1276_v38 = vld [vmem:[#allocation2 + $0x1f8] sm:$0xff] }
 0x14a   : > { %1665 = vst.msk [vmem:[%s2519_s20 + $0x1b0] sm:$0xff] %vm304_vm0, %v1601_v52  ;;  %vm1476_vm6 = vcmp.ge.f32.partialorder %v1412_v29, 0.0  ;;  %v1540_v42 = vmul.f32 0.2, %v1412_v29  ;;  %vm1443_vm7 = vcmp.ge.f32.partialorder %v1379_v55, 0.0  ;;  %v1311_v4 = vmul.f32 %v2851_v7, %v1240_v41  ;;  %v1243_v22 = vld [vmem:[#allocation2 + $0xf0] sm:$0xff] }
 0x14b   : > { %v1507_v2 = vmul.f32 0.2, %v1379_v55  ;;  %vm1475_vm8 = vcmp.ge.f32.partialorder %v1411_v56, 0.0  ;;  %v1539_v5 = vmul.f32 0.2, %v1411_v56  ;;  %v1572_v6 = vsel %vm1444_vm5, %v1380_v28, %v1508_v62  ;;  %v1275_v24 = vld [vmem:[#allocation2 + $0x1f0] sm:$0xff] }
 0x14c   : > { %v1604_v3 = vsel %vm1476_vm6, %v1412_v29, %v1540_v42  ;;  %v1343_v53 = vmul.f32 %v2851_v7, %v1272_v49  ;;  %1636 = vst.msk [vmem:[%s2519_s20 + $0xc8] sm:$0xff] %vm304_vm0, %v1572_v6  ;;  %v1310_v14 = vmul.f32 %v2851_v7, %v1239_v50  ;;  %v1342_v15 = vmul.f32 %v2851_v7, %v1271_v57 }
 0x14d   : > { %1668 = vst.msk [vmem:[%s2519_s20 + $0x1c8] sm:$0xff] %vm304_vm0, %v1604_v3  ;;  %v1571_v8 = vsel %vm1443_vm7, %v1379_v55, %v1507_v2  ;;  %v1603_v9 = vsel %vm1475_vm8, %v1411_v56, %v1539_v5  ;;  %v1382_v0 = vadd.f32 %v2860_v23, %v1311_v4  ;;  %v1313_v19 = vmul.f32 %v2851_v7, %v1242_v60 }
 0x14e   : > { %1635 = vst.msk [vmem:[%s2519_s20 + $0xc0] sm:$0xff] %vm304_vm0, %v1571_v8  ;;  %1667 = vst.msk [vmem:[%s2519_s20 + $0x1c0] sm:$0xff] %vm304_vm0, %v1603_v9  ;;  %v1414_v18 = vadd.f32 %v2860_v23, %v1343_v53  ;;  %v1345_v35 = vmul.f32 %v2851_v7, %v1274_v61  ;;  %v1381_v36 = vadd.f32 %v2860_v23, %v1310_v14 }
 0x14f   : > { %v1413_v46 = vadd.f32 %v2860_v23, %v1342_v15  ;;  %v1312_v47 = vmul.f32 %v2851_v7, %v1241_v10  ;;  %v1344_v58 = vmul.f32 %v2851_v7, %v1273_v11  ;;  %vm1446_vm9 = vcmp.ge.f32.partialorder %v1382_v0, 0.0 }
 0x150   : > { %v1510_v59 = vmul.f32 0.2, %v1382_v0  ;;  %vm1478_vm10 = vcmp.ge.f32.partialorder %v1414_v18, 0.0  ;;  %v1542_v43 = vmul.f32 0.2, %v1414_v18  ;;  %vm1445_vm11 = vcmp.ge.f32.partialorder %v1381_v36, 0.0 }
 0x151   : > { %v1509_v63 = vmul.f32 0.2, %v1381_v36  ;;  %vm1477_vm12 = vcmp.ge.f32.partialorder %v1413_v46, 0.0  ;;  %v1541_v54 = vmul.f32 0.2, %v1413_v46  ;;  %v1384_v44 = vadd.f32 %v2860_v23, %v1313_v19 }
 0x152   : > { %v1574_v27 = vsel %vm1446_vm9, %v1382_v0, %v1510_v59  ;;  %v1606_v30 = vsel %vm1478_vm10, %v1414_v18, %v1542_v43  ;;  %v1416_v45 = vadd.f32 %v2860_v23, %v1345_v35  ;;  %v1383_v13 = vadd.f32 %v2860_v23, %v1312_v47 }
 0x153   : > { %1638 = vst.msk [vmem:[%s2519_s20 + $0xd8] sm:$0xff] %vm304_vm0, %v1574_v27  ;;  %1670 = vst.msk [vmem:[%s2519_s20 + $0x1d8] sm:$0xff] %vm304_vm0, %v1606_v30  ;;  %v1573_v1 = vsel %vm1445_vm11, %v1381_v36, %v1509_v63  ;;  %v1605_v12 = vsel %vm1477_vm12, %v1413_v46, %v1541_v54  ;;  %v1415_v17 = vadd.f32 %v2860_v23, %v1344_v58  ;;  %vm1448_vm13 = vcmp.ge.f32.partialorder %v1384_v44, 0.0 }
 0x154   : > { %1637 = vst.msk [vmem:[%s2519_s20 + $0xd0] sm:$0xff] %vm304_vm0, %v1573_v1  ;;  %1669 = vst.msk [vmem:[%s2519_s20 + $0x1d0] sm:$0xff] %vm304_vm0, %v1605_v12  ;;  %v1512_v25 = vmul.f32 0.2, %v1384_v44  ;;  %vm1480_vm14 = vcmp.ge.f32.partialorder %v1416_v45, 0.0  ;;  %vm1447_vm15 = vcmp.ge.f32.partialorder %v1383_v13, 0.0  ;;  %v1315_v37 = vmul.f32 %v2851_v7, %v1244_v16 }
 0x155   : > { %v1544_v26 = vmul.f32 0.2, %v1416_v45  ;;  %v1511_v31 = vmul.f32 0.2, %v1383_v13  ;;  %vm1479_vm1 = vcmp.ge.f32.partialorder %v1415_v17, 0.0  ;;  %v1347_v39 = vmul.f32 %v2851_v7, %v1276_v38 }
 0x156   : > { %v1543_v32 = vmul.f32 0.2, %v1415_v17  ;;  %v1576_v33 = vsel %vm1448_vm13, %v1384_v44, %v1512_v25  ;;  %v1314_v21 = vmul.f32 %v2851_v7, %v1243_v22  ;;  %v1346_v48 = vmul.f32 %v2851_v7, %v1275_v24 }
 0x157   : > { %v1608_v34 = vsel %vm1480_vm14, %v1416_v45, %v1544_v26  ;;  %1640 = vst.msk [vmem:[%s2519_s20 + $0xe8] sm:$0xff] %vm304_vm0, %v1576_v33  ;;  %v1575_v40 = vsel %vm1447_vm15, %v1383_v13, %v1511_v31  ;;  %v1386_v28 = vadd.f32 %v2860_v23, %v1315_v37  ;;  %v1418_v29 = vadd.f32 %v2860_v23, %v1347_v39 }
 0x158   : > { %1672 = vst.msk [vmem:[%s2519_s20 + $0x1e8] sm:$0xff] %vm304_vm0, %v1608_v34  ;;  %v1607_v20 = vsel %vm1479_vm1, %v1415_v17, %v1543_v32  ;;  %1639 = vst.msk [vmem:[%s2519_s20 + $0xe0] sm:$0xff] %vm304_vm0, %v1575_v40  ;;  %v1385_v41 = vadd.f32 %v2860_v23, %v1314_v21  ;;  %v1417_v49 = vadd.f32 %v2860_v23, %v1346_v48 }
 0x159   : > { %1671 = vst.msk [vmem:[%s2519_s20 + $0x1e0] sm:$0xff] %vm304_vm0, %v1607_v20  ;;  %vm1450_vm2 = vcmp.ge.f32.partialorder %v1386_v28, 0.0  ;;  %v1514_v50 = vmul.f32 0.2, %v1386_v28  ;;  %vm1482_vm3 = vcmp.ge.f32.partialorder %v1418_v29, 0.0 }
 0x15a   : > { %v1546_v7 = vmul.f32 0.2, %v1418_v29  ;;  %vm1449_vm4 = vcmp.ge.f32.partialorder %v1385_v41, 0.0  ;;  %v1513_v51 = vmul.f32 0.2, %v1385_v41  ;;  %vm1481_vm5 = vcmp.ge.f32.partialorder %v1417_v49, 0.0 }
 0x15b   : > { %v1545_v52 = vmul.f32 0.2, %v1417_v49  ;;  %v1578_v55 = vsel %vm1450_vm2, %v1386_v28, %v1514_v50 }
 0x15c   : > { %v1610_v56 = vsel %vm1482_vm3, %v1418_v29, %v1546_v7  ;;  %1642 = vst.msk [vmem:[%s2519_s20 + $0xf8] sm:$0xff] %vm304_vm0, %v1578_v55  ;;  %v1577_v57 = vsel %vm1449_vm4, %v1385_v41, %v1513_v51 }
 0x15d   : > { %1674 = vst.msk [vmem:[%s2519_s20 + $0x1f8] sm:$0xff] %vm304_vm0, %v1610_v56  ;;  %v1609_v60 = vsel %vm1481_vm5, %v1417_v49, %v1545_v52  ;;  %1641 = vst.msk [vmem:[%s2519_s20 + $0xf0] sm:$0xff] %vm304_vm0, %v1577_v57 }
 0x15e   : > { %1673 = vst.msk [vmem:[%s2519_s20 + $0x1f0] sm:$0xff] %vm304_vm0, %v1609_v60 }
 0x15f PF: > { %s14_s17 = sadd.s32 1, %s2123_s17   ;;  %s2953_s15 = smov %s2119_s16 }
 0x160   : > { %p11_p5 = scmp.ge.s32.totalorder %s14_s17, 6   ;;  %s2954_s16 = smov %s2956_s18 }
 0x162   :  { %13 = sbr.rel (!%p11_p5) target bundleno = 2 (0x2), region = 83 }

// kernel: _lambda_.11
= control target key start
LH: loop header
LB: loop body
LE: loop exit
PB: predicated region body
PF: predicated region fallthrough
CT: control target
= control target key end

     0   :  { %vm21_vm0 = vcmask 64512   ;;  %v1675_v3 = vmov 0.0   ;;  %vm222_vm1 = vcmask 523264   ;;  %s2693_s1 = inlined_call_operand.vmem [shape: f32[64,8], index: 1, kind: input, shape index: {}]   ;;  %s2694_s0 = inlined_call_operand.vmem [shape: f32[512,64], index: 0, kind: input, shape index: {}]   ;;  %s2695_s2 = inlined_call_operand.vmem [shape: f32[1,8], index: 2, kind: input, shape index: {}]   ;;  %s2696_s3 = inlined_call_operand.vmem [shape: f32[1,8], index: 3, kind: input, shape index: {}]   ;;  %s2697_s4 = inlined_call_operand.vmem [shape: f32[512,8], index: 4, kind: output, shape index: {}]  }
   0x1   :  { %v1704_v0 = vld [vmem:[%s2693_s1] sm:$0xff]  ;;  %v1709_v1 = vld [vmem:[%s2693_s1 + $0x8] sm:$0xff]  ;;  %v1714_v2 = vld [vmem:[%s2693_s1 + $0x10] sm:$0xff]  ;;  %23 = vst.msk [vmem:[#allocation2 + $0x8] sm:$0xff] %vm21_vm0, %v1675_v3 }
   0x2   :  { %22 = vst.msk [vmem:[#allocation2] sm:$0xff] %vm21_vm0, %v1675_v3  ;;  %24 = vst.msk [vmem:[#allocation2 + $0x10] sm:$0xff] %vm21_vm0, %v1675_v3  ;;  %v1648_v4 = vpack.c.bf16 %v1709_v1, %v1704_v0  ;;  %v217_v5 = vld [vmem:[%s2693_s1 + $0x18] sm:$0xff]  ;;  %v218_v7 = vld [vmem:[%s2693_s1 + $0x20] sm:$0xff] }
   0x3   :  { %25 = vst.msk [vmem:[#allocation2 + $0x18] sm:$0xff] %vm21_vm0, %v1675_v3  ;;  %26 = vst.msk [vmem:[#allocation2 + $0x20] sm:$0xff] %vm21_vm0, %v1675_v3  ;;  %v1652_v6 = vpack.c.bf16 %v217_v5, %v1714_v2  ;;  %v219_v8 = vld [vmem:[%s2693_s1 + $0x28] sm:$0xff]  ;;  %v150_v9 = vld [vmem:[%s2694_s0] sm:$0xff] }
   0x4   :  { %27 = vst.msk [vmem:[#allocation2 + $0x28] sm:$0xff] %vm21_vm0, %v1675_v3  ;;  %28 = vst.msk [vmem:[#allocation2 + $0x30] sm:$0xff] %vm21_vm0, %v1675_v3  ;;  %1649 = vmatprep.subr.bf16.mxu0 %v1648_v4  ;;  %1664 = vmatprep.subr.bf16.mxu1 %v1648_v4  ;;  %v182_v10 = vld [vmem:[%s2694_s0 + $0x100] sm:$0xff]  ;;  %v1656_v11 = vpack.c.bf16 %v219_v8, %v218_v7  ;;  %v220_v12 = vld [vmem:[%s2693_s1 + $0x30] sm:$0xff] }
   0x5   :  { %29 = vst.msk [vmem:[#allocation2 + $0x38] sm:$0xff] %vm21_vm0, %v1675_v3  ;;  %30 = vst.msk [vmem:[#allocation2 + $0x40] sm:$0xff] %vm21_vm0, %v1675_v3  ;;  %1651 = vmatpush3.bf16.msra.mxu0 %v1648_v4  ;;  %1668 = vmatpush3.bf16.msra.mxu1 %v1648_v4  ;;  %v221_v13 = vld [vmem:[%s2693_s1 + $0x38] sm:$0xff]  ;;  %v151_v15 = vld [vmem:[%s2694_s0 + $0x8] sm:$0xff] }
   0x6   :  { %31 = vst.msk [vmem:[#allocation2 + $0x48] sm:$0xff] %vm21_vm0, %v1675_v3  ;;  %32 = vst.msk [vmem:[#allocation2 + $0x50] sm:$0xff] %vm21_vm0, %v1675_v3  ;;  %1653 = vmatprep.subr.bf16.mxu0 %v1652_v6  ;;  %1665 = vmatprep.subr.bf16.mxu1 %v1652_v6  ;;  %v1660_v14 = vpack.c.bf16 %v221_v13, %v220_v12  ;;  %v183_v16 = vld [vmem:[%s2694_s0 + $0x108] sm:$0xff]  ;;  %v152_v17 = vld [vmem:[%s2694_s0 + $0x10] sm:$0xff] }
   0x7   :  { %33 = vst.msk [vmem:[#allocation2 + $0x58] sm:$0xff] %vm21_vm0, %v1675_v3  ;;  %34 = vst.msk [vmem:[#allocation2 + $0x60] sm:$0xff] %vm21_vm0, %v1675_v3  ;;  %1552 = vmatprep.mubr.msk.f32.mxu0 %vm222_vm1, %v150_v9  ;;  %1600 = vmatprep.mubr.msk.f32.mxu1 %vm222_vm1, %v182_v10  ;;  %v184_v18 = vld [vmem:[%s2694_s0 + $0x110] sm:$0xff]  ;;  %v153_v19 = vld [vmem:[%s2694_s0 + $0x18] sm:$0xff] }
   0x8   :  { %35 = vst.msk [vmem:[#allocation2 + $0x68] sm:$0xff] %vm21_vm0, %v1675_v3  ;;  %36 = vst.msk [vmem:[#allocation2 + $0x70] sm:$0xff] %vm21_vm0, %v1675_v3  ;;  %v185_v20 = vld [vmem:[%s2694_s0 + $0x118] sm:$0xff]  ;;  %v154_v21 = vld [vmem:[%s2694_s0 + $0x20] sm:$0xff] }
   0x9   :  { %37 = vst.msk [vmem:[#allocation2 + $0x78] sm:$0xff] %vm21_vm0, %v1675_v3  ;;  %38 = vst.msk [vmem:[#allocation2 + $0x80] sm:$0xff] %vm21_vm0, %v1675_v3  ;;  %1655 = vmatpush3.bf16.msra.mxu0 %v1652_v6  ;;  %1669 = vmatpush3.bf16.msra.mxu1 %v1652_v6  ;;  %v186_v22 = vld [vmem:[%s2694_s0 + $0x120] sm:$0xff]  ;;  %v155_v23 = vld [vmem:[%s2694_s0 + $0x28] sm:$0xff] }
   0xa   :  { %39 = vst.msk [vmem:[#allocation2 + $0x88] sm:$0xff] %vm21_vm0, %v1675_v3  ;;  %40 = vst.msk [vmem:[#allocation2 + $0x90] sm:$0xff] %vm21_vm0, %v1675_v3  ;;  %1657 = vmatprep.subr.bf16.mxu0 %v1656_v11  ;;  %1666 = vmatprep.subr.bf16.mxu1 %v1656_v11  ;;  %v187_v24 = vld [vmem:[%s2694_s0 + $0x128] sm:$0xff]  ;;  %v156_v25 = vld [vmem:[%s2694_s0 + $0x30] sm:$0xff] }
   0xb   :  { %41 = vst.msk [vmem:[#allocation2 + $0x98] sm:$0xff] %vm21_vm0, %v1675_v3  ;;  %42 = vst.msk [vmem:[#allocation2 + $0xa0] sm:$0xff] %vm21_vm0, %v1675_v3  ;;  %v188_v26 = vld [vmem:[%s2694_s0 + $0x130] sm:$0xff]  ;;  %v157_v27 = vld [vmem:[%s2694_s0 + $0x38] sm:$0xff] }
   0xc   :  { %43 = vst.msk [vmem:[#allocation2 + $0xa8] sm:$0xff] %vm21_vm0, %v1675_v3  ;;  %44 = vst.msk [vmem:[#allocation2 + $0xb0] sm:$0xff] %vm21_vm0, %v1675_v3  ;;  %v189_v28 = vld [vmem:[%s2694_s0 + $0x138] sm:$0xff]  ;;  %v158_v29 = vld [vmem:[%s2694_s0 + $0x40] sm:$0xff] }
   0xd   :  { %45 = vst.msk [vmem:[#allocation2 + $0xb8] sm:$0xff] %vm21_vm0, %v1675_v3  ;;  %46 = vst.msk [vmem:[#allocation2 + $0xc0] sm:$0xff] %vm21_vm0, %v1675_v3  ;;  %1659 = vmatpush3.bf16.msra.mxu0 %v1656_v11  ;;  %1670 = vmatpush3.bf16.msra.mxu1 %v1656_v11  ;;  %v190_v30 = vld [vmem:[%s2694_s0 + $0x140] sm:$0xff]  ;;  %v159_v31 = vld [vmem:[%s2694_s0 + $0x48] sm:$0xff] }
   0xe   :  { %47 = vst.msk [vmem:[#allocation2 + $0xc8] sm:$0xff] %vm21_vm0, %v1675_v3  ;;  %48 = vst.msk [vmem:[#allocation2 + $0xd0] sm:$0xff] %vm21_vm0, %v1675_v3  ;;  %1661 = vmatprep.subr.bf16.mxu0 %v1660_v14  ;;  %1667 = vmatprep.subr.bf16.mxu1 %v1660_v14  ;;  %v191_v32 = vld [vmem:[%s2694_s0 + $0x148] sm:$0xff]  ;;  %v160_v33 = vld [vmem:[%s2694_s0 + $0x50] sm:$0xff] }
   0xf   :  { %49 = vst.msk [vmem:[#allocation2 + $0xd8] sm:$0xff] %vm21_vm0, %v1675_v3  ;;  %50 = vst.msk [vmem:[#allocation2 + $0xe0] sm:$0xff] %vm21_vm0, %v1675_v3  ;;  %v192_v34 = vld [vmem:[%s2694_s0 + $0x150] sm:$0xff]  ;;  %v161_v35 = vld [vmem:[%s2694_s0 + $0x58] sm:$0xff] }
  0x10   :  { %51 = vst.msk [vmem:[#allocation2 + $0xe8] sm:$0xff] %vm21_vm0, %v1675_v3  ;;  %52 = vst.msk [vmem:[#allocation2 + $0xf0] sm:$0xff] %vm21_vm0, %v1675_v3  ;;  %v193_v36 = vld [vmem:[%s2694_s0 + $0x158] sm:$0xff]  ;;  %v162_v37 = vld [vmem:[%s2694_s0 + $0x60] sm:$0xff] }
  0x11   :  { %53 = vst.msk [vmem:[#allocation2 + $0xf8] sm:$0xff] %vm21_vm0, %v1675_v3  ;;  %54 = vst.msk [vmem:[#allocation2 + $0x100] sm:$0xff] %vm21_vm0, %v1675_v3  ;;  %1663 = vmatpush3.bf16.msra.mxu0 %v1660_v14  ;;  %1671 = vmatpush3.bf16.msra.mxu1 %v1660_v14  ;;  %v194_v38 = vld [vmem:[%s2694_s0 + $0x160] sm:$0xff]  ;;  %v163_v39 = vld [vmem:[%s2694_s0 + $0x68] sm:$0xff] }
  0x12   :  { %55 = vst.msk [vmem:[#allocation2 + $0x108] sm:$0xff] %vm21_vm0, %v1675_v3  ;;  %56 = vst.msk [vmem:[#allocation2 + $0x110] sm:$0xff] %vm21_vm0, %v1675_v3  ;;  %v195_v40 = vld [vmem:[%s2694_s0 + $0x168] sm:$0xff]  ;;  %v164_v41 = vld [vmem:[%s2694_s0 + $0x70] sm:$0xff] }
  0x13   :  { %57 = vst.msk [vmem:[#allocation2 + $0x118] sm:$0xff] %vm21_vm0, %v1675_v3  ;;  %58 = vst.msk [vmem:[#allocation2 + $0x120] sm:$0xff] %vm21_vm0, %v1675_v3  ;;  %v196_v42 = vld [vmem:[%s2694_s0 + $0x170] sm:$0xff]  ;;  %v165_v43 = vld [vmem:[%s2694_s0 + $0x78] sm:$0xff] }
  0x14   :  { %59 = vst.msk [vmem:[#allocation2 + $0x128] sm:$0xff] %vm21_vm0, %v1675_v3  ;;  %60 = vst.msk [vmem:[#allocation2 + $0x130] sm:$0xff] %vm21_vm0, %v1675_v3  ;;  %1553 = vmatmul.mubr.msk.f32.vlgmr.msra.gmra.mrb[0].mxu0 %vm222_vm1, %v151_v15  ;;  %1601 = vmatmul.mubr.msk.f32.vlgmr.msra.gmra.mrb[0].mxu1 %vm222_vm1, %v183_v16  ;;  %v197_v44 = vld [vmem:[%s2694_s0 + $0x178] sm:$0xff]  ;;  %v166_v45 = vld [vmem:[%s2694_s0 + $0x80] sm:$0xff] }
  0x15   :  { %61 = vst.msk [vmem:[#allocation2 + $0x138] sm:$0xff] %vm21_vm0, %v1675_v3  ;;  %62 = vst.msk [vmem:[#allocation2 + $0x140] sm:$0xff] %vm21_vm0, %v1675_v3  ;;  %1555 = vmatprep.mubr.msk.f32.mxu0 %vm222_vm1, %v152_v17  ;;  %1603 = vmatprep.mubr.msk.f32.mxu1 %vm222_vm1, %v184_v18  ;;  %v198_v46 = vld [vmem:[%s2694_s0 + $0x180] sm:$0xff]  ;;  %v167_v47 = vld [vmem:[%s2694_s0 + $0x88] sm:$0xff] }
  0x16   :  { %63 = vst.msk [vmem:[#allocation2 + $0x148] sm:$0xff] %vm21_vm0, %v1675_v3  ;;  %64 = vst.msk [vmem:[#allocation2 + $0x150] sm:$0xff] %vm21_vm0, %v1675_v3  ;;  %v199_v48 = vld [vmem:[%s2694_s0 + $0x188] sm:$0xff]  ;;  %v168_v49 = vld [vmem:[%s2694_s0 + $0x90] sm:$0xff] }
  0x17   :  { %65 = vst.msk [vmem:[#allocation2 + $0x158] sm:$0xff] %vm21_vm0, %v1675_v3  ;;  %66 = vst.msk [vmem:[#allocation2 + $0x160] sm:$0xff] %vm21_vm0, %v1675_v3  ;;  %v200_v50 = vld [vmem:[%s2694_s0 + $0x190] sm:$0xff]  ;;  %v169_v51 = vld [vmem:[%s2694_s0 + $0x98] sm:$0xff] }
  0x18   :  { %67 = vst.msk [vmem:[#allocation2 + $0x168] sm:$0xff] %vm21_vm0, %v1675_v3  ;;  %68 = vst.msk [vmem:[#allocation2 + $0x170] sm:$0xff] %vm21_vm0, %v1675_v3  ;;  %1556 = vmatmul.mubr.msk.f32.gmra.mrb[2].mxu0 %vm222_vm1, %v153_v19  ;;  %1604 = vmatmul.mubr.msk.f32.gmra.mrb[2].mxu1 %vm222_vm1, %v185_v20  ;;  %v201_v52 = vld [vmem:[%s2694_s0 + $0x198] sm:$0xff]  ;;  %v170_v53 = vld [vmem:[%s2694_s0 + $0xa0] sm:$0xff] }
  0x19   :  { %69 = vst.msk [vmem:[#allocation2 + $0x178] sm:$0xff] %vm21_vm0, %v1675_v3  ;;  %70 = vst.msk [vmem:[#allocation2 + $0x180] sm:$0xff] %vm21_vm0, %v1675_v3  ;;  %1558 = vmatprep.mubr.msk.f32.mxu0 %vm222_vm1, %v154_v21  ;;  %1606 = vmatprep.mubr.msk.f32.mxu1 %vm222_vm1, %v186_v22  ;;  %v202_v54 = vld [vmem:[%s2694_s0 + $0x1a0] sm:$0xff]  ;;  %v171_v55 = vld [vmem:[%s2694_s0 + $0xa8] sm:$0xff] }
  0x1a   :  { %71 = vst.msk [vmem:[#allocation2 + $0x188] sm:$0xff] %vm21_vm0, %v1675_v3  ;;  %72 = vst.msk [vmem:[#allocation2 + $0x190] sm:$0xff] %vm21_vm0, %v1675_v3  ;;  %v203_v56 = vld [vmem:[%s2694_s0 + $0x1a8] sm:$0xff]  ;;  %v172_v57 = vld [vmem:[%s2694_s0 + $0xb0] sm:$0xff] }
  0x1b   :  { %73 = vst.msk [vmem:[#allocation2 + $0x198] sm:$0xff] %vm21_vm0, %v1675_v3  ;;  %74 = vst.msk [vmem:[#allocation2 + $0x1a0] sm:$0xff] %vm21_vm0, %v1675_v3  ;;  %v204_v58 = vld [vmem:[%s2694_s0 + $0x1b0] sm:$0xff]  ;;  %v173_v59 = vld [vmem:[%s2694_s0 + $0xb8] sm:$0xff] }
  0x1c   :  { %75 = vst.msk [vmem:[#allocation2 + $0x1a8] sm:$0xff] %vm21_vm0, %v1675_v3  ;;  %76 = vst.msk [vmem:[#allocation2 + $0x1b0] sm:$0xff] %vm21_vm0, %v1675_v3  ;;  %1559 = vmatmul.mubr.msk.f32.gmra.mrb[4].mxu0 %vm222_vm1, %v155_v23  ;;  %1607 = vmatmul.mubr.msk.f32.gmra.mrb[4].mxu1 %vm222_vm1, %v187_v24  ;;  %v205_v60 = vld [vmem:[%s2694_s0 + $0x1b8] sm:$0xff]  ;;  %v174_v61 = vld [vmem:[%s2694_s0 + $0xc0] sm:$0xff] }
  0x1d   :  { %77 = vst.msk [vmem:[#allocation2 + $0x1b8] sm:$0xff] %vm21_vm0, %v1675_v3  ;;  %78 = vst.msk [vmem:[#allocation2 + $0x1c0] sm:$0xff] %vm21_vm0, %v1675_v3  ;;  %1561 = vmatprep.mubr.msk.f32.mxu0 %vm222_vm1, %v156_v25  ;;  %1609 = vmatprep.mubr.msk.f32.mxu1 %vm222_vm1, %v188_v26  ;;  %v206_v62 = vld [vmem:[%s2694_s0 + $0x1c0] sm:$0xff]  ;;  %v175_v63 = vld [vmem:[%s2694_s0 + $0xc8] sm:$0xff] }
  0x1e   :  { %79 = vst.msk [vmem:[#allocation2 + $0x1c8] sm:$0xff] %vm21_vm0, %v1675_v3  ;;  %80 = vst.msk [vmem:[#allocation2 + $0x1d0] sm:$0xff] %vm21_vm0, %v1675_v3  ;;  %v207_v0 = vld [vmem:[%s2694_s0 + $0x1c8] sm:$0xff]  ;;  %v176_v1 = vld [vmem:[%s2694_s0 + $0xd0] sm:$0xff] }
  0x1f   :  { %81 = vst.msk [vmem:[#allocation2 + $0x1d8] sm:$0xff] %vm21_vm0, %v1675_v3  ;;  %82 = vst.msk [vmem:[#allocation2 + $0x1e0] sm:$0xff] %vm21_vm0, %v1675_v3  ;;  %v208_v2 = vld [vmem:[%s2694_s0 + $0x1d0] sm:$0xff]  ;;  %v209_v4 = vld [vmem:[%s2694_s0 + $0x1d8] sm:$0xff] }
  0x20   :  { %83 = vst.msk [vmem:[#allocation2 + $0x1e8] sm:$0xff] %vm21_vm0, %v1675_v3  ;;  %84 = vst.msk [vmem:[#allocation2 + $0x1f0] sm:$0xff] %vm21_vm0, %v1675_v3  ;;  %1562 = vmatmul.mubr.msk.f32.gmra.mrb[6].mxu0 %vm222_vm1, %v157_v27  ;;  %1610 = vmatmul.mubr.msk.f32.gmra.mrb[6].mxu1 %vm222_vm1, %v189_v28  ;;  %v178_v5 = vld [vmem:[%s2694_s0 + $0xe0] sm:$0xff]  ;;  %v179_v7 = vld [vmem:[%s2694_s0 + $0xe8] sm:$0xff] }
  0x21   :  { %85 = vst.msk [vmem:[#allocation2 + $0x1f8] sm:$0xff] %vm21_vm0, %v1675_v3  ;;  %1564 = vmatprep.mubr.msk.f32.mxu0 %vm222_vm1, %v158_v29  ;;  %1612 = vmatprep.mubr.msk.f32.mxu1 %vm222_vm1, %v190_v30  ;;  %v177_v3 = vld [vmem:[%s2694_s0 + $0xd8] sm:$0xff]  ;;  %v210_v6 = vld [vmem:[%s2694_s0 + $0x1e0] sm:$0xff]  ;;  %v211_v8 = vld [vmem:[%s2694_s0 + $0x1e8] sm:$0xff] }
  0x22   :  { %v180_v9 = vld [vmem:[%s2694_s0 + $0xf0] sm:$0xff]  ;;  %v181_v11 = vld [vmem:[%s2694_s0 + $0xf8] sm:$0xff]  ;;  %v87_v13 = vld [vmem:[#allocation2 + $0x8] sm:$0xff] }
  0x23   :  { %v212_v10 = vld [vmem:[%s2694_s0 + $0x1f0] sm:$0xff]  ;;  %v213_v12 = vld [vmem:[%s2694_s0 + $0x1f8] sm:$0xff]  ;;  %v119_v14 = vld [vmem:[#allocation2 + $0x108] sm:$0xff] }
  0x24   :  { %1565 = vmatmul.mubr.msk.f32.gmra.mrb[8].mxu0 %vm222_vm1, %v159_v31  ;;  %1613 = vmatmul.mubr.msk.f32.gmra.mrb[8].mxu1 %vm222_vm1, %v191_v32  ;;  %v86_v15 = vld [vmem:[#allocation2] sm:$0xff]  ;;  %v89_v25 = vld [vmem:[#allocation2 + $0x18] sm:$0xff]  ;;  %v88_v27 = vld [vmem:[#allocation2 + $0x10] sm:$0xff] }
  0x25   :  { %1567 = vmatprep.mubr.msk.f32.mxu0 %vm222_vm1, %v160_v33  ;;  %1615 = vmatprep.mubr.msk.f32.mxu1 %vm222_vm1, %v192_v34  ;;  %v118_v16 = vld [vmem:[#allocation2 + $0x100] sm:$0xff]  ;;  %v121_v26 = vld [vmem:[#allocation2 + $0x118] sm:$0xff]  ;;  %v120_v28 = vld [vmem:[#allocation2 + $0x110] sm:$0xff] }
  0x28   :  { %1568 = vmatmul.mubr.msk.f32.gmra.mrb[10].mxu0 %vm222_vm1, %v161_v35  ;;  %1616 = vmatmul.mubr.msk.f32.gmra.mrb[10].mxu1 %vm222_vm1, %v193_v36 }
  0x29   :  { %1570 = vmatprep.mubr.msk.f32.mxu0 %vm222_vm1, %v162_v37  ;;  %1618 = vmatprep.mubr.msk.f32.mxu1 %vm222_vm1, %v194_v38  ;;  %v91_v37 = vld [vmem:[#allocation2 + $0x28] sm:$0xff] }
  0x2a   :  { %v123_v38 = vld [vmem:[#allocation2 + $0x128] sm:$0xff] }
  0x2c   :  { %1571 = vmatmul.mubr.msk.f32.gmra.mrb[12].mxu0 %vm222_vm1, %v163_v39  ;;  %1619 = vmatmul.mubr.msk.f32.gmra.mrb[12].mxu1 %vm222_vm1, %v195_v40  ;;  %v90_v39 = vld [vmem:[#allocation2 + $0x20] sm:$0xff] }
  0x2d   :  { %1573 = vmatprep.mubr.msk.f32.mxu0 %vm222_vm1, %v164_v41  ;;  %1621 = vmatprep.mubr.msk.f32.mxu1 %vm222_vm1, %v196_v42  ;;  %v122_v40 = vld [vmem:[#allocation2 + $0x120] sm:$0xff] }
  0x2e   :  { %v2127_v41 = vld [vmem:[%s2695_s2] ss:$0 sm:$0xff] }
  0x30   :  { %1574 = vmatmul.mubr.msk.f32.gmra.mrb[14].mxu0 %vm222_vm1, %v165_v43  ;;  %1622 = vmatmul.mubr.msk.f32.gmra.mrb[14].mxu1 %vm222_vm1, %v197_v44  ;;  %v2134_v44 = vld [vmem:[%s2696_s3] ss:$0 sm:$0xff] }
  0x31   :  { %1576 = vmatprep.mubr.msk.f32.mxu0 %vm222_vm1, %v166_v45  ;;  %1624 = vmatprep.mubr.msk.f32.mxu1 %vm222_vm1, %v198_v46 }
  0x34   :  { %1577 = vmatmul.mubr.msk.f32.gmra.mrb[16].mxu0 %vm222_vm1, %v167_v47  ;;  %1625 = vmatmul.mubr.msk.f32.gmra.mrb[16].mxu1 %vm222_vm1, %v199_v48 }
  0x35   :  { %1579 = vmatprep.mubr.msk.f32.mxu0 %vm222_vm1, %v168_v49  ;;  %1627 = vmatprep.mubr.msk.f32.mxu1 %vm222_vm1, %v200_v50  ;;  %v93_v49 = vld [vmem:[#allocation2 + $0x38] sm:$0xff] }
  0x36   :  { %v125_v50 = vld [vmem:[#allocation2 + $0x138] sm:$0xff] }
  0x38   :  { %1580 = vmatmul.mubr.msk.f32.gmra.mrb[18].mxu0 %vm222_vm1, %v169_v51  ;;  %1628 = vmatmul.mubr.msk.f32.gmra.mrb[18].mxu1 %vm222_vm1, %v201_v52 }
  0x39   :  { %1582 = vmatprep.mubr.msk.f32.mxu0 %vm222_vm1, %v170_v53  ;;  %1630 = vmatprep.mubr.msk.f32.mxu1 %vm222_vm1, %v202_v54 }
  0x3c   :  { %1583 = vmatmul.mubr.msk.f32.gmra.mrb[20].mxu0 %vm222_vm1, %v171_v55  ;;  %1631 = vmatmul.mubr.msk.f32.gmra.mrb[20].mxu1 %vm222_vm1, %v203_v56  ;;  %v92_v55 = vld [vmem:[#allocation2 + $0x30] sm:$0xff] }
  0x3d   :  { %1585 = vmatprep.mubr.msk.f32.mxu0 %vm222_vm1, %v172_v57  ;;  %1633 = vmatprep.mubr.msk.f32.mxu1 %vm222_vm1, %v204_v58 }
  0x40   :  { %1586 = vmatmul.mubr.msk.f32.gmra.mrb[22].mxu0 %vm222_vm1, %v173_v59  ;;  %1634 = vmatmul.mubr.msk.f32.gmra.mrb[22].mxu1 %vm222_vm1, %v205_v60  ;;  %v124_v60 = vld [vmem:[#allocation2 + $0x130] sm:$0xff] }
  0x41   :  { %1588 = vmatprep.mubr.msk.f32.mxu0 %vm222_vm1, %v174_v61  ;;  %1636 = vmatprep.mubr.msk.f32.mxu1 %vm222_vm1, %v206_v62 }
  0x44   :  { %1589 = vmatmul.mubr.msk.f32.gmra.mrb[24].mxu0 %vm222_vm1, %v175_v63  ;;  %1637 = vmatmul.mubr.msk.f32.gmra.mrb[24].mxu1 %vm222_vm1, %v207_v0 }
  0x45   :  { %1591 = vmatprep.mubr.msk.f32.mxu0 %vm222_vm1, %v176_v1  ;;  %1639 = vmatprep.mubr.msk.f32.mxu1 %vm222_vm1, %v208_v2 }
  0x48   :  { %1592 = vmatmul.mubr.msk.f32.gmra.mrb[26].mxu0 %vm222_vm1, %v177_v3  ;;  %1640 = vmatmul.mubr.msk.f32.gmra.mrb[26].mxu1 %vm222_vm1, %v209_v4 }
  0x49   :  { %1594 = vmatprep.mubr.msk.f32.mxu0 %vm222_vm1, %v178_v5  ;;  %1642 = vmatprep.mubr.msk.f32.mxu1 %vm222_vm1, %v210_v6 }
  0x4c   :  { %1595 = vmatmul.mubr.msk.f32.gmra.mrb[28].mxu0 %vm222_vm1, %v179_v7  ;;  %1643 = vmatmul.mubr.msk.f32.gmra.mrb[28].mxu1 %vm222_vm1, %v211_v8 }
  0x4d   :  { %1597 = vmatprep.mubr.msk.f32.mxu0 %vm222_vm1, %v180_v9  ;;  %1645 = vmatprep.mubr.msk.f32.mxu1 %vm222_vm1, %v212_v10 }
  0x50   :  { %1598 = vmatmul.mubr.msk.f32.gmra.mrb[30].mxu0 %vm222_vm1, %v181_v11  ;;  %1646 = vmatmul.mubr.msk.f32.gmra.mrb[30].mxu1 %vm222_vm1, %v213_v12 }
  0xe7   :  { %v1554_v17 = vpop.f32.mrb[0].mxu0  ;;  %v1602_v18 = vpop.f32.mrb[0].mxu1 }
  0xe8   :  { %v801_v19 = vadd.f32 %v1554_v17, %v87_v13  ;;  %v833_v20 = vadd.f32 %v1602_v18, %v119_v14  ;;  %v481_v21 = vpop.f32.mrb[1].mxu0  ;;  %v641_v22 = vpop.f32.mrb[1].mxu1 }
  0xe9   :  { %v800_v23 = vadd.f32 %v481_v21, %v86_v15  ;;  %v832_v24 = vadd.f32 %v641_v22, %v118_v16 }
  0xea   :  { %866 = vst.msk [vmem:[#allocation2 + $0x8] sm:$0xff] %vm21_vm0, %v801_v19  ;;  %898 = vst.msk [vmem:[#allocation2 + $0x108] sm:$0xff] %vm21_vm0, %v833_v20 }
  0xeb   :  { %865 = vst.msk [vmem:[#allocation2] sm:$0xff] %vm21_vm0, %v800_v23  ;;  %897 = vst.msk [vmem:[#allocation2 + $0x100] sm:$0xff] %vm21_vm0, %v832_v24  ;;  %v1557_v29 = vpop.f32.mrb[2].mxu0  ;;  %v1605_v30 = vpop.f32.mrb[2].mxu1 }
  0xec   :  { %v803_v31 = vadd.f32 %v1557_v29, %v89_v25  ;;  %v835_v32 = vadd.f32 %v1605_v30, %v121_v26  ;;  %v491_v33 = vpop.f32.mrb[3].mxu0  ;;  %v651_v34 = vpop.f32.mrb[3].mxu1 }
  0xed   :  { %v802_v35 = vadd.f32 %v491_v33, %v88_v27  ;;  %v834_v36 = vadd.f32 %v651_v34, %v120_v28 }
  0xee   :  { %868 = vst.msk [vmem:[#allocation2 + $0x18] sm:$0xff] %vm21_vm0, %v803_v31  ;;  %900 = vst.msk [vmem:[#allocation2 + $0x118] sm:$0xff] %vm21_vm0, %v835_v32 }
  0xef   :  { %867 = vst.msk [vmem:[#allocation2 + $0x10] sm:$0xff] %vm21_vm0, %v802_v35  ;;  %899 = vst.msk [vmem:[#allocation2 + $0x110] sm:$0xff] %vm21_vm0, %v834_v36  ;;  %v1560_v42 = vpop.f32.mrb[4].mxu0  ;;  %v1608_v43 = vpop.f32.mrb[4].mxu1 }
  0xf0   :  { %v805_v45 = vadd.f32 %v1560_v42, %v91_v37  ;;  %v837_v46 = vadd.f32 %v1608_v43, %v123_v38  ;;  %v501_v47 = vpop.f32.mrb[5].mxu0  ;;  %v661_v48 = vpop.f32.mrb[5].mxu1 }
  0xf1   :  { %v933_v51 = vld [vmem:[#allocation2 + $0x8] sm:$0xff]  ;;  %v804_v53 = vadd.f32 %v501_v47, %v90_v39  ;;  %v836_v54 = vadd.f32 %v661_v48, %v122_v40 }
  0xf2   :  { %v965_v52 = vld [vmem:[#allocation2 + $0x108] sm:$0xff]  ;;  %v1004_v56 = vmul.f32 %v2127_v41, %v933_v51  ;;  %v932_v58 = vld [vmem:[#allocation2] sm:$0xff]  ;;  %870 = vst.msk [vmem:[#allocation2 + $0x28] sm:$0xff] %vm21_vm0, %v805_v45  ;;  %902 = vst.msk [vmem:[#allocation2 + $0x128] sm:$0xff] %vm21_vm0, %v837_v46 }
  0xf3   :  { %v1036_v57 = vmul.f32 %v2127_v41, %v965_v52  ;;  %v964_v59 = vld [vmem:[#allocation2 + $0x100] sm:$0xff]  ;;  %v1003_v61 = vmul.f32 %v2127_v41, %v932_v58  ;;  %869 = vst.msk [vmem:[#allocation2 + $0x20] sm:$0xff] %vm21_vm0, %v804_v53  ;;  %901 = vst.msk [vmem:[#allocation2 + $0x120] sm:$0xff] %vm21_vm0, %v836_v54  ;;  %v1563_v63 = vpop.f32.mrb[6].mxu0  ;;  %v1611_v0 = vpop.f32.mrb[6].mxu1 }
  0xf4   :  { %v1035_v62 = vmul.f32 %v2127_v41, %v964_v59  ;;  %v1075_v1 = vadd.f32 %v2134_v44, %v1004_v56  ;;  %v807_v3 = vadd.f32 %v1563_v63, %v93_v49  ;;  %v839_v4 = vadd.f32 %v1611_v0, %v125_v50  ;;  %v511_v5 = vpop.f32.mrb[7].mxu0  ;;  %v671_v6 = vpop.f32.mrb[7].mxu1 }
  0xf5   :  { %v1107_v2 = vadd.f32 %v2134_v44, %v1036_v57  ;;  %v1074_v7 = vadd.f32 %v2134_v44, %v1003_v61  ;;  %v935_v9 = vld [vmem:[#allocation2 + $0x18] sm:$0xff]  ;;  %v806_v11 = vadd.f32 %v511_v5, %v92_v55  ;;  %v838_v12 = vadd.f32 %v671_v6, %v124_v60 }
  0xf6   :  { %v1106_v8 = vadd.f32 %v2134_v44, %v1035_v62  ;;  %v967_v10 = vld [vmem:[#allocation2 + $0x118] sm:$0xff]  ;;  %vm1139_vm2 = vcmp.ge.f32.partialorder %v1075_v1, 0.0  ;;  %v1203_v13 = vmul.f32 0.2, %v1075_v1  ;;  %872 = vst.msk [vmem:[#allocation2 + $0x38] sm:$0xff] %vm21_vm0, %v807_v3  ;;  %904 = vst.msk [vmem:[#allocation2 + $0x138] sm:$0xff] %vm21_vm0, %v839_v4  ;;  %v1006_v19 = vmul.f32 %v2127_v41, %v935_v9 }
  0xf7   :  { %vm1171_vm3 = vcmp.ge.f32.partialorder %v1107_v2, 0.0  ;;  %v1235_v14 = vmul.f32 0.2, %v1107_v2  ;;  %vm1138_vm4 = vcmp.ge.f32.partialorder %v1074_v7, 0.0  ;;  %v1202_v15 = vmul.f32 0.2, %v1074_v7 }
  0xf8   :  { %vm1170_vm5 = vcmp.ge.f32.partialorder %v1106_v8, 0.0  ;;  %v1234_v16 = vmul.f32 0.2, %v1106_v8  ;;  %871 = vst.msk [vmem:[#allocation2 + $0x30] sm:$0xff] %vm21_vm0, %v806_v11  ;;  %903 = vst.msk [vmem:[#allocation2 + $0x130] sm:$0xff] %vm21_vm0, %v838_v12  ;;  %v1267_v17 = vsel %vm1139_vm2, %v1075_v1, %v1203_v13  ;;  %v1038_v20 = vmul.f32 %v2127_v41, %v967_v10  ;;  %v934_v21 = vld [vmem:[#allocation2 + $0x10] sm:$0xff] }
  0xf9   :  { %v1299_v18 = vsel %vm1171_vm3, %v1107_v2, %v1235_v14  ;;  %v966_v22 = vld [vmem:[#allocation2 + $0x110] sm:$0xff]  ;;  %v2154_v23 = vpop.f32.mrb[8].mxu0  ;;  %v2156_v24 = vpop.f32.mrb[8].mxu1  ;;  %1331 = vst.msk [vmem:[%s2697_s4 + $0x8] sm:$0xff] %vm21_vm0, %v1267_v17  ;;  %v1266_v25 = vsel %vm1138_vm4, %v1074_v7, %v1202_v15  ;;  %v1005_v27 = vmul.f32 %v2127_v41, %v934_v21  ;;  %v937_v29 = vld [vmem:[#allocation2 + $0x28] sm:$0xff]  ;;  %v1077_v33 = vadd.f32 %v2134_v44, %v1006_v19  ;;  %v94_v13 = vld [vmem:[#allocation2 + $0x40] sm:$0xff] }
  0xfa   :  { %1363 = vst.msk [vmem:[%s2697_s4 + $0x108] sm:$0xff] %vm21_vm0, %v1299_v18  ;;  %v1298_v26 = vsel %vm1170_vm5, %v1106_v8, %v1234_v16  ;;  %v1037_v28 = vmul.f32 %v2127_v41, %v966_v22  ;;  %v969_v30 = vld [vmem:[#allocation2 + $0x128] sm:$0xff]  ;;  %v2169_v31 = vpop.f32.mrb[9].mxu0  ;;  %v2171_v32 = vpop.f32.mrb[9].mxu1  ;;  %1330 = vst.msk [vmem:[%s2697_s4] sm:$0xff] %vm21_vm0, %v1266_v25  ;;  %v1109_v34 = vadd.f32 %v2134_v44, %v1038_v20  ;;  %v936_v37 = vld [vmem:[#allocation2 + $0x20] sm:$0xff] }
  0xfb   :  { %1362 = vst.msk [vmem:[%s2697_s4 + $0x100] sm:$0xff] %vm21_vm0, %v1298_v26  ;;  %v1008_v35 = vmul.f32 %v2127_v41, %v937_v29  ;;  %v1040_v36 = vmul.f32 %v2127_v41, %v969_v30  ;;  %v968_v38 = vld [vmem:[#allocation2 + $0x120] sm:$0xff]  ;;  %v1076_v39 = vadd.f32 %v2134_v44, %v1005_v27  ;;  %v1007_v42 = vmul.f32 %v2127_v41, %v936_v37  ;;  %v2189_v45 = vpop.f32.mrb[10].mxu0  ;;  %v2191_v46 = vpop.f32.mrb[10].mxu1  ;;  %v95_v1 = vld [vmem:[#allocation2 + $0x48] sm:$0xff]  ;;  %v97_v21 = vld [vmem:[#allocation2 + $0x58] sm:$0xff] }
  0xfc   :  { %v1108_v40 = vadd.f32 %v2134_v44, %v1037_v28  ;;  %v1039_v43 = vmul.f32 %v2127_v41, %v968_v38  ;;  %vm1141_vm6 = vcmp.ge.f32.partialorder %v1077_v33, 0.0  ;;  %v1205_v47 = vmul.f32 0.2, %v1077_v33  ;;  %v2195_v56 = vpop.f32.mrb[11].mxu0  ;;  %v2197_v57 = vpop.f32.mrb[11].mxu1  ;;  %v127_v2 = vld [vmem:[#allocation2 + $0x148] sm:$0xff] }
  0xfd   :  { %vm1173_vm7 = vcmp.ge.f32.partialorder %v1109_v34, 0.0  ;;  %v1237_v48 = vmul.f32 0.2, %v1109_v34  ;;  %vm1140_vm8 = vcmp.ge.f32.partialorder %v1076_v39, 0.0  ;;  %v1204_v49 = vmul.f32 0.2, %v1076_v39 }
  0xfe   :  { %vm1172_vm9 = vcmp.ge.f32.partialorder %v1108_v40, 0.0  ;;  %v1236_v50 = vmul.f32 0.2, %v1108_v40  ;;  %v1269_v51 = vsel %vm1141_vm6, %v1077_v33, %v1205_v47  ;;  %v1079_v53 = vadd.f32 %v2134_v44, %v1008_v35  ;;  %v939_v55 = vld [vmem:[#allocation2 + $0x38] sm:$0xff]  ;;  %v126_v14 = vld [vmem:[#allocation2 + $0x140] sm:$0xff]  ;;  %v96_v33 = vld [vmem:[#allocation2 + $0x50] sm:$0xff] }
  0xff   :  { %v1301_v52 = vsel %vm1173_vm7, %v1109_v34, %v1237_v48  ;;  %v1111_v54 = vadd.f32 %v2134_v44, %v1040_v36  ;;  %1333 = vst.msk [vmem:[%s2697_s4 + $0x18] sm:$0xff] %vm21_vm0, %v1269_v51  ;;  %v1268_v58 = vsel %vm1140_vm8, %v1076_v39, %v1204_v49  ;;  %v1078_v60 = vadd.f32 %v2134_v44, %v1007_v42  ;;  %v971_v62 = vld [vmem:[#allocation2 + $0x138] sm:$0xff]  ;;  %v938_v63 = vld [vmem:[#allocation2 + $0x30] sm:$0xff]  ;;  %v2209_v3 = vpop.f32.mrb[12].mxu0  ;;  %v2211_v4 = vpop.f32.mrb[12].mxu1  ;;  %v99_v42 = vld [vmem:[#allocation2 + $0x68] sm:$0xff] }
 0x100   :  { %1365 = vst.msk [vmem:[%s2697_s4 + $0x118] sm:$0xff] %vm21_vm0, %v1301_v52  ;;  %v1300_v59 = vsel %vm1172_vm9, %v1108_v40, %v1236_v50  ;;  %v1110_v61 = vadd.f32 %v2134_v44, %v1039_v43  ;;  %v970_v0 = vld [vmem:[#allocation2 + $0x130] sm:$0xff]  ;;  %1332 = vst.msk [vmem:[%s2697_s4 + $0x10] sm:$0xff] %vm21_vm0, %v1268_v58  ;;  %vm1143_vm10 = vcmp.ge.f32.partialorder %v1079_v53, 0.0  ;;  %v1207_v5 = vmul.f32 0.2, %v1079_v53 }
 0x101   :  { %1364 = vst.msk [vmem:[%s2697_s4 + $0x110] sm:$0xff] %vm21_vm0, %v1300_v59  ;;  %vm1175_vm11 = vcmp.ge.f32.partialorder %v1111_v54, 0.0  ;;  %v1239_v6 = vmul.f32 0.2, %v1111_v54  ;;  %vm1142_vm12 = vcmp.ge.f32.partialorder %v1078_v60, 0.0  ;;  %v1010_v11 = vmul.f32 %v2127_v41, %v939_v55  ;;  %v2223_v15 = vpop.f32.mrb[13].mxu0 }
 0x102   :  { %v1206_v7 = vmul.f32 0.2, %v1078_v60  ;;  %vm1174_vm13 = vcmp.ge.f32.partialorder %v1110_v61, 0.0  ;;  %v1238_v8 = vmul.f32 0.2, %v1110_v61  ;;  %v1271_v9 = vsel %vm1143_vm10, %v1079_v53, %v1207_v5  ;;  %v2225_v16 = vpop.f32.mrb[13].mxu1 }
 0x103   :  { %v1303_v10 = vsel %vm1175_vm11, %v1111_v54, %v1239_v6  ;;  %v1042_v12 = vmul.f32 %v2127_v41, %v971_v62  ;;  %1335 = vst.msk [vmem:[%s2697_s4 + $0x28] sm:$0xff] %vm21_vm0, %v1271_v9  ;;  %v1009_v19 = vmul.f32 %v2127_v41, %v938_v63  ;;  %v1041_v20 = vmul.f32 %v2127_v41, %v970_v0  ;;  %v2237_v22 = vpop.f32.mrb[14].mxu0  ;;  %v2239_v25 = vpop.f32.mrb[14].mxu1  ;;  %v129_v30 = vld [vmem:[#allocation2 + $0x158] sm:$0xff]  ;;  %v128_v34 = vld [vmem:[#allocation2 + $0x150] sm:$0xff]  ;;  %v131_v43 = vld [vmem:[#allocation2 + $0x168] sm:$0xff] }
 0x104   :  { %1367 = vst.msk [vmem:[%s2697_s4 + $0x128] sm:$0xff] %vm21_vm0, %v1303_v10  ;;  %v1270_v17 = vsel %vm1142_vm12, %v1078_v60, %v1206_v7  ;;  %v1302_v18 = vsel %vm1174_vm13, %v1110_v61, %v1238_v8  ;;  %v1081_v26 = vadd.f32 %v2134_v44, %v1010_v11  ;;  %v809_v28 = vadd.f32 %v2154_v23, %v95_v1  ;;  %v551_v35 = vpop.f32.mrb[15].mxu0  ;;  %v711_v36 = vpop.f32.mrb[15].mxu1  ;;  %v98_v47 = vld [vmem:[#allocation2 + $0x60] sm:$0xff]  ;;  %v101_v49 = vld [vmem:[#allocation2 + $0x78] sm:$0xff]  ;;  %v100_v51 = vld [vmem:[#allocation2 + $0x70] sm:$0xff] }
 0x105   :  { %1334 = vst.msk [vmem:[%s2697_s4 + $0x20] sm:$0xff] %vm21_vm0, %v1270_v17  ;;  %1366 = vst.msk [vmem:[%s2697_s4 + $0x120] sm:$0xff] %vm21_vm0, %v1302_v18  ;;  %v1113_v27 = vadd.f32 %v2134_v44, %v1042_v12  ;;  %v841_v29 = vadd.f32 %v2156_v24, %v127_v2  ;;  %v1080_v37 = vadd.f32 %v2134_v44, %v1009_v19  ;;  %v130_v48 = vld [vmem:[#allocation2 + $0x160] sm:$0xff]  ;;  %v133_v50 = vld [vmem:[#allocation2 + $0x178] sm:$0xff] }
 0x106   :  { %v1112_v38 = vadd.f32 %v2134_v44, %v1041_v20  ;;  %v808_v39 = vadd.f32 %v2169_v31, %v94_v13  ;;  %v840_v40 = vadd.f32 %v2171_v32, %v126_v14  ;;  %vm1145_vm14 = vcmp.ge.f32.partialorder %v1081_v26, 0.0  ;;  %874 = vst.msk [vmem:[#allocation2 + $0x48] sm:$0xff] %vm21_vm0, %v809_v28  ;;  %v132_v58 = vld [vmem:[#allocation2 + $0x170] sm:$0xff]  ;;  %v103_v59 = vld [vmem:[#allocation2 + $0x88] sm:$0xff]  ;;  %v102_v1 = vld [vmem:[#allocation2 + $0x80] sm:$0xff] }
 0x107   :  { %v1209_v23 = vmul.f32 0.2, %v1081_v26  ;;  %vm1177_vm15 = vcmp.ge.f32.partialorder %v1113_v27, 0.0  ;;  %v1241_v24 = vmul.f32 0.2, %v1113_v27  ;;  %906 = vst.msk [vmem:[#allocation2 + $0x148] sm:$0xff] %vm21_vm0, %v841_v29  ;;  %v811_v54 = vadd.f32 %v2189_v45, %v97_v21 }
 0x108   :  { %vm1144_vm1 = vcmp.ge.f32.partialorder %v1080_v37, 0.0  ;;  %v1208_v52 = vmul.f32 0.2, %v1080_v37  ;;  %vm1176_vm2 = vcmp.ge.f32.partialorder %v1112_v38, 0.0  ;;  %v1240_v31 = vmul.f32 0.2, %v1112_v38 }
 0x109   :  { %873 = vst.msk [vmem:[#allocation2 + $0x40] sm:$0xff] %vm21_vm0, %v808_v39  ;;  %905 = vst.msk [vmem:[#allocation2 + $0x140] sm:$0xff] %vm21_vm0, %v840_v40  ;;  %v1273_v32 = vsel %vm1145_vm14, %v1081_v26, %v1209_v23  ;;  %v1305_v53 = vsel %vm1177_vm15, %v1113_v27, %v1241_v24  ;;  %v843_v55 = vadd.f32 %v2191_v46, %v129_v30  ;;  %v1578_v60 = vpop.f32.mrb[16].mxu0  ;;  %v135_v61 = vld [vmem:[#allocation2 + $0x188] sm:$0xff]  ;;  %v1626_v62 = vpop.f32.mrb[16].mxu1  ;;  %v134_v5 = vld [vmem:[#allocation2 + $0x180] sm:$0xff] }
 0x10a   :  { %1337 = vst.msk [vmem:[%s2697_s4 + $0x38] sm:$0xff] %vm21_vm0, %v1273_v32  ;;  %1369 = vst.msk [vmem:[%s2697_s4 + $0x138] sm:$0xff] %vm21_vm0, %v1305_v53  ;;  %v1272_v63 = vsel %vm1144_vm1, %v1080_v37, %v1208_v52  ;;  %v1304_v45 = vsel %vm1176_vm2, %v1112_v38, %v1240_v31  ;;  %v810_v46 = vadd.f32 %v2195_v56, %v96_v33  ;;  %v561_v2 = vpop.f32.mrb[17].mxu0  ;;  %v721_v6 = vpop.f32.mrb[17].mxu1  ;;  %v105_v7 = vld [vmem:[#allocation2 + $0x98] sm:$0xff]  ;;  %v104_v11 = vld [vmem:[#allocation2 + $0x90] sm:$0xff] }
 0x10b   :  { %v842_v0 = vadd.f32 %v2197_v57, %v128_v34  ;;  %1336 = vst.msk [vmem:[%s2697_s4 + $0x30] sm:$0xff] %vm21_vm0, %v1272_v63  ;;  %1368 = vst.msk [vmem:[%s2697_s4 + $0x130] sm:$0xff] %vm21_vm0, %v1304_v45  ;;  %v813_v56 = vadd.f32 %v2209_v3, %v99_v42  ;;  %v845_v57 = vadd.f32 %v2211_v4, %v131_v43  ;;  %v137_v10 = vld [vmem:[#allocation2 + $0x198] sm:$0xff]  ;;  %v136_v12 = vld [vmem:[#allocation2 + $0x190] sm:$0xff]  ;;  %v1581_v3 = vpop.f32.mrb[18].mxu0  ;;  %v1629_v19 = vpop.f32.mrb[18].mxu1 }
 0x10c   :  { %876 = vst.msk [vmem:[#allocation2 + $0x58] sm:$0xff] %vm21_vm0, %v811_v54  ;;  %908 = vst.msk [vmem:[#allocation2 + $0x158] sm:$0xff] %vm21_vm0, %v843_v55  ;;  %v812_v8 = vadd.f32 %v2223_v15, %v98_v47  ;;  %v844_v9 = vadd.f32 %v2225_v16, %v130_v48  ;;  %v815_v13 = vadd.f32 %v2237_v22, %v101_v49  ;;  %v571_v21 = vpop.f32.mrb[19].mxu0  ;;  %v731_v22 = vpop.f32.mrb[19].mxu1  ;;  %v107_v26 = vld [vmem:[#allocation2 + $0xa8] sm:$0xff]  ;;  %v138_v40 = vld [vmem:[#allocation2 + $0x1a0] sm:$0xff] }
 0x10d   :  { %875 = vst.msk [vmem:[#allocation2 + $0x50] sm:$0xff] %vm21_vm0, %v810_v46  ;;  %907 = vst.msk [vmem:[#allocation2 + $0x150] sm:$0xff] %vm21_vm0, %v842_v0  ;;  %v847_v14 = vadd.f32 %v2239_v25, %v133_v50  ;;  %v814_v17 = vadd.f32 %v551_v35, %v100_v51  ;;  %v846_v18 = vadd.f32 %v711_v36, %v132_v58  ;;  %v139_v25 = vld [vmem:[#allocation2 + $0x1a8] sm:$0xff]  ;;  %v106_v35 = vld [vmem:[#allocation2 + $0xa0] sm:$0xff] }
 0x10e   :  { %878 = vst.msk [vmem:[#allocation2 + $0x68] sm:$0xff] %vm21_vm0, %v813_v56  ;;  %910 = vst.msk [vmem:[#allocation2 + $0x168] sm:$0xff] %vm21_vm0, %v845_v57  ;;  %v817_v4 = vadd.f32 %v1578_v60, %v103_v59  ;;  %v849_v15 = vadd.f32 %v1626_v62, %v135_v61  ;;  %v816_v16 = vadd.f32 %v561_v2, %v102_v1  ;;  %v941_v27 = vld [vmem:[#allocation2 + $0x48] sm:$0xff] }
 0x10f   :  { %877 = vst.msk [vmem:[#allocation2 + $0x60] sm:$0xff] %vm21_vm0, %v812_v8  ;;  %909 = vst.msk [vmem:[#allocation2 + $0x160] sm:$0xff] %vm21_vm0, %v844_v9  ;;  %v848_v20 = vadd.f32 %v721_v6, %v134_v5  ;;  %v973_v28 = vld [vmem:[#allocation2 + $0x148] sm:$0xff]  ;;  %v819_v29 = vadd.f32 %v1581_v3, %v105_v7  ;;  %v851_v30 = vadd.f32 %v1629_v19, %v137_v10  ;;  %v1584_v47 = vpop.f32.mrb[20].mxu0  ;;  %v1632_v48 = vpop.f32.mrb[20].mxu1 }
 0x110   :  { %880 = vst.msk [vmem:[#allocation2 + $0x78] sm:$0xff] %vm21_vm0, %v815_v13  ;;  %912 = vst.msk [vmem:[#allocation2 + $0x178] sm:$0xff] %vm21_vm0, %v847_v14  ;;  %v818_v33 = vadd.f32 %v571_v21, %v104_v11  ;;  %v850_v34 = vadd.f32 %v731_v22, %v136_v12  ;;  %v1012_v36 = vmul.f32 %v2127_v41, %v941_v27  ;;  %v940_v38 = vld [vmem:[#allocation2 + $0x40] sm:$0xff]  ;;  %v581_v51 = vpop.f32.mrb[21].mxu0  ;;  %v741_v52 = vpop.f32.mrb[21].mxu1 }
 0x111   :  { %879 = vst.msk [vmem:[#allocation2 + $0x70] sm:$0xff] %vm21_vm0, %v814_v17  ;;  %911 = vst.msk [vmem:[#allocation2 + $0x170] sm:$0xff] %vm21_vm0, %v846_v18  ;;  %v1044_v37 = vmul.f32 %v2127_v41, %v973_v28  ;;  %v972_v39 = vld [vmem:[#allocation2 + $0x140] sm:$0xff]  ;;  %v1011_v42 = vmul.f32 %v2127_v41, %v940_v38  ;;  %v821_v49 = vadd.f32 %v1584_v47, %v107_v26 }
 0x112   :  { %882 = vst.msk [vmem:[#allocation2 + $0x88] sm:$0xff] %vm21_vm0, %v817_v4  ;;  %914 = vst.msk [vmem:[#allocation2 + $0x188] sm:$0xff] %vm21_vm0, %v849_v15  ;;  %v1043_v43 = vmul.f32 %v2127_v41, %v972_v39  ;;  %v1083_v23 = vadd.f32 %v2134_v44, %v1012_v36  ;;  %v853_v50 = vadd.f32 %v1632_v48, %v139_v25 }
 0x113   :  { %881 = vst.msk [vmem:[#allocation2 + $0x80] sm:$0xff] %vm21_vm0, %v816_v16  ;;  %913 = vst.msk [vmem:[#allocation2 + $0x180] sm:$0xff] %vm21_vm0, %v848_v20  ;;  %v1115_v24 = vadd.f32 %v2134_v44, %v1044_v37  ;;  %v1082_v31 = vadd.f32 %v2134_v44, %v1011_v42  ;;  %v943_v53 = vld [vmem:[#allocation2 + $0x58] sm:$0xff]  ;;  %v820_v55 = vadd.f32 %v581_v51, %v106_v35  ;;  %v2323_v6 = vpop.f32.mrb[22].mxu0  ;;  %v2325_v7 = vpop.f32.mrb[22].mxu1 }
 0x114   :  { %884 = vst.msk [vmem:[#allocation2 + $0x98] sm:$0xff] %vm21_vm0, %v819_v29  ;;  %916 = vst.msk [vmem:[#allocation2 + $0x198] sm:$0xff] %vm21_vm0, %v851_v30  ;;  %v1114_v32 = vadd.f32 %v2134_v44, %v1043_v43  ;;  %v975_v54 = vld [vmem:[#allocation2 + $0x158] sm:$0xff]  ;;  %v852_v58 = vadd.f32 %v741_v52, %v138_v40  ;;  %vm1147_vm3 = vcmp.ge.f32.partialorder %v1083_v23, 0.0  ;;  %v1211_v59 = vmul.f32 0.2, %v1083_v23 }
 0x115   :  { %883 = vst.msk [vmem:[#allocation2 + $0x90] sm:$0xff] %vm21_vm0, %v818_v33  ;;  %915 = vst.msk [vmem:[#allocation2 + $0x190] sm:$0xff] %vm21_vm0, %v850_v34  ;;  %vm1179_vm4 = vcmp.ge.f32.partialorder %v1115_v24, 0.0  ;;  %v1243_v60 = vmul.f32 0.2, %v1115_v24  ;;  %vm1146_vm5 = vcmp.ge.f32.partialorder %v1082_v31, 0.0  ;;  %v1014_v46 = vmul.f32 %v2127_v41, %v943_v53 }
 0x116   :  { %886 = vst.msk [vmem:[#allocation2 + $0xa8] sm:$0xff] %vm21_vm0, %v821_v49  ;;  %918 = vst.msk [vmem:[#allocation2 + $0x1a8] sm:$0xff] %vm21_vm0, %v853_v50  ;;  %v1210_v61 = vmul.f32 0.2, %v1082_v31  ;;  %vm1178_vm6 = vcmp.ge.f32.partialorder %v1114_v32, 0.0  ;;  %v1275_v63 = vsel %vm1147_vm3, %v1083_v23, %v1211_v59  ;;  %v1046_v0 = vmul.f32 %v2127_v41, %v975_v54  ;;  %v942_v1 = vld [vmem:[#allocation2 + $0x50] sm:$0xff] }
 0x117   :  { %v1242_v62 = vmul.f32 0.2, %v1114_v32  ;;  %885 = vst.msk [vmem:[#allocation2 + $0xa0] sm:$0xff] %vm21_vm0, %v820_v55  ;;  %917 = vst.msk [vmem:[#allocation2 + $0x1a0] sm:$0xff] %vm21_vm0, %v852_v58  ;;  %v1307_v45 = vsel %vm1179_vm4, %v1115_v24, %v1243_v60  ;;  %v974_v2 = vld [vmem:[#allocation2 + $0x150] sm:$0xff]  ;;  %v945_v5 = vld [vmem:[#allocation2 + $0x68] sm:$0xff]  ;;  %v1013_v8 = vmul.f32 %v2127_v41, %v942_v1  ;;  %v1085_v17 = vadd.f32 %v2134_v44, %v1014_v46 }
 0x118   :  { %1339 = vst.msk [vmem:[%s2697_s4 + $0x48] sm:$0xff] %vm21_vm0, %v1275_v63  ;;  %1371 = vst.msk [vmem:[%s2697_s4 + $0x148] sm:$0xff] %vm21_vm0, %v1307_v45  ;;  %v1274_v56 = vsel %vm1146_vm5, %v1082_v31, %v1210_v61  ;;  %v1045_v9 = vmul.f32 %v2127_v41, %v974_v2  ;;  %v977_v10 = vld [vmem:[#allocation2 + $0x168] sm:$0xff]  ;;  %v944_v11 = vld [vmem:[#allocation2 + $0x60] sm:$0xff]  ;;  %v2339_v13 = vpop.f32.mrb[23].mxu0  ;;  %v2341_v14 = vpop.f32.mrb[23].mxu1  ;;  %v1117_v18 = vadd.f32 %v2134_v44, %v1046_v0 }
 0x119   :  { %v1306_v57 = vsel %vm1178_vm6, %v1114_v32, %v1242_v62  ;;  %v976_v12 = vld [vmem:[#allocation2 + $0x160] sm:$0xff]  ;;  %1338 = vst.msk [vmem:[%s2697_s4 + $0x40] sm:$0xff] %vm21_vm0, %v1274_v56  ;;  %v1016_v3 = vmul.f32 %v2127_v41, %v945_v5  ;;  %v1048_v19 = vmul.f32 %v2127_v41, %v977_v10  ;;  %v1084_v4 = vadd.f32 %v2134_v44, %v1013_v8  ;;  %v2359_v21 = vpop.f32.mrb[24].mxu0  ;;  %v2361_v22 = vpop.f32.mrb[24].mxu1  ;;  %v947_v35 = vld [vmem:[#allocation2 + $0x78] sm:$0xff]  ;;  %v946_v37 = vld [vmem:[#allocation2 + $0x70] sm:$0xff] }
 0x11a   :  { %1370 = vst.msk [vmem:[%s2697_s4 + $0x140] sm:$0xff] %vm21_vm0, %v1306_v57  ;;  %v1116_v15 = vadd.f32 %v2134_v44, %v1045_v9  ;;  %v1015_v16 = vmul.f32 %v2127_v41, %v944_v11  ;;  %v1047_v20 = vmul.f32 %v2127_v41, %v976_v12  ;;  %vm1149_vm7 = vcmp.ge.f32.partialorder %v1085_v17, 0.0  ;;  %v979_v36 = vld [vmem:[#allocation2 + $0x178] sm:$0xff]  ;;  %v2365_v38 = vpop.f32.mrb[25].mxu0  ;;  %v2367_v39 = vpop.f32.mrb[25].mxu1  ;;  %v978_v48 = vld [vmem:[#allocation2 + $0x170] sm:$0xff] }
 0x11b   :  { %v1213_v26 = vmul.f32 0.2, %v1085_v17  ;;  %vm1181_vm8 = vcmp.ge.f32.partialorder %v1117_v18, 0.0  ;;  %v1245_v25 = vmul.f32 0.2, %v1117_v18  ;;  %vm1148_vm9 = vcmp.ge.f32.partialorder %v1084_v4, 0.0 }
 0x11c   :  { %v1212_v27 = vmul.f32 0.2, %v1084_v4  ;;  %vm1180_vm10 = vcmp.ge.f32.partialorder %v1116_v15, 0.0  ;;  %v1244_v28 = vmul.f32 0.2, %v1116_v15  ;;  %v1087_v33 = vadd.f32 %v2134_v44, %v1016_v3  ;;  %v949_v23 = vld [vmem:[#allocation2 + $0x88] sm:$0xff] }
 0x11d   :  { %v1277_v29 = vsel %vm1149_vm7, %v1085_v17, %v1213_v26  ;;  %v1309_v30 = vsel %vm1181_vm8, %v1117_v18, %v1245_v25  ;;  %v1119_v34 = vadd.f32 %v2134_v44, %v1048_v19  ;;  %v1086_v43 = vadd.f32 %v2134_v44, %v1015_v16  ;;  %v981_v24 = vld [vmem:[#allocation2 + $0x188] sm:$0xff]  ;;  %v2379_v49 = vpop.f32.mrb[26].mxu0  ;;  %v2381_v50 = vpop.f32.mrb[26].mxu1  ;;  %v948_v59 = vld [vmem:[#allocation2 + $0x80] sm:$0xff] }
 0x11e   :  { %1341 = vst.msk [vmem:[%s2697_s4 + $0x58] sm:$0xff] %vm21_vm0, %v1277_v29  ;;  %1373 = vst.msk [vmem:[%s2697_s4 + $0x158] sm:$0xff] %vm21_vm0, %v1309_v30  ;;  %v1276_v40 = vsel %vm1148_vm9, %v1084_v4, %v1212_v27  ;;  %v1308_v42 = vsel %vm1180_vm10, %v1116_v15, %v1244_v28  ;;  %v1118_v47 = vadd.f32 %v2134_v44, %v1047_v20  ;;  %vm1151_vm11 = vcmp.ge.f32.partialorder %v1087_v33, 0.0  ;;  %v980_v60 = vld [vmem:[#allocation2 + $0x180] sm:$0xff]  ;;  %v2393_v61 = vpop.f32.mrb[27].mxu0  ;;  %v2395_v62 = vpop.f32.mrb[27].mxu1 }
 0x11f   :  { %1340 = vst.msk [vmem:[%s2697_s4 + $0x50] sm:$0xff] %vm21_vm0, %v1276_v40  ;;  %1372 = vst.msk [vmem:[%s2697_s4 + $0x150] sm:$0xff] %vm21_vm0, %v1308_v42  ;;  %v1215_v51 = vmul.f32 0.2, %v1087_v33  ;;  %vm1183_vm12 = vcmp.ge.f32.partialorder %v1119_v34, 0.0  ;;  %vm1150_vm13 = vcmp.ge.f32.partialorder %v1086_v43, 0.0  ;;  %v1018_v55 = vmul.f32 %v2127_v41, %v947_v35 }
 0x120   :  { %v1247_v52 = vmul.f32 0.2, %v1119_v34  ;;  %v1214_v31 = vmul.f32 0.2, %v1086_v43  ;;  %vm1182_vm14 = vcmp.ge.f32.partialorder %v1118_v47, 0.0  ;;  %v1050_v58 = vmul.f32 %v2127_v41, %v979_v36  ;;  %v2407_v1 = vpop.f32.mrb[28].mxu0 }
 0x121   :  { %v1246_v32 = vmul.f32 0.2, %v1118_v47  ;;  %v1279_v53 = vsel %vm1151_vm11, %v1087_v33, %v1215_v51  ;;  %v1017_v46 = vmul.f32 %v2127_v41, %v946_v37  ;;  %v1049_v0 = vmul.f32 %v2127_v41, %v978_v48  ;;  %v2409_v2 = vpop.f32.mrb[28].mxu1  ;;  %v2423_v9 = vpop.f32.mrb[29].mxu0  ;;  %v951_v27 = vld [vmem:[#allocation2 + $0x98] sm:$0xff]  ;;  %v950_v29 = vld [vmem:[#allocation2 + $0x90] sm:$0xff] }
 0x122   :  { %v1311_v54 = vsel %vm1183_vm12, %v1119_v34, %v1247_v52  ;;  %1343 = vst.msk [vmem:[%s2697_s4 + $0x68] sm:$0xff] %vm21_vm0, %v1279_v53  ;;  %v1278_v63 = vsel %vm1150_vm13, %v1086_v43, %v1214_v31  ;;  %v1089_v5 = vadd.f32 %v2134_v44, %v1018_v55  ;;  %v1121_v56 = vadd.f32 %v2134_v44, %v1050_v58  ;;  %v2425_v10 = vpop.f32.mrb[29].mxu1  ;;  %v983_v28 = vld [vmem:[#allocation2 + $0x198] sm:$0xff]  ;;  %v982_v40 = vld [vmem:[#allocation2 + $0x190] sm:$0xff]  ;;  %v953_v42 = vld [vmem:[#allocation2 + $0xa8] sm:$0xff] }
 0x123   :  { %1375 = vst.msk [vmem:[%s2697_s4 + $0x168] sm:$0xff] %vm21_vm0, %v1311_v54  ;;  %v1310_v45 = vsel %vm1182_vm14, %v1118_v47, %v1246_v32  ;;  %1342 = vst.msk [vmem:[%s2697_s4 + $0x60] sm:$0xff] %vm21_vm0, %v1278_v63  ;;  %v1020_v57 = vmul.f32 %v2127_v41, %v949_v23  ;;  %v1052_v8 = vmul.f32 %v2127_v41, %v981_v24  ;;  %v2433_v30 = vpop.f32.mrb[30].mxu0  ;;  %v2435_v33 = vpop.f32.mrb[30].mxu1  ;;  %v985_v43 = vld [vmem:[#allocation2 + $0x1a8] sm:$0xff]  ;;  %v952_v55 = vld [vmem:[#allocation2 + $0xa0] sm:$0xff] }
 0x124   :  { %1374 = vst.msk [vmem:[%s2697_s4 + $0x160] sm:$0xff] %vm21_vm0, %v1310_v45  ;;  %v1088_v11 = vadd.f32 %v2134_v44, %v1017_v46  ;;  %v1120_v12 = vadd.f32 %v2134_v44, %v1049_v0  ;;  %v1019_v17 = vmul.f32 %v2127_v41, %v948_v59  ;;  %v1051_v18 = vmul.f32 %v2127_v41, %v980_v60  ;;  %v2447_v47 = vpop.f32.mrb[31].mxu0  ;;  %v2449_v48 = vpop.f32.mrb[31].mxu1  ;;  %v984_v58 = vld [vmem:[#allocation2 + $0x1a0] sm:$0xff] }
 0x125   :  { %vm1153_vm15 = vcmp.ge.f32.partialorder %v1089_v5, 0.0  ;;  %v1217_v3 = vmul.f32 0.2, %v1089_v5  ;;  %vm1185_vm1 = vcmp.ge.f32.partialorder %v1121_v56, 0.0  ;;  %v1249_v19 = vmul.f32 0.2, %v1121_v56 }
 0x126   :  { %vm1152_vm2 = vcmp.ge.f32.partialorder %v1088_v11, 0.0  ;;  %v1216_v4 = vmul.f32 0.2, %v1088_v11  ;;  %vm1184_vm3 = vcmp.ge.f32.partialorder %v1120_v12, 0.0  ;;  %v1248_v15 = vmul.f32 0.2, %v1120_v12 }
 0x127   :  { %v1281_v16 = vsel %vm1153_vm15, %v1089_v5, %v1217_v3  ;;  %v1313_v20 = vsel %vm1185_vm1, %v1121_v56, %v1249_v19  ;;  %v1091_v26 = vadd.f32 %v2134_v44, %v1020_v57  ;;  %v1123_v25 = vadd.f32 %v2134_v44, %v1052_v8 }
 0x128   :  { %1345 = vst.msk [vmem:[%s2697_s4 + $0x78] sm:$0xff] %vm21_vm0, %v1281_v16  ;;  %1377 = vst.msk [vmem:[%s2697_s4 + $0x178] sm:$0xff] %vm21_vm0, %v1313_v20  ;;  %v1280_v34 = vsel %vm1152_vm2, %v1088_v11, %v1216_v4  ;;  %v1312_v35 = vsel %vm1184_vm3, %v1120_v12, %v1248_v15  ;;  %v1090_v36 = vadd.f32 %v2134_v44, %v1019_v17  ;;  %v109_v4 = vld [vmem:[#allocation2 + $0xb8] sm:$0xff] }
 0x129   :  { %v1122_v37 = vadd.f32 %v2134_v44, %v1051_v18  ;;  %1344 = vst.msk [vmem:[%s2697_s4 + $0x70] sm:$0xff] %vm21_vm0, %v1280_v34  ;;  %1376 = vst.msk [vmem:[%s2697_s4 + $0x170] sm:$0xff] %vm21_vm0, %v1312_v35  ;;  %vm1155_vm4 = vcmp.ge.f32.partialorder %v1091_v26, 0.0  ;;  %v1219_v23 = vmul.f32 0.2, %v1091_v26  ;;  %vm1187_vm5 = vcmp.ge.f32.partialorder %v1123_v25, 0.0 }
 0x12a   :  { %v1251_v24 = vmul.f32 0.2, %v1123_v25  ;;  %vm1154_vm6 = vcmp.ge.f32.partialorder %v1090_v36, 0.0  ;;  %v1218_v51 = vmul.f32 0.2, %v1090_v36  ;;  %v1022_v53 = vmul.f32 %v2127_v41, %v951_v27  ;;  %v108_v27 = vld [vmem:[#allocation2 + $0xb0] sm:$0xff] }
 0x12b   :  { %vm1186_vm7 = vcmp.ge.f32.partialorder %v1122_v37, 0.0  ;;  %v1250_v52 = vmul.f32 0.2, %v1122_v37  ;;  %v1283_v31 = vsel %vm1155_vm4, %v1091_v26, %v1219_v23  ;;  %v1054_v54 = vmul.f32 %v2127_v41, %v983_v28  ;;  %v140_v28 = vld [vmem:[#allocation2 + $0x1b0] sm:$0xff] }
 0x12c   :  { %v1315_v32 = vsel %vm1187_vm5, %v1123_v25, %v1251_v24  ;;  %1347 = vst.msk [vmem:[%s2697_s4 + $0x88] sm:$0xff] %vm21_vm0, %v1283_v31  ;;  %v1282_v59 = vsel %vm1154_vm6, %v1090_v36, %v1218_v51  ;;  %v1021_v63 = vmul.f32 %v2127_v41, %v950_v29  ;;  %v1053_v45 = vmul.f32 %v2127_v41, %v982_v40  ;;  %v141_v25 = vld [vmem:[#allocation2 + $0x1b8] sm:$0xff]  ;;  %v111_v36 = vld [vmem:[#allocation2 + $0xc8] sm:$0xff]  ;;  %v110_v40 = vld [vmem:[#allocation2 + $0xc0] sm:$0xff] }
 0x12d   :  { %1379 = vst.msk [vmem:[%s2697_s4 + $0x188] sm:$0xff] %vm21_vm0, %v1315_v32  ;;  %v1314_v60 = vsel %vm1186_vm7, %v1122_v37, %v1250_v52  ;;  %1346 = vst.msk [vmem:[%s2697_s4 + $0x80] sm:$0xff] %vm21_vm0, %v1282_v59  ;;  %v1093_v46 = vadd.f32 %v2134_v44, %v1022_v53  ;;  %v1125_v0 = vadd.f32 %v2134_v44, %v1054_v54  ;;  %v143_v37 = vld [vmem:[#allocation2 + $0x1c8] sm:$0xff]  ;;  %v113_v24 = vld [vmem:[#allocation2 + $0xd8] sm:$0xff] }
 0x12e   :  { %1378 = vst.msk [vmem:[%s2697_s4 + $0x180] sm:$0xff] %vm21_vm0, %v1314_v60  ;;  %v1024_v5 = vmul.f32 %v2127_v41, %v953_v42  ;;  %v1056_v56 = vmul.f32 %v2127_v41, %v985_v43  ;;  %v1092_v57 = vadd.f32 %v2134_v44, %v1021_v63  ;;  %v1124_v8 = vadd.f32 %v2134_v44, %v1053_v45  ;;  %v142_v42 = vld [vmem:[#allocation2 + $0x1c0] sm:$0xff]  ;;  %v112_v51 = vld [vmem:[#allocation2 + $0xd0] sm:$0xff]  ;;  %v115_v59 = vld [vmem:[#allocation2 + $0xe8] sm:$0xff] }
 0x12f   :  { %v1023_v11 = vmul.f32 %v2127_v41, %v952_v55  ;;  %v1055_v12 = vmul.f32 %v2127_v41, %v984_v58  ;;  %vm1157_vm8 = vcmp.ge.f32.partialorder %v1093_v46, 0.0  ;;  %v1221_v17 = vmul.f32 0.2, %v1093_v46  ;;  %v144_v58 = vld [vmem:[#allocation2 + $0x1d0] sm:$0xff]  ;;  %v147_v60 = vld [vmem:[#allocation2 + $0x1e8] sm:$0xff] }
 0x130   :  { %vm1189_vm9 = vcmp.ge.f32.partialorder %v1125_v0, 0.0  ;;  %v1253_v18 = vmul.f32 0.2, %v1125_v0  ;;  %vm1156_vm10 = vcmp.ge.f32.partialorder %v1092_v57, 0.0  ;;  %v1220_v3 = vmul.f32 0.2, %v1092_v57 }
 0x131   :  { %vm1188_vm11 = vcmp.ge.f32.partialorder %v1124_v8, 0.0  ;;  %v1252_v19 = vmul.f32 0.2, %v1124_v8  ;;  %v1285_v15 = vsel %vm1157_vm8, %v1093_v46, %v1221_v17  ;;  %v1095_v20 = vadd.f32 %v2134_v44, %v1024_v5  ;;  %v117_v5 = vld [vmem:[#allocation2 + $0xf8] sm:$0xff] }
 0x132   :  { %v1317_v16 = vsel %vm1189_vm9, %v1125_v0, %v1253_v18  ;;  %v1127_v26 = vadd.f32 %v2134_v44, %v1056_v56  ;;  %1349 = vst.msk [vmem:[%s2697_s4 + $0x98] sm:$0xff] %vm21_vm0, %v1285_v15  ;;  %v1284_v41 = vsel %vm1156_vm10, %v1092_v57, %v1220_v3  ;;  %v1094_v34 = vadd.f32 %v2134_v44, %v1023_v11  ;;  %v146_v0 = vld [vmem:[#allocation2 + $0x1e0] sm:$0xff]  ;;  %v116_v11 = vld [vmem:[#allocation2 + $0xf0] sm:$0xff] }
 0x133   :  { %1381 = vst.msk [vmem:[%s2697_s4 + $0x198] sm:$0xff] %vm21_vm0, %v1317_v16  ;;  %v1316_v29 = vsel %vm1188_vm11, %v1124_v8, %v1252_v19  ;;  %v1126_v35 = vadd.f32 %v2134_v44, %v1055_v12  ;;  %1348 = vst.msk [vmem:[%s2697_s4 + $0x90] sm:$0xff] %vm21_vm0, %v1284_v41  ;;  %vm1159_vm12 = vcmp.ge.f32.partialorder %v1095_v20, 0.0  ;;  %v1223_v43 = vmul.f32 0.2, %v1095_v20  ;;  %v145_v44 = vld [vmem:[#allocation2 + $0x1d8] sm:$0xff] }
 0x134   :  { %1380 = vst.msk [vmem:[%s2697_s4 + $0x190] sm:$0xff] %vm21_vm0, %v1316_v29  ;;  %vm1191_vm13 = vcmp.ge.f32.partialorder %v1127_v26, 0.0  ;;  %v1255_v23 = vmul.f32 0.2, %v1127_v26  ;;  %vm1158_vm14 = vcmp.ge.f32.partialorder %v1094_v34, 0.0  ;;  %v823_v54 = vadd.f32 %v2323_v6, %v109_v4  ;;  %v149_v8 = vld [vmem:[#allocation2 + $0x1f8] sm:$0xff] }
 0x135   :  { %v1222_v52 = vmul.f32 0.2, %v1094_v34  ;;  %vm1190_vm15 = vcmp.ge.f32.partialorder %v1126_v35, 0.0  ;;  %v1254_v31 = vmul.f32 0.2, %v1126_v35  ;;  %v1287_v32 = vsel %vm1159_vm12, %v1095_v20, %v1223_v43  ;;  %v148_v12 = vld [vmem:[#allocation2 + $0x1f0] sm:$0xff] }
 0x136   :  { %v1319_v53 = vsel %vm1191_vm13, %v1127_v26, %v1255_v23  ;;  %v855_v55 = vadd.f32 %v2325_v7, %v141_v25  ;;  %1351 = vst.msk [vmem:[%s2697_s4 + $0xa8] sm:$0xff] %vm21_vm0, %v1287_v32  ;;  %v822_v46 = vadd.f32 %v2339_v13, %v108_v27  ;;  %v854_v6 = vadd.f32 %v2341_v14, %v140_v28  ;;  %v114_v7 = vld [vmem:[#allocation2 + $0xe0] sm:$0xff] }
 0x137   :  { %1383 = vst.msk [vmem:[%s2697_s4 + $0x1a8] sm:$0xff] %vm21_vm0, %v1319_v53  ;;  %v1286_v63 = vsel %vm1158_vm14, %v1094_v34, %v1222_v52  ;;  %v1318_v45 = vsel %vm1190_vm15, %v1126_v35, %v1254_v31  ;;  %888 = vst.msk [vmem:[#allocation2 + $0xb8] sm:$0xff] %vm21_vm0, %v823_v54  ;;  %v825_v13 = vadd.f32 %v2359_v21, %v111_v36  ;;  %v2575_v26 = vld [vmem:[%s2696_s3] ss:$0 sm:$0xff] }
 0x138   :  { %1350 = vst.msk [vmem:[%s2697_s4 + $0xa0] sm:$0xff] %vm21_vm0, %v1286_v63  ;;  %1382 = vst.msk [vmem:[%s2697_s4 + $0x1a0] sm:$0xff] %vm21_vm0, %v1318_v45  ;;  %v857_v14 = vadd.f32 %v2361_v22, %v143_v37  ;;  %v824_v56 = vadd.f32 %v2365_v38, %v110_v40  ;;  %v856_v57 = vadd.f32 %v2367_v39, %v142_v42 }
 0x139   :  { %920 = vst.msk [vmem:[#allocation2 + $0x1b8] sm:$0xff] %vm21_vm0, %v855_v55  ;;  %887 = vst.msk [vmem:[#allocation2 + $0xb0] sm:$0xff] %vm21_vm0, %v822_v46  ;;  %v827_v17 = vadd.f32 %v2379_v49, %v113_v24  ;;  %v859_v18 = vadd.f32 %v2381_v50, %v145_v44  ;;  %v826_v3 = vadd.f32 %v2393_v61, %v112_v51 }
 0x13a   :  { %919 = vst.msk [vmem:[#allocation2 + $0x1b0] sm:$0xff] %vm21_vm0, %v854_v6  ;;  %v858_v21 = vadd.f32 %v2395_v62, %v144_v58  ;;  %890 = vst.msk [vmem:[#allocation2 + $0xc8] sm:$0xff] %vm21_vm0, %v825_v13  ;;  %v829_v22 = vadd.f32 %v2407_v1, %v115_v59  ;;  %v861_v38 = vadd.f32 %v2409_v2, %v147_v60 }
 0x13b   :  { %922 = vst.msk [vmem:[#allocation2 + $0x1c8] sm:$0xff] %vm21_vm0, %v857_v14  ;;  %889 = vst.msk [vmem:[#allocation2 + $0xc0] sm:$0xff] %vm21_vm0, %v824_v56  ;;  %v828_v39 = vadd.f32 %v2423_v9, %v114_v7  ;;  %v860_v49 = vadd.f32 %v2425_v10, %v146_v0  ;;  %v831_v50 = vadd.f32 %v2433_v30, %v117_v5  ;;  %v2566_v10 = vld [vmem:[%s2695_s2] ss:$0 sm:$0xff] }
 0x13c   :  { %921 = vst.msk [vmem:[#allocation2 + $0x1c0] sm:$0xff] %vm21_vm0, %v856_v57  ;;  %892 = vst.msk [vmem:[#allocation2 + $0xd8] sm:$0xff] %vm21_vm0, %v827_v17  ;;  %v863_v61 = vadd.f32 %v2435_v33, %v149_v8  ;;  %v830_v62 = vadd.f32 %v2447_v47, %v116_v11  ;;  %v862_v1 = vadd.f32 %v2449_v48, %v148_v12 }
 0x13d   :  { %924 = vst.msk [vmem:[#allocation2 + $0x1d8] sm:$0xff] %vm21_vm0, %v859_v18  ;;  %891 = vst.msk [vmem:[#allocation2 + $0xd0] sm:$0xff] %vm21_vm0, %v826_v3 }
 0x13e   :  { %923 = vst.msk [vmem:[#allocation2 + $0x1d0] sm:$0xff] %vm21_vm0, %v858_v21  ;;  %894 = vst.msk [vmem:[#allocation2 + $0xe8] sm:$0xff] %vm21_vm0, %v829_v22  ;;  %v955_v2 = vld [vmem:[#allocation2 + $0xb8] sm:$0xff] }
 0x13f   :  { %926 = vst.msk [vmem:[#allocation2 + $0x1e8] sm:$0xff] %vm21_vm0, %v861_v38  ;;  %893 = vst.msk [vmem:[#allocation2 + $0xe0] sm:$0xff] %vm21_vm0, %v828_v39  ;;  %v1026_v30 = vmul.f32 %v2566_v10, %v955_v2 }
 0x140   :  { %925 = vst.msk [vmem:[#allocation2 + $0x1e0] sm:$0xff] %vm21_vm0, %v860_v49  ;;  %896 = vst.msk [vmem:[#allocation2 + $0xf8] sm:$0xff] %vm21_vm0, %v831_v50  ;;  %v987_v9 = vld [vmem:[#allocation2 + $0x1b8] sm:$0xff]  ;;  %v954_v47 = vld [vmem:[#allocation2 + $0xb0] sm:$0xff] }
 0x141   :  { %928 = vst.msk [vmem:[#allocation2 + $0x1f8] sm:$0xff] %vm21_vm0, %v863_v61  ;;  %895 = vst.msk [vmem:[#allocation2 + $0xf0] sm:$0xff] %vm21_vm0, %v830_v62  ;;  %v1058_v33 = vmul.f32 %v2566_v10, %v987_v9  ;;  %v986_v48 = vld [vmem:[#allocation2 + $0x1b0] sm:$0xff]  ;;  %v1025_v19 = vmul.f32 %v2566_v10, %v954_v47  ;;  %v957_v15 = vld [vmem:[#allocation2 + $0xc8] sm:$0xff]  ;;  %v1097_v25 = vadd.f32 %v2575_v26, %v1026_v30 }
 0x142   :  { %927 = vst.msk [vmem:[#allocation2 + $0x1f0] sm:$0xff] %vm21_vm0, %v862_v1  ;;  %v1057_v4 = vmul.f32 %v2566_v10, %v986_v48  ;;  %v989_v16 = vld [vmem:[#allocation2 + $0x1c8] sm:$0xff]  ;;  %v956_v20 = vld [vmem:[#allocation2 + $0xc0] sm:$0xff]  ;;  %v1028_v28 = vmul.f32 %v2566_v10, %v957_v15 }
 0x143   :  { %v1129_v27 = vadd.f32 %v2575_v26, %v1058_v33  ;;  %v1060_v41 = vmul.f32 %v2566_v10, %v989_v16  ;;  %v988_v29 = vld [vmem:[#allocation2 + $0x1c0] sm:$0xff]  ;;  %v1096_v34 = vadd.f32 %v2575_v26, %v1025_v19  ;;  %v1027_v36 = vmul.f32 %v2566_v10, %v956_v20  ;;  %v959_v31 = vld [vmem:[#allocation2 + $0xd8] sm:$0xff] }
 0x144   :  { %v1128_v35 = vadd.f32 %v2575_v26, %v1057_v4  ;;  %v1059_v37 = vmul.f32 %v2566_v10, %v988_v29  ;;  %vm1161_vm1 = vcmp.ge.f32.partialorder %v1097_v25, 0.0  ;;  %v1225_v40 = vmul.f32 0.2, %v1097_v25  ;;  %v991_v32 = vld [vmem:[#allocation2 + $0x1d8] sm:$0xff]  ;;  %v958_v53 = vld [vmem:[#allocation2 + $0xd0] sm:$0xff] }
 0x145   :  { %vm1193_vm2 = vcmp.ge.f32.partialorder %v1129_v27, 0.0  ;;  %v1257_v42 = vmul.f32 0.2, %v1129_v27  ;;  %vm1160_vm3 = vcmp.ge.f32.partialorder %v1096_v34, 0.0  ;;  %v1224_v43 = vmul.f32 0.2, %v1096_v34 }
 0x146   :  { %vm1192_vm4 = vcmp.ge.f32.partialorder %v1128_v35, 0.0  ;;  %v1256_v23 = vmul.f32 0.2, %v1128_v35  ;;  %v1289_v24 = vsel %vm1161_vm1, %v1097_v25, %v1225_v40  ;;  %v1099_v51 = vadd.f32 %v2575_v26, %v1028_v28  ;;  %v990_v60 = vld [vmem:[#allocation2 + $0x1d0] sm:$0xff]  ;;  %v961_v63 = vld [vmem:[#allocation2 + $0xe8] sm:$0xff]  ;;  %v960_v57 = vld [vmem:[#allocation2 + $0xe0] sm:$0xff] }
 0x147   :  { %v1321_v44 = vsel %vm1193_vm2, %v1129_v27, %v1257_v42  ;;  %v1131_v52 = vadd.f32 %v2575_v26, %v1060_v41  ;;  %1353 = vst.msk [vmem:[%s2697_s4 + $0xb8] sm:$0xff] %vm21_vm0, %v1289_v24  ;;  %v1288_v54 = vsel %vm1160_vm3, %v1096_v34, %v1224_v43  ;;  %v1098_v58 = vadd.f32 %v2575_v26, %v1027_v36  ;;  %v993_v45 = vld [vmem:[#allocation2 + $0x1e8] sm:$0xff]  ;;  %v992_v8 = vld [vmem:[#allocation2 + $0x1e0] sm:$0xff]  ;;  %v963_v19 = vld [vmem:[#allocation2 + $0xf8] sm:$0xff] }
 0x148   :  { %1385 = vst.msk [vmem:[%s2697_s4 + $0x1b8] sm:$0xff] %vm21_vm0, %v1321_v44  ;;  %v1320_v55 = vsel %vm1192_vm4, %v1128_v35, %v1256_v23  ;;  %v1130_v59 = vadd.f32 %v2575_v26, %v1059_v37  ;;  %1352 = vst.msk [vmem:[%s2697_s4 + $0xb0] sm:$0xff] %vm21_vm0, %v1288_v54  ;;  %vm1163_vm5 = vcmp.ge.f32.partialorder %v1099_v51, 0.0  ;;  %v1227_v46 = vmul.f32 0.2, %v1099_v51  ;;  %v995_v25 = vld [vmem:[#allocation2 + $0x1f8] sm:$0xff] }
 0x149   :  { %1384 = vst.msk [vmem:[%s2697_s4 + $0x1b0] sm:$0xff] %vm21_vm0, %v1320_v55  ;;  %vm1195_vm6 = vcmp.ge.f32.partialorder %v1131_v52, 0.0  ;;  %v1259_v6 = vmul.f32 0.2, %v1131_v52  ;;  %vm1162_vm7 = vcmp.ge.f32.partialorder %v1098_v58, 0.0  ;;  %v1030_v14 = vmul.f32 %v2566_v10, %v959_v31  ;;  %v962_v27 = vld [vmem:[#allocation2 + $0xf0] sm:$0xff] }
 0x14a   :  { %v1226_v7 = vmul.f32 0.2, %v1098_v58  ;;  %vm1194_vm8 = vcmp.ge.f32.partialorder %v1130_v59, 0.0  ;;  %v1258_v0 = vmul.f32 0.2, %v1130_v59  ;;  %v1291_v5 = vsel %vm1163_vm5, %v1099_v51, %v1227_v46  ;;  %v994_v28 = vld [vmem:[#allocation2 + $0x1f0] sm:$0xff] }
 0x14b   :  { %v1323_v13 = vsel %vm1195_vm6, %v1131_v52, %v1259_v6  ;;  %v1062_v56 = vmul.f32 %v2566_v10, %v991_v32  ;;  %1355 = vst.msk [vmem:[%s2697_s4 + $0xc8] sm:$0xff] %vm21_vm0, %v1291_v5  ;;  %v1029_v17 = vmul.f32 %v2566_v10, %v958_v53  ;;  %v1061_v18 = vmul.f32 %v2566_v10, %v990_v60 }
 0x14c   :  { %1387 = vst.msk [vmem:[%s2697_s4 + $0x1c8] sm:$0xff] %vm21_vm0, %v1323_v13  ;;  %v1290_v11 = vsel %vm1162_vm7, %v1098_v58, %v1226_v7  ;;  %v1322_v12 = vsel %vm1194_vm8, %v1130_v59, %v1258_v0  ;;  %v1101_v3 = vadd.f32 %v2575_v26, %v1030_v14  ;;  %v1032_v22 = vmul.f32 %v2566_v10, %v961_v63 }
 0x14d   :  { %1354 = vst.msk [vmem:[%s2697_s4 + $0xc0] sm:$0xff] %vm21_vm0, %v1290_v11  ;;  %1386 = vst.msk [vmem:[%s2697_s4 + $0x1c0] sm:$0xff] %vm21_vm0, %v1322_v12  ;;  %v1133_v21 = vadd.f32 %v2575_v26, %v1062_v56  ;;  %v1064_v38 = vmul.f32 %v2566_v10, %v993_v45  ;;  %v1100_v39 = vadd.f32 %v2575_v26, %v1029_v17 }
 0x14e   :  { %v1132_v49 = vadd.f32 %v2575_v26, %v1061_v18  ;;  %v1031_v50 = vmul.f32 %v2566_v10, %v960_v57  ;;  %v1063_v61 = vmul.f32 %v2566_v10, %v992_v8  ;;  %vm1165_vm9 = vcmp.ge.f32.partialorder %v1101_v3, 0.0 }
 0x14f   :  { %v1229_v62 = vmul.f32 0.2, %v1101_v3  ;;  %vm1197_vm10 = vcmp.ge.f32.partialorder %v1133_v21, 0.0  ;;  %v1261_v1 = vmul.f32 0.2, %v1133_v21  ;;  %vm1164_vm11 = vcmp.ge.f32.partialorder %v1100_v39, 0.0 }
 0x150   :  { %v1228_v2 = vmul.f32 0.2, %v1100_v39  ;;  %vm1196_vm12 = vcmp.ge.f32.partialorder %v1132_v49, 0.0  ;;  %v1260_v9 = vmul.f32 0.2, %v1132_v49  ;;  %v1103_v47 = vadd.f32 %v2575_v26, %v1032_v22 }
 0x151   :  { %v1293_v30 = vsel %vm1165_vm9, %v1101_v3, %v1229_v62  ;;  %v1325_v33 = vsel %vm1197_vm10, %v1133_v21, %v1261_v1  ;;  %v1135_v48 = vadd.f32 %v2575_v26, %v1064_v38  ;;  %v1102_v16 = vadd.f32 %v2575_v26, %v1031_v50 }
 0x152   :  { %1357 = vst.msk [vmem:[%s2697_s4 + $0xd8] sm:$0xff] %vm21_vm0, %v1293_v30  ;;  %1389 = vst.msk [vmem:[%s2697_s4 + $0x1d8] sm:$0xff] %vm21_vm0, %v1325_v33  ;;  %v1292_v4 = vsel %vm1164_vm11, %v1100_v39, %v1228_v2  ;;  %v1324_v15 = vsel %vm1196_vm12, %v1132_v49, %v1260_v9  ;;  %v1134_v20 = vadd.f32 %v2575_v26, %v1063_v61  ;;  %vm1167_vm13 = vcmp.ge.f32.partialorder %v1103_v47, 0.0 }
 0x153   :  { %1356 = vst.msk [vmem:[%s2697_s4 + $0xd0] sm:$0xff] %vm21_vm0, %v1292_v4  ;;  %1388 = vst.msk [vmem:[%s2697_s4 + $0x1d0] sm:$0xff] %vm21_vm0, %v1324_v15  ;;  %v1231_v41 = vmul.f32 0.2, %v1103_v47  ;;  %vm1199_vm14 = vcmp.ge.f32.partialorder %v1135_v48, 0.0  ;;  %vm1166_vm15 = vcmp.ge.f32.partialorder %v1102_v16, 0.0  ;;  %v1034_v40 = vmul.f32 %v2566_v10, %v963_v19 }
 0x154   :  { %v1263_v29 = vmul.f32 0.2, %v1135_v48  ;;  %v1230_v34 = vmul.f32 0.2, %v1102_v16  ;;  %vm1198_vm1 = vcmp.ge.f32.partialorder %v1134_v20, 0.0  ;;  %v1066_v42 = vmul.f32 %v2566_v10, %v995_v25 }
 0x155   :  { %v1262_v35 = vmul.f32 0.2, %v1134_v20  ;;  %v1295_v36 = vsel %vm1167_vm13, %v1103_v47, %v1231_v41  ;;  %v1033_v24 = vmul.f32 %v2566_v10, %v962_v27  ;;  %v1065_v44 = vmul.f32 %v2566_v10, %v994_v28 }
 0x156   :  { %v1327_v37 = vsel %vm1199_vm14, %v1135_v48, %v1263_v29  ;;  %1359 = vst.msk [vmem:[%s2697_s4 + $0xe8] sm:$0xff] %vm21_vm0, %v1295_v36  ;;  %v1294_v43 = vsel %vm1166_vm15, %v1102_v16, %v1230_v34  ;;  %v1105_v51 = vadd.f32 %v2575_v26, %v1034_v40  ;;  %v1137_v52 = vadd.f32 %v2575_v26, %v1066_v42 }
 0x157   :  { %1391 = vst.msk [vmem:[%s2697_s4 + $0x1e8] sm:$0xff] %vm21_vm0, %v1327_v37  ;;  %v1326_v23 = vsel %vm1198_vm1, %v1134_v20, %v1262_v35  ;;  %1358 = vst.msk [vmem:[%s2697_s4 + $0xe0] sm:$0xff] %vm21_vm0, %v1294_v43  ;;  %v1104_v31 = vadd.f32 %v2575_v26, %v1033_v24  ;;  %v1136_v32 = vadd.f32 %v2575_v26, %v1065_v44 }
 0x158   :  { %1390 = vst.msk [vmem:[%s2697_s4 + $0x1e0] sm:$0xff] %vm21_vm0, %v1326_v23  ;;  %vm1169_vm2 = vcmp.ge.f32.partialorder %v1105_v51, 0.0  ;;  %v1233_v10 = vmul.f32 0.2, %v1105_v51  ;;  %vm1201_vm3 = vcmp.ge.f32.partialorder %v1137_v52, 0.0 }
 0x159   :  { %v1265_v53 = vmul.f32 0.2, %v1137_v52  ;;  %vm1168_vm4 = vcmp.ge.f32.partialorder %v1104_v31, 0.0  ;;  %v1232_v54 = vmul.f32 0.2, %v1104_v31  ;;  %vm1200_vm5 = vcmp.ge.f32.partialorder %v1136_v32, 0.0 }
 0x15a   :  { %v1264_v55 = vmul.f32 0.2, %v1136_v32  ;;  %v1297_v58 = vsel %vm1169_vm2, %v1105_v51, %v1233_v10 }
 0x15b   :  { %v1329_v59 = vsel %vm1201_vm3, %v1137_v52, %v1265_v53  ;;  %1361 = vst.msk [vmem:[%s2697_s4 + $0xf8] sm:$0xff] %vm21_vm0, %v1297_v58  ;;  %v1296_v26 = vsel %vm1168_vm4, %v1104_v31, %v1232_v54 }
 0x15c   :  { %1393 = vst.msk [vmem:[%s2697_s4 + $0x1f8] sm:$0xff] %vm21_vm0, %v1329_v59  ;;  %v1328_v60 = vsel %vm1200_vm5, %v1136_v32, %v1264_v55  ;;  %1360 = vst.msk [vmem:[%s2697_s4 + $0xf0] sm:$0xff] %vm21_vm0, %v1296_v26 }
 0x15d   :  { %1392 = vst.msk [vmem:[%s2697_s4 + $0x1f0] sm:$0xff] %vm21_vm0, %v1328_v60 }

// kernel: _lambda_.12
= control target key start
LH: loop header
LB: loop body
LE: loop exit
PB: predicated region body
PF: predicated region fallthrough
CT: control target
= control target key end

     0   :  { %vm21_vm0 = vcmask 130048   ;;  %v536_v3 = vmov 0.0   ;;  %s796_s1 = inlined_call_operand.vmem [shape: f32[128,16], index: 1, kind: input, shape index: {}]   ;;  %s797_s0 = inlined_call_operand.vmem [shape: f32[128,128], index: 0, kind: input, shape index: {}]   ;;  %s798_s2 = inlined_call_operand.vmem [shape: f32[1,16], index: 2, kind: input, shape index: {}]   ;;  %s799_s3 = inlined_call_operand.vmem [shape: f32[1,16], index: 3, kind: input, shape index: {}]   ;;  %s800_s4 = inlined_call_operand.vmem [shape: f32[128,16], index: 4, kind: output, shape index: {}]  }
   0x1   :  { %v70_v0 = vld [vmem:[%s796_s1] sm:$0xff]  ;;  %v71_v1 = vld [vmem:[%s796_s1 + $0x8] sm:$0xff]  ;;  %v72_v2 = vld [vmem:[%s796_s1 + $0x10] sm:$0xff]  ;;  %23 = vst.msk [vmem:[#allocation2 + $0x8] sm:$0xff] %vm21_vm0, %v536_v3 }
   0x2   :  { %22 = vst.msk [vmem:[#allocation2] sm:$0xff] %vm21_vm0, %v536_v3  ;;  %24 = vst.msk [vmem:[#allocation2 + $0x10] sm:$0xff] %vm21_vm0, %v536_v3  ;;  %v487_v4 = vpack.c.bf16 %v71_v1, %v70_v0  ;;  %v73_v5 = vld [vmem:[%s796_s1 + $0x18] sm:$0xff]  ;;  %v74_v7 = vld [vmem:[%s796_s1 + $0x20] sm:$0xff] }
   0x3   :  { %25 = vst.msk [vmem:[#allocation2 + $0x18] sm:$0xff] %vm21_vm0, %v536_v3  ;;  %26 = vst.msk [vmem:[#allocation2 + $0x20] sm:$0xff] %vm21_vm0, %v536_v3  ;;  %v491_v6 = vpack.c.bf16 %v73_v5, %v72_v2  ;;  %v75_v8 = vld [vmem:[%s796_s1 + $0x28] sm:$0xff]  ;;  %v54_v10 = vld [vmem:[%s797_s0] sm:$0xff] }
   0x4   :  { %27 = vst.msk [vmem:[#allocation2 + $0x28] sm:$0xff] %vm21_vm0, %v536_v3  ;;  %28 = vst.msk [vmem:[#allocation2 + $0x30] sm:$0xff] %vm21_vm0, %v536_v3  ;;  %488 = vmatprep.subr.bf16.mxu0 %v487_v4  ;;  %519 = vmatprep.subr.bf16.mxu1 %v487_v4  ;;  %v495_v9 = vpack.c.bf16 %v75_v8, %v74_v7  ;;  %v62_v11 = vld [vmem:[%s797_s0 + $0x40] sm:$0xff]  ;;  %v76_v12 = vld [vmem:[%s796_s1 + $0x30] sm:$0xff] }
   0x5   :  { %29 = vst.msk [vmem:[#allocation2 + $0x38] sm:$0xff] %vm21_vm0, %v536_v3  ;;  %30 = vst.msk [vmem:[#allocation2 + $0x40] sm:$0xff] %vm21_vm0, %v536_v3  ;;  %490 = vmatpush3.bf16.msra.mxu0 %v487_v4  ;;  %527 = vmatpush3.bf16.msra.mxu1 %v487_v4  ;;  %v77_v13 = vld [vmem:[%s796_s1 + $0x38] sm:$0xff]  ;;  %v78_v15 = vld [vmem:[%s796_s1 + $0x40] sm:$0xff] }
   0x6   :  { %31 = vst.msk [vmem:[#allocation2 + $0x48] sm:$0xff] %vm21_vm0, %v536_v3  ;;  %32 = vst.msk [vmem:[#allocation2 + $0x50] sm:$0xff] %vm21_vm0, %v536_v3  ;;  %492 = vmatprep.subr.bf16.mxu0 %v491_v6  ;;  %520 = vmatprep.subr.bf16.mxu1 %v491_v6  ;;  %v499_v14 = vpack.c.bf16 %v77_v13, %v76_v12  ;;  %v79_v16 = vld [vmem:[%s796_s1 + $0x48] sm:$0xff]  ;;  %v80_v18 = vld [vmem:[%s796_s1 + $0x50] sm:$0xff] }
   0x7   :  { %33 = vst.msk [vmem:[#allocation2 + $0x58] sm:$0xff] %vm21_vm0, %v536_v3  ;;  %34 = vst.msk [vmem:[#allocation2 + $0x60] sm:$0xff] %vm21_vm0, %v536_v3  ;;  %463 = vmatprep.mubr.f32.mxu0 %v54_v10  ;;  %475 = vmatprep.mubr.f32.mxu1 %v62_v11  ;;  %v503_v17 = vpack.c.bf16 %v79_v16, %v78_v15  ;;  %v81_v19 = vld [vmem:[%s796_s1 + $0x58] sm:$0xff]  ;;  %v82_v21 = vld [vmem:[%s796_s1 + $0x60] sm:$0xff] }
   0x8   :  { %35 = vst.msk [vmem:[#allocation2 + $0x68] sm:$0xff] %vm21_vm0, %v536_v3  ;;  %36 = vst.msk [vmem:[#allocation2 + $0x70] sm:$0xff] %vm21_vm0, %v536_v3  ;;  %v507_v20 = vpack.c.bf16 %v81_v19, %v80_v18  ;;  %v83_v22 = vld [vmem:[%s796_s1 + $0x68] sm:$0xff]  ;;  %v84_v24 = vld [vmem:[%s796_s1 + $0x70] sm:$0xff] }
   0x9   :  { %37 = vst.msk [vmem:[#allocation2 + $0x78] sm:$0xff] %vm21_vm0, %v536_v3  ;;  %494 = vmatpush3.bf16.msra.mxu0 %v491_v6  ;;  %528 = vmatpush3.bf16.msra.mxu1 %v491_v6  ;;  %v511_v23 = vpack.c.bf16 %v83_v22, %v82_v21  ;;  %v85_v25 = vld [vmem:[%s796_s1 + $0x78] sm:$0xff]  ;;  %v55_v27 = vld [vmem:[%s797_s0 + $0x8] sm:$0xff]  ;;  %v56_v29 = vld [vmem:[%s797_s0 + $0x10] sm:$0xff] }
   0xa   :  { %496 = vmatprep.subr.bf16.mxu0 %v495_v9  ;;  %521 = vmatprep.subr.bf16.mxu1 %v495_v9  ;;  %v515_v26 = vpack.c.bf16 %v85_v25, %v84_v24  ;;  %v63_v28 = vld [vmem:[%s797_s0 + $0x48] sm:$0xff]  ;;  %v64_v30 = vld [vmem:[%s797_s0 + $0x50] sm:$0xff]  ;;  %v57_v31 = vld [vmem:[%s797_s0 + $0x18] sm:$0xff] }
   0xb   :  { %v65_v32 = vld [vmem:[%s797_s0 + $0x58] sm:$0xff]  ;;  %v58_v33 = vld [vmem:[%s797_s0 + $0x20] sm:$0xff]  ;;  %v59_v35 = vld [vmem:[%s797_s0 + $0x28] sm:$0xff] }
   0xc   :  { %v66_v34 = vld [vmem:[%s797_s0 + $0x60] sm:$0xff]  ;;  %v67_v36 = vld [vmem:[%s797_s0 + $0x68] sm:$0xff]  ;;  %v60_v37 = vld [vmem:[%s797_s0 + $0x30] sm:$0xff] }
   0xd   :  { %498 = vmatpush3.bf16.msra.mxu0 %v495_v9  ;;  %529 = vmatpush3.bf16.msra.mxu1 %v495_v9  ;;  %v68_v38 = vld [vmem:[%s797_s0 + $0x70] sm:$0xff]  ;;  %v61_v39 = vld [vmem:[%s797_s0 + $0x38] sm:$0xff]  ;;  %v39_v41 = vld [vmem:[#allocation2 + $0x8] sm:$0xff] }
   0xe   :  { %500 = vmatprep.subr.bf16.mxu0 %v499_v14  ;;  %522 = vmatprep.subr.bf16.mxu1 %v499_v14  ;;  %v69_v40 = vld [vmem:[%s797_s0 + $0x78] sm:$0xff]  ;;  %v47_v42 = vld [vmem:[#allocation2 + $0x48] sm:$0xff]  ;;  %v38_v43 = vld [vmem:[#allocation2] sm:$0xff] }
   0xf   :  { %v46_v44 = vld [vmem:[#allocation2 + $0x40] sm:$0xff]  ;;  %v41_v53 = vld [vmem:[#allocation2 + $0x18] sm:$0xff]  ;;  %v40_v55 = vld [vmem:[#allocation2 + $0x10] sm:$0xff] }
  0x10   :  { %v49_v54 = vld [vmem:[#allocation2 + $0x58] sm:$0xff]  ;;  %v48_v56 = vld [vmem:[#allocation2 + $0x50] sm:$0xff]  ;;  %v43_v1 = vld [vmem:[#allocation2 + $0x28] sm:$0xff] }
  0x11   :  { %502 = vmatpush3.bf16.msra.mxu0 %v499_v14  ;;  %530 = vmatpush3.bf16.msra.mxu1 %v499_v14  ;;  %v51_v2 = vld [vmem:[#allocation2 + $0x68] sm:$0xff]  ;;  %v42_v3 = vld [vmem:[#allocation2 + $0x20] sm:$0xff]  ;;  %v45_v13 = vld [vmem:[#allocation2 + $0x38] sm:$0xff] }
  0x12   :  { %504 = vmatprep.subr.bf16.mxu0 %v503_v17  ;;  %523 = vmatprep.subr.bf16.mxu1 %v503_v17  ;;  %v50_v4 = vld [vmem:[#allocation2 + $0x60] sm:$0xff]  ;;  %v53_v14 = vld [vmem:[#allocation2 + $0x78] sm:$0xff]  ;;  %v44_v19 = vld [vmem:[#allocation2 + $0x30] sm:$0xff] }
  0x13   :  { %v683_v5 = vld [vmem:[%s798_s2] ss:$0 sm:$0xff]  ;;  %v52_v24 = vld [vmem:[#allocation2 + $0x70] sm:$0xff] }
  0x14   :  { %v690_v8 = vld [vmem:[%s799_s3] ss:$0 sm:$0xff] }
  0x15   :  { %506 = vmatpush3.bf16.msra.mxu0 %v503_v17  ;;  %531 = vmatpush3.bf16.msra.mxu1 %v503_v17 }
  0x16   :  { %508 = vmatprep.subr.bf16.mxu0 %v507_v20  ;;  %524 = vmatprep.subr.bf16.mxu1 %v507_v20 }
  0x19   :  { %510 = vmatpush3.bf16.msra.mxu0 %v507_v20  ;;  %532 = vmatpush3.bf16.msra.mxu1 %v507_v20 }
  0x1a   :  { %512 = vmatprep.subr.bf16.mxu0 %v511_v23  ;;  %525 = vmatprep.subr.bf16.mxu1 %v511_v23 }
  0x1d   :  { %514 = vmatpush3.bf16.msra.mxu0 %v511_v23  ;;  %533 = vmatpush3.bf16.msra.mxu1 %v511_v23 }
  0x1e   :  { %516 = vmatprep.subr.bf16.mxu0 %v515_v26  ;;  %526 = vmatprep.subr.bf16.mxu1 %v515_v26 }
  0x21   :  { %518 = vmatpush3.bf16.msra.mxu0 %v515_v26  ;;  %534 = vmatpush3.bf16.msra.mxu1 %v515_v26 }
  0x24   :  { %464 = vmatmul.mubr.f32.vlgmr.msra.gmra.mrb[0].mxu0 %v55_v27  ;;  %476 = vmatmul.mubr.f32.vlgmr.msra.gmra.mrb[0].mxu1 %v63_v28 }
  0x25   :  { %466 = vmatprep.mubr.f32.mxu0 %v56_v29  ;;  %478 = vmatprep.mubr.f32.mxu1 %v64_v30 }
  0x28   :  { %467 = vmatmul.mubr.f32.gmra.mrb[2].mxu0 %v57_v31  ;;  %479 = vmatmul.mubr.f32.gmra.mrb[2].mxu1 %v65_v32 }
  0x29   :  { %469 = vmatprep.mubr.f32.mxu0 %v58_v33  ;;  %481 = vmatprep.mubr.f32.mxu1 %v66_v34 }
  0x2c   :  { %470 = vmatmul.mubr.f32.gmra.mrb[4].mxu0 %v59_v35  ;;  %482 = vmatmul.mubr.f32.gmra.mrb[4].mxu1 %v67_v36 }
  0x2d   :  { %472 = vmatprep.mubr.f32.mxu0 %v60_v37  ;;  %484 = vmatprep.mubr.f32.mxu1 %v68_v38 }
  0x30   :  { %473 = vmatmul.mubr.f32.gmra.mrb[6].mxu0 %v61_v39  ;;  %485 = vmatmul.mubr.f32.gmra.mrb[6].mxu1 %v69_v40 }
  0xf7   :  { %v465_v45 = vpop.f32.mrb[0].mxu0  ;;  %v477_v46 = vpop.f32.mrb[0].mxu1 }
  0xf8   :  { %v232_v47 = vadd.f32 %v465_v45, %v39_v41  ;;  %v240_v48 = vadd.f32 %v477_v46, %v47_v42  ;;  %v152_v49 = vpop.f32.mrb[1].mxu0  ;;  %v192_v50 = vpop.f32.mrb[1].mxu1 }
  0xf9   :  { %v231_v51 = vadd.f32 %v152_v49, %v38_v43  ;;  %v239_v52 = vadd.f32 %v192_v50, %v46_v44 }
  0xfa   :  { %249 = vst.msk [vmem:[#allocation2 + $0x8] sm:$0xff] %vm21_vm0, %v232_v47  ;;  %257 = vst.msk [vmem:[#allocation2 + $0x48] sm:$0xff] %vm21_vm0, %v240_v48 }
  0xfb   :  { %248 = vst.msk [vmem:[#allocation2] sm:$0xff] %vm21_vm0, %v231_v51  ;;  %256 = vst.msk [vmem:[#allocation2 + $0x40] sm:$0xff] %vm21_vm0, %v239_v52  ;;  %v468_v57 = vpop.f32.mrb[2].mxu0  ;;  %v480_v58 = vpop.f32.mrb[2].mxu1 }
  0xfc   :  { %v234_v59 = vadd.f32 %v468_v57, %v41_v53  ;;  %v242_v60 = vadd.f32 %v480_v58, %v49_v54  ;;  %v162_v61 = vpop.f32.mrb[3].mxu0  ;;  %v202_v62 = vpop.f32.mrb[3].mxu1 }
  0xfd   :  { %v233_v63 = vadd.f32 %v162_v61, %v40_v55  ;;  %v241_v0 = vadd.f32 %v202_v62, %v48_v56 }
  0xfe   :  { %251 = vst.msk [vmem:[#allocation2 + $0x18] sm:$0xff] %vm21_vm0, %v234_v59  ;;  %259 = vst.msk [vmem:[#allocation2 + $0x58] sm:$0xff] %vm21_vm0, %v242_v60 }
  0xff   :  { %250 = vst.msk [vmem:[#allocation2 + $0x10] sm:$0xff] %vm21_vm0, %v233_v63  ;;  %258 = vst.msk [vmem:[#allocation2 + $0x50] sm:$0xff] %vm21_vm0, %v241_v0  ;;  %v471_v6 = vpop.f32.mrb[4].mxu0  ;;  %v483_v7 = vpop.f32.mrb[4].mxu1 }
 0x100   :  { %v236_v9 = vadd.f32 %v471_v6, %v43_v1  ;;  %v244_v10 = vadd.f32 %v483_v7, %v51_v2  ;;  %v172_v11 = vpop.f32.mrb[5].mxu0  ;;  %v212_v12 = vpop.f32.mrb[5].mxu1 }
 0x101   :  { %v268_v15 = vld [vmem:[#allocation2 + $0x8] sm:$0xff]  ;;  %v235_v17 = vadd.f32 %v172_v11, %v42_v3  ;;  %v243_v18 = vadd.f32 %v212_v12, %v50_v4 }
 0x102   :  { %v276_v16 = vld [vmem:[#allocation2 + $0x48] sm:$0xff]  ;;  %v291_v20 = vmul.f32 %v683_v5, %v268_v15  ;;  %v267_v22 = vld [vmem:[#allocation2] sm:$0xff]  ;;  %253 = vst.msk [vmem:[#allocation2 + $0x28] sm:$0xff] %vm21_vm0, %v236_v9  ;;  %261 = vst.msk [vmem:[#allocation2 + $0x68] sm:$0xff] %vm21_vm0, %v244_v10 }
 0x103   :  { %v299_v21 = vmul.f32 %v683_v5, %v276_v16  ;;  %v275_v23 = vld [vmem:[#allocation2 + $0x40] sm:$0xff]  ;;  %v290_v25 = vmul.f32 %v683_v5, %v267_v22  ;;  %252 = vst.msk [vmem:[#allocation2 + $0x20] sm:$0xff] %vm21_vm0, %v235_v17  ;;  %260 = vst.msk [vmem:[#allocation2 + $0x60] sm:$0xff] %vm21_vm0, %v243_v18  ;;  %v474_v27 = vpop.f32.mrb[6].mxu0  ;;  %v486_v28 = vpop.f32.mrb[6].mxu1 }
 0x104   :  { %v298_v26 = vmul.f32 %v683_v5, %v275_v23  ;;  %v314_v29 = vadd.f32 %v690_v8, %v291_v20  ;;  %v238_v31 = vadd.f32 %v474_v27, %v45_v13  ;;  %v246_v32 = vadd.f32 %v486_v28, %v53_v14  ;;  %v182_v33 = vpop.f32.mrb[7].mxu0  ;;  %v222_v34 = vpop.f32.mrb[7].mxu1 }
 0x105   :  { %v322_v30 = vadd.f32 %v690_v8, %v299_v21  ;;  %v313_v35 = vadd.f32 %v690_v8, %v290_v25  ;;  %v270_v37 = vld [vmem:[#allocation2 + $0x18] sm:$0xff]  ;;  %v237_v39 = vadd.f32 %v182_v33, %v44_v19  ;;  %v245_v40 = vadd.f32 %v222_v34, %v52_v24 }
 0x106   :  { %v321_v36 = vadd.f32 %v690_v8, %v298_v26  ;;  %v278_v38 = vld [vmem:[#allocation2 + $0x58] sm:$0xff]  ;;  %vm330_vm1 = vcmp.ge.f32.partialorder %v314_v29, 0.0  ;;  %v346_v41 = vmul.f32 0.2, %v314_v29  ;;  %255 = vst.msk [vmem:[#allocation2 + $0x38] sm:$0xff] %vm21_vm0, %v238_v31  ;;  %263 = vst.msk [vmem:[#allocation2 + $0x78] sm:$0xff] %vm21_vm0, %v246_v32  ;;  %v293_v47 = vmul.f32 %v683_v5, %v270_v37 }
 0x107   :  { %vm338_vm2 = vcmp.ge.f32.partialorder %v322_v30, 0.0  ;;  %v354_v42 = vmul.f32 0.2, %v322_v30  ;;  %vm329_vm3 = vcmp.ge.f32.partialorder %v313_v35, 0.0  ;;  %v345_v43 = vmul.f32 0.2, %v313_v35 }
 0x108   :  { %vm337_vm4 = vcmp.ge.f32.partialorder %v321_v36, 0.0  ;;  %v353_v44 = vmul.f32 0.2, %v321_v36  ;;  %254 = vst.msk [vmem:[#allocation2 + $0x30] sm:$0xff] %vm21_vm0, %v237_v39  ;;  %262 = vst.msk [vmem:[#allocation2 + $0x70] sm:$0xff] %vm21_vm0, %v245_v40  ;;  %v362_v45 = vsel %vm330_vm1, %v314_v29, %v346_v41  ;;  %v301_v48 = vmul.f32 %v683_v5, %v278_v38  ;;  %v269_v49 = vld [vmem:[#allocation2 + $0x10] sm:$0xff] }
 0x109   :  { %v370_v46 = vsel %vm338_vm2, %v322_v30, %v354_v42  ;;  %v277_v50 = vld [vmem:[#allocation2 + $0x50] sm:$0xff]  ;;  %378 = vst.msk [vmem:[%s800_s4 + $0x8] sm:$0xff] %vm21_vm0, %v362_v45  ;;  %v361_v51 = vsel %vm329_vm3, %v313_v35, %v345_v43  ;;  %v292_v53 = vmul.f32 %v683_v5, %v269_v49  ;;  %v272_v55 = vld [vmem:[#allocation2 + $0x28] sm:$0xff]  ;;  %v316_v57 = vadd.f32 %v690_v8, %v293_v47 }
 0x10a   :  { %386 = vst.msk [vmem:[%s800_s4 + $0x48] sm:$0xff] %vm21_vm0, %v370_v46  ;;  %v369_v52 = vsel %vm337_vm4, %v321_v36, %v353_v44  ;;  %v300_v54 = vmul.f32 %v683_v5, %v277_v50  ;;  %v280_v56 = vld [vmem:[#allocation2 + $0x68] sm:$0xff]  ;;  %377 = vst.msk [vmem:[%s800_s4] sm:$0xff] %vm21_vm0, %v361_v51  ;;  %v324_v58 = vadd.f32 %v690_v8, %v301_v48  ;;  %v271_v61 = vld [vmem:[#allocation2 + $0x20] sm:$0xff] }
 0x10b   :  { %385 = vst.msk [vmem:[%s800_s4 + $0x40] sm:$0xff] %vm21_vm0, %v369_v52  ;;  %v295_v59 = vmul.f32 %v683_v5, %v272_v55  ;;  %v303_v60 = vmul.f32 %v683_v5, %v280_v56  ;;  %v279_v62 = vld [vmem:[#allocation2 + $0x60] sm:$0xff]  ;;  %v315_v63 = vadd.f32 %v690_v8, %v292_v53  ;;  %v294_v1 = vmul.f32 %v683_v5, %v271_v61 }
 0x10c   :  { %v323_v0 = vadd.f32 %v690_v8, %v300_v54  ;;  %v302_v2 = vmul.f32 %v683_v5, %v279_v62  ;;  %vm332_vm5 = vcmp.ge.f32.partialorder %v316_v57, 0.0  ;;  %v348_v3 = vmul.f32 0.2, %v316_v57 }
 0x10d   :  { %vm340_vm6 = vcmp.ge.f32.partialorder %v324_v58, 0.0  ;;  %v356_v4 = vmul.f32 0.2, %v324_v58  ;;  %vm331_vm7 = vcmp.ge.f32.partialorder %v315_v63, 0.0  ;;  %v347_v6 = vmul.f32 0.2, %v315_v63 }
 0x10e   :  { %vm339_vm8 = vcmp.ge.f32.partialorder %v323_v0, 0.0  ;;  %v355_v7 = vmul.f32 0.2, %v323_v0  ;;  %v364_v9 = vsel %vm332_vm5, %v316_v57, %v348_v3  ;;  %v318_v11 = vadd.f32 %v690_v8, %v295_v59  ;;  %v274_v13 = vld [vmem:[#allocation2 + $0x38] sm:$0xff] }
 0x10f   :  { %v372_v10 = vsel %vm340_vm6, %v324_v58, %v356_v4  ;;  %v326_v12 = vadd.f32 %v690_v8, %v303_v60  ;;  %380 = vst.msk [vmem:[%s800_s4 + $0x18] sm:$0xff] %vm21_vm0, %v364_v9  ;;  %v363_v14 = vsel %vm331_vm7, %v315_v63, %v347_v6  ;;  %v317_v16 = vadd.f32 %v690_v8, %v294_v1  ;;  %v282_v18 = vld [vmem:[#allocation2 + $0x78] sm:$0xff]  ;;  %v273_v19 = vld [vmem:[#allocation2 + $0x30] sm:$0xff] }
 0x110   :  { %388 = vst.msk [vmem:[%s800_s4 + $0x58] sm:$0xff] %vm21_vm0, %v372_v10  ;;  %v371_v15 = vsel %vm339_vm8, %v323_v0, %v355_v7  ;;  %v325_v17 = vadd.f32 %v690_v8, %v302_v2  ;;  %v281_v20 = vld [vmem:[#allocation2 + $0x70] sm:$0xff]  ;;  %379 = vst.msk [vmem:[%s800_s4 + $0x10] sm:$0xff] %vm21_vm0, %v363_v14  ;;  %vm334_vm9 = vcmp.ge.f32.partialorder %v318_v11, 0.0  ;;  %v350_v21 = vmul.f32 0.2, %v318_v11 }
 0x111   :  { %387 = vst.msk [vmem:[%s800_s4 + $0x50] sm:$0xff] %vm21_vm0, %v371_v15  ;;  %vm342_vm10 = vcmp.ge.f32.partialorder %v326_v12, 0.0  ;;  %v358_v22 = vmul.f32 0.2, %v326_v12  ;;  %vm333_vm11 = vcmp.ge.f32.partialorder %v317_v16, 0.0  ;;  %v297_v27 = vmul.f32 %v683_v5, %v274_v13 }
 0x112   :  { %v349_v23 = vmul.f32 0.2, %v317_v16  ;;  %vm341_vm12 = vcmp.ge.f32.partialorder %v325_v17, 0.0  ;;  %v357_v24 = vmul.f32 0.2, %v325_v17  ;;  %v366_v25 = vsel %vm334_vm9, %v318_v11, %v350_v21 }
 0x113   :  { %v374_v26 = vsel %vm342_vm10, %v326_v12, %v358_v22  ;;  %v305_v28 = vmul.f32 %v683_v5, %v282_v18  ;;  %382 = vst.msk [vmem:[%s800_s4 + $0x28] sm:$0xff] %vm21_vm0, %v366_v25  ;;  %v296_v31 = vmul.f32 %v683_v5, %v273_v19  ;;  %v304_v32 = vmul.f32 %v683_v5, %v281_v20 }
 0x114   :  { %390 = vst.msk [vmem:[%s800_s4 + $0x68] sm:$0xff] %vm21_vm0, %v374_v26  ;;  %v365_v29 = vsel %vm333_vm11, %v317_v16, %v349_v23  ;;  %v373_v30 = vsel %vm341_vm12, %v325_v17, %v357_v24  ;;  %v320_v33 = vadd.f32 %v690_v8, %v297_v27 }
 0x115   :  { %381 = vst.msk [vmem:[%s800_s4 + $0x20] sm:$0xff] %vm21_vm0, %v365_v29  ;;  %389 = vst.msk [vmem:[%s800_s4 + $0x60] sm:$0xff] %vm21_vm0, %v373_v30  ;;  %v328_v34 = vadd.f32 %v690_v8, %v305_v28  ;;  %v319_v35 = vadd.f32 %v690_v8, %v296_v31  ;;  %v327_v36 = vadd.f32 %v690_v8, %v304_v32 }
 0x116   :  { %vm336_vm13 = vcmp.ge.f32.partialorder %v320_v33, 0.0  ;;  %v352_v5 = vmul.f32 0.2, %v320_v33 }
 0x117   :  { %vm344_vm14 = vcmp.ge.f32.partialorder %v328_v34, 0.0  ;;  %v360_v37 = vmul.f32 0.2, %v328_v34  ;;  %vm335_vm15 = vcmp.ge.f32.partialorder %v319_v35, 0.0  ;;  %v351_v38 = vmul.f32 0.2, %v319_v35 }
 0x118   :  { %vm343_vm1 = vcmp.ge.f32.partialorder %v327_v36, 0.0  ;;  %v359_v39 = vmul.f32 0.2, %v327_v36  ;;  %v368_v40 = vsel %vm336_vm13, %v320_v33, %v352_v5 }
 0x119   :  { %v376_v41 = vsel %vm344_vm14, %v328_v34, %v360_v37  ;;  %384 = vst.msk [vmem:[%s800_s4 + $0x38] sm:$0xff] %vm21_vm0, %v368_v40  ;;  %v367_v8 = vsel %vm335_vm15, %v319_v35, %v351_v38 }
 0x11a   :  { %392 = vst.msk [vmem:[%s800_s4 + $0x78] sm:$0xff] %vm21_vm0, %v376_v41  ;;  %v375_v42 = vsel %vm343_vm1, %v327_v36, %v359_v39  ;;  %383 = vst.msk [vmem:[%s800_s4 + $0x30] sm:$0xff] %vm21_vm0, %v367_v8 }
 0x11b   :  { %391 = vst.msk [vmem:[%s800_s4 + $0x70] sm:$0xff] %vm21_vm0, %v375_v42 }

// kernel: _lambda_.13
= control target key start
LH: loop header
LB: loop body
LE: loop exit
PB: predicated region body
PF: predicated region fallthrough
CT: control target
= control target key end

     0   :  { %vm21_vm0 = vcmask 261120   ;;  %v308_v56 = vmov 0.0   ;;  %s484_s1 = inlined_call_operand.vmem [shape: f32[256,32], index: 1, kind: input, shape index: {}]   ;;  %s485_s0 = inlined_call_operand.vmem [shape: f32[32,256], index: 0, kind: input, shape index: {}]   ;;  %s486_s2 = inlined_call_operand.vmem [shape: f32[1,32], index: 2, kind: input, shape index: {}]   ;;  %s487_s3 = inlined_call_operand.vmem [shape: f32[1,32], index: 3, kind: input, shape index: {}]   ;;  %s488_s4 = inlined_call_operand.vmem [shape: f32[32,32], index: 4, kind: output, shape index: {}]  }
   0x1   :  { %v54_v0 = vld [vmem:[%s484_s1 + $0x80] sm:$0xff]  ;;  %v55_v1 = vld [vmem:[%s484_s1 + $0x88] sm:$0xff]  ;;  %v56_v5 = vld [vmem:[%s484_s1 + $0x90] sm:$0xff]  ;;  %22 = vst.msk [vmem:[#allocation2] sm:$0xff] %vm21_vm0, %v308_v56 }
   0x2   :  { %v38_v2 = vld [vmem:[%s484_s1] sm:$0xff]  ;;  %v259_v3 = vpack.c.bf16 %v55_v1, %v54_v0  ;;  %v39_v4 = vld [vmem:[%s484_s1 + $0x8] sm:$0xff]  ;;  %v57_v6 = vld [vmem:[%s484_s1 + $0x98] sm:$0xff]  ;;  %23 = vst.msk [vmem:[#allocation2 + $0x8] sm:$0xff] %vm21_vm0, %v308_v56 }
   0x3   :  { %v261_v7 = vpack.c.bf16 %v39_v4, %v38_v2  ;;  %v263_v8 = vpack.c.bf16 %v57_v6, %v56_v5  ;;  %v40_v9 = vld [vmem:[%s484_s1 + $0x10] sm:$0xff]  ;;  %v41_v10 = vld [vmem:[%s484_s1 + $0x18] sm:$0xff]  ;;  %v58_v11 = vld [vmem:[%s484_s1 + $0xa0] sm:$0xff]  ;;  %24 = vst.msk [vmem:[#allocation2 + $0x10] sm:$0xff] %vm21_vm0, %v308_v56 }
   0x4   :  { %260 = vmatprep.subr.bf16.mxu0 %v259_v3  ;;  %291 = vmatprep.subr.bf16.mxu1 %v259_v3  ;;  %v59_v12 = vld [vmem:[%s484_s1 + $0xa8] sm:$0xff]  ;;  %v265_v13 = vpack.c.bf16 %v41_v10, %v40_v9  ;;  %v42_v15 = vld [vmem:[%s484_s1 + $0x20] sm:$0xff]  ;;  %v60_v17 = vld [vmem:[%s484_s1 + $0xb0] sm:$0xff]  ;;  %25 = vst.msk [vmem:[#allocation2 + $0x18] sm:$0xff] %vm21_vm0, %v308_v56 }
   0x5   :  { %262 = vmatpush3.bf16.msra.mxu0 %v261_v7  ;;  %299 = vmatpush3.bf16.msra.mxu1 %v261_v7  ;;  %v267_v14 = vpack.c.bf16 %v59_v12, %v58_v11  ;;  %v43_v16 = vld [vmem:[%s484_s1 + $0x28] sm:$0xff]  ;;  %v61_v18 = vld [vmem:[%s484_s1 + $0xb8] sm:$0xff]  ;;  %v44_v21 = vld [vmem:[%s484_s1 + $0x30] sm:$0xff] }
   0x6   :  { %264 = vmatprep.subr.bf16.mxu0 %v263_v8  ;;  %292 = vmatprep.subr.bf16.mxu1 %v263_v8  ;;  %v269_v19 = vpack.c.bf16 %v43_v16, %v42_v15  ;;  %v271_v20 = vpack.c.bf16 %v61_v18, %v60_v17  ;;  %v45_v22 = vld [vmem:[%s484_s1 + $0x38] sm:$0xff]  ;;  %v62_v23 = vld [vmem:[%s484_s1 + $0xc0] sm:$0xff]  ;;  %v63_v24 = vld [vmem:[%s484_s1 + $0xc8] sm:$0xff] }
   0x7   :  { %v31_v25 = vld [vmem:[%s485_s0 + $0x8] sm:$0xff]  ;;  %v273_v27 = vpack.c.bf16 %v45_v22, %v44_v21  ;;  %v275_v28 = vpack.c.bf16 %v63_v24, %v62_v23  ;;  %v46_v29 = vld [vmem:[%s484_s1 + $0x40] sm:$0xff]  ;;  %v64_v31 = vld [vmem:[%s484_s1 + $0xd0] sm:$0xff] }
   0x8   :  { %134 = vmatprep.mubr.f32.mxu0 %v31_v25  ;;  %v35_v26 = vld [vmem:[%s485_s0 + $0x28] sm:$0xff]  ;;  %v65_v32 = vld [vmem:[%s484_s1 + $0xd8] sm:$0xff]  ;;  %v48_v35 = vld [vmem:[%s484_s1 + $0x50] sm:$0xff] }
   0x9   :  { %266 = vmatpush3.bf16.msra.mxu0 %v265_v13  ;;  %300 = vmatpush3.bf16.msra.mxu1 %v265_v13  ;;  %v47_v30 = vld [vmem:[%s484_s1 + $0x48] sm:$0xff]  ;;  %v279_v34 = vpack.c.bf16 %v65_v32, %v64_v31  ;;  %v49_v36 = vld [vmem:[%s484_s1 + $0x58] sm:$0xff]  ;;  %v66_v37 = vld [vmem:[%s484_s1 + $0xe0] sm:$0xff] }
   0xa   :  { %268 = vmatprep.subr.bf16.mxu0 %v267_v14  ;;  %293 = vmatprep.subr.bf16.mxu1 %v267_v14  ;;  %v277_v33 = vpack.c.bf16 %v47_v30, %v46_v29  ;;  %v67_v38 = vld [vmem:[%s484_s1 + $0xe8] sm:$0xff]  ;;  %v281_v39 = vpack.c.bf16 %v49_v36, %v48_v35  ;;  %v50_v41 = vld [vmem:[%s484_s1 + $0x60] sm:$0xff]  ;;  %v68_v43 = vld [vmem:[%s484_s1 + $0xf0] sm:$0xff] }
   0xb   :  { %144 = vmatprep.mubr.f32.mxu1 %v35_v26  ;;  %v283_v40 = vpack.c.bf16 %v67_v38, %v66_v37  ;;  %v51_v42 = vld [vmem:[%s484_s1 + $0x68] sm:$0xff]  ;;  %v69_v44 = vld [vmem:[%s484_s1 + $0xf8] sm:$0xff]  ;;  %v52_v47 = vld [vmem:[%s484_s1 + $0x70] sm:$0xff] }
   0xc   :  { %v285_v45 = vpack.c.bf16 %v51_v42, %v50_v41  ;;  %v287_v46 = vpack.c.bf16 %v69_v44, %v68_v43  ;;  %v53_v48 = vld [vmem:[%s484_s1 + $0x78] sm:$0xff]  ;;  %v30_v50 = vld [vmem:[%s485_s0] sm:$0xff]  ;;  %v32_v54 = vld [vmem:[%s485_s0 + $0x10] sm:$0xff] }
   0xd   :  { %270 = vmatpush3.bf16.msra.mxu0 %v269_v19  ;;  %301 = vmatpush3.bf16.msra.mxu1 %v269_v19  ;;  %v289_v49 = vpack.c.bf16 %v53_v48, %v52_v47  ;;  %v34_v51 = vld [vmem:[%s485_s0 + $0x20] sm:$0xff]  ;;  %v33_v52 = vld [vmem:[%s485_s0 + $0x18] sm:$0xff]  ;;  %v36_v55 = vld [vmem:[%s485_s0 + $0x30] sm:$0xff] }
   0xe   :  { %272 = vmatprep.subr.bf16.mxu0 %v271_v20  ;;  %294 = vmatprep.subr.bf16.mxu1 %v271_v20  ;;  %v37_v53 = vld [vmem:[%s485_s0 + $0x38] sm:$0xff]  ;;  %v26_v59 = vld [vmem:[#allocation2] sm:$0xff]  ;;  %v28_v61 = vld [vmem:[#allocation2 + $0x10] sm:$0xff] }
   0xf   :  { %v27_v5 = vld [vmem:[#allocation2 + $0x8] sm:$0xff]  ;;  %v29_v7 = vld [vmem:[#allocation2 + $0x18] sm:$0xff]  ;;  %v213_v13 = vld [vmem:[%s486_s2] ss:$0 sm:$0xff] }
  0x10   :  { %v214_v15 = vld [vmem:[%s487_s3] ss:$0 sm:$0xff] }
  0x11   :  { %274 = vmatpush3.bf16.msra.mxu0 %v273_v27  ;;  %302 = vmatpush3.bf16.msra.mxu1 %v273_v27 }
  0x12   :  { %276 = vmatprep.subr.bf16.mxu0 %v275_v28  ;;  %295 = vmatprep.subr.bf16.mxu1 %v275_v28 }
  0x15   :  { %278 = vmatpush3.bf16.msra.mxu0 %v277_v33  ;;  %303 = vmatpush3.bf16.msra.mxu1 %v277_v33 }
  0x16   :  { %280 = vmatprep.subr.bf16.mxu0 %v279_v34  ;;  %296 = vmatprep.subr.bf16.mxu1 %v279_v34 }
  0x19   :  { %282 = vmatpush3.bf16.msra.mxu0 %v281_v39  ;;  %304 = vmatpush3.bf16.msra.mxu1 %v281_v39 }
  0x1a   :  { %284 = vmatprep.subr.bf16.mxu0 %v283_v40  ;;  %297 = vmatprep.subr.bf16.mxu1 %v283_v40 }
  0x1d   :  { %286 = vmatpush3.bf16.msra.mxu0 %v285_v45  ;;  %305 = vmatpush3.bf16.msra.mxu1 %v285_v45 }
  0x1e   :  { %288 = vmatprep.subr.bf16.mxu0 %v287_v46  ;;  %298 = vmatprep.subr.bf16.mxu1 %v287_v46 }
  0x21   :  { %290 = vmatpush3.bf16.msra.mxu0 %v289_v49  ;;  %306 = vmatpush3.bf16.msra.mxu1 %v289_v49 }
  0x24   :  { %135 = vmatmul.mubr.f32.vlgmr.msra.gmra.mrb[0].mxu0 %v30_v50  ;;  %145 = vmatmul.mubr.f32.vlgmr.msra.gmra.mrb[0].mxu1 %v34_v51 }
  0x25   :  { %139 = vmatprep.mubr.f32.mxu0 %v33_v52  ;;  %149 = vmatprep.mubr.f32.mxu1 %v37_v53 }
  0x28   :  { %140 = vmatmul.mubr.f32.gmra.mrb[2].mxu0 %v32_v54  ;;  %150 = vmatmul.mubr.f32.gmra.mrb[2].mxu1 %v36_v55 }
  0xf7   :  { %v247_v57 = vpop.f32.mrb[0].mxu0  ;;  %v253_v58 = vpop.f32.mrb[0].mxu1 }
  0xf8   :  { %v248_v60 = vpop.f32.mrb[1].mxu0  ;;  %v254_v62 = vpop.f32.mrb[1].mxu1 }
  0xf9   :  { %v249_v63 = vadd.f32 %v248_v60, %v247_v57  ;;  %v255_v0 = vadd.f32 %v254_v62, %v253_v58 }
  0xfb   :  { %v155_v1 = vadd.f32 %v249_v63, %v26_v59  ;;  %v157_v2 = vadd.f32 %v255_v0, %v28_v61  ;;  %v250_v3 = vpop.f32.mrb[2].mxu0  ;;  %v256_v4 = vpop.f32.mrb[2].mxu1 }
  0xfc   :  { %v251_v6 = vpop.f32.mrb[3].mxu0  ;;  %v257_v8 = vpop.f32.mrb[3].mxu1 }
  0xfd   :  { %160 = vst.msk [vmem:[#allocation2] sm:$0xff] %vm21_vm0, %v155_v1  ;;  %162 = vst.msk [vmem:[#allocation2 + $0x10] sm:$0xff] %vm21_vm0, %v157_v2  ;;  %v252_v9 = vadd.f32 %v251_v6, %v250_v3  ;;  %v258_v10 = vadd.f32 %v257_v8, %v256_v4 }
  0xff   :  { %v156_v11 = vadd.f32 %v252_v9, %v27_v5  ;;  %v158_v12 = vadd.f32 %v258_v10, %v29_v7 }
 0x101   :  { %161 = vst.msk [vmem:[#allocation2 + $0x8] sm:$0xff] %vm21_vm0, %v156_v11  ;;  %163 = vst.msk [vmem:[#allocation2 + $0x18] sm:$0xff] %vm21_vm0, %v158_v12 }
 0x104   :  { %v167_v14 = vld [vmem:[#allocation2] sm:$0xff]  ;;  %v169_v16 = vld [vmem:[#allocation2 + $0x10] sm:$0xff] }
 0x105   :  { %v178_v17 = vmul.f32 %v213_v13, %v167_v14  ;;  %v180_v18 = vmul.f32 %v213_v13, %v169_v16 }
 0x107   :  { %v189_v19 = vadd.f32 %v214_v15, %v178_v17  ;;  %v191_v20 = vadd.f32 %v214_v15, %v180_v18 }
 0x108   :  { %v168_v21 = vld [vmem:[#allocation2 + $0x8] sm:$0xff]  ;;  %v170_v22 = vld [vmem:[#allocation2 + $0x18] sm:$0xff] }
 0x109   :  { %vm193_vm1 = vcmp.ge.f32.partialorder %v189_v19, 0.0  ;;  %v197_v23 = vmul.f32 0.2, %v189_v19  ;;  %vm195_vm2 = vcmp.ge.f32.partialorder %v191_v20, 0.0  ;;  %v199_v24 = vmul.f32 0.2, %v191_v20 }
 0x10a   :  { %v179_v25 = vmul.f32 %v213_v13, %v168_v21  ;;  %v181_v26 = vmul.f32 %v213_v13, %v170_v22 }
 0x10b   :  { %v201_v27 = vsel %vm193_vm1, %v189_v19, %v197_v23  ;;  %v203_v28 = vsel %vm195_vm2, %v191_v20, %v199_v24 }
 0x10c   :  { %205 = vst.msk [vmem:[%s488_s4] sm:$0xff] %vm21_vm0, %v201_v27  ;;  %207 = vst.msk [vmem:[%s488_s4 + $0x10] sm:$0xff] %vm21_vm0, %v203_v28  ;;  %v190_v29 = vadd.f32 %v214_v15, %v179_v25  ;;  %v192_v30 = vadd.f32 %v214_v15, %v181_v26 }
 0x10e   :  { %vm194_vm3 = vcmp.ge.f32.partialorder %v190_v29, 0.0  ;;  %v198_v31 = vmul.f32 0.2, %v190_v29  ;;  %vm196_vm4 = vcmp.ge.f32.partialorder %v192_v30, 0.0  ;;  %v200_v32 = vmul.f32 0.2, %v192_v30 }
 0x110   :  { %v202_v33 = vsel %vm194_vm3, %v190_v29, %v198_v31  ;;  %v204_v34 = vsel %vm196_vm4, %v192_v30, %v200_v32 }
 0x111   :  { %206 = vst.msk [vmem:[%s488_s4 + $0x8] sm:$0xff] %vm21_vm0, %v202_v33  ;;  %208 = vst.msk [vmem:[%s488_s4 + $0x18] sm:$0xff] %vm21_vm0, %v204_v34 }

// kernel: _lambda_.14
= control target key start
LH: loop header
LB: loop body
LE: loop exit
PB: predicated region body
PF: predicated region fallthrough
CT: control target
= control target key end

     0   :  { %vm21_vm0 = vcmask 523264   ;;  %s642_s1 = inlined_call_operand.vmem [shape: f32[512,64], index: 1, kind: input, shape index: {}]   ;;  %s643_s0 = inlined_call_operand.vmem [shape: f32[8,512], index: 0, kind: input, shape index: {}]   ;;  %s644_s2 = inlined_call_operand.vmem [shape: f32[1,64], index: 2, kind: input, shape index: {}]   ;;  %s645_s3 = inlined_call_operand.vmem [shape: f32[1,64], index: 3, kind: input, shape index: {}]   ;;  %s646_s4 = inlined_call_operand.vmem [shape: f32[8,64], index: 4, kind: output, shape index: {}]  }
   0x1   :  { %v44_v0 = vld [vmem:[%s642_s1 + $0x80] sm:$0xff]  ;;  %v45_v1 = vld [vmem:[%s642_s1 + $0x88] sm:$0xff]  ;;  %v46_v11 = vld [vmem:[%s642_s1 + $0x90] sm:$0xff] }
   0x2   :  { %v76_v2 = vld [vmem:[%s642_s1 + $0x180] sm:$0xff]  ;;  %v335_v3 = vpack.c.bf16 %v45_v1, %v44_v0  ;;  %v77_v4 = vld [vmem:[%s642_s1 + $0x188] sm:$0xff]  ;;  %v47_v13 = vld [vmem:[%s642_s1 + $0x98] sm:$0xff] }
   0x3   :  { %v28_v5 = vld [vmem:[%s642_s1] sm:$0xff]  ;;  %v29_v6 = vld [vmem:[%s642_s1 + $0x8] sm:$0xff]  ;;  %v367_v7 = vpack.c.bf16 %v77_v4, %v76_v2  ;;  %v78_v14 = vld [vmem:[%s642_s1 + $0x190] sm:$0xff]  ;;  %v339_v16 = vpack.c.bf16 %v47_v13, %v46_v11 }
   0x4   :  { %v337_v8 = vpack.c.bf16 %v29_v6, %v28_v5  ;;  %v60_v9 = vld [vmem:[%s642_s1 + $0x100] sm:$0xff]  ;;  %v61_v10 = vld [vmem:[%s642_s1 + $0x108] sm:$0xff]  ;;  %336 = vmatprep.subr.bf16.mxu0 %v335_v3  ;;  %v79_v15 = vld [vmem:[%s642_s1 + $0x198] sm:$0xff] }
   0x5   :  { %v369_v12 = vpack.c.bf16 %v61_v10, %v60_v9  ;;  %368 = vmatprep.subr.bf16.mxu1 %v367_v7  ;;  %v371_v17 = vpack.c.bf16 %v79_v15, %v78_v14  ;;  %v30_v18 = vld [vmem:[%s642_s1 + $0x10] sm:$0xff]  ;;  %v31_v19 = vld [vmem:[%s642_s1 + $0x18] sm:$0xff]  ;;  %v48_v23 = vld [vmem:[%s642_s1 + $0xa0] sm:$0xff] }
   0x6   :  { %338 = vmatpush3.bf16.msra.mxu0 %v337_v8  ;;  %v62_v20 = vld [vmem:[%s642_s1 + $0x110] sm:$0xff]  ;;  %v341_v21 = vpack.c.bf16 %v31_v19, %v30_v18  ;;  %v63_v22 = vld [vmem:[%s642_s1 + $0x118] sm:$0xff]  ;;  %v49_v24 = vld [vmem:[%s642_s1 + $0xa8] sm:$0xff] }
   0x7   :  { %370 = vmatpush3.bf16.msra.mxu1 %v369_v12  ;;  %340 = vmatprep.subr.bf16.mxu0 %v339_v16  ;;  %v373_v25 = vpack.c.bf16 %v63_v22, %v62_v20  ;;  %v343_v26 = vpack.c.bf16 %v49_v24, %v48_v23  ;;  %v80_v27 = vld [vmem:[%s642_s1 + $0x1a0] sm:$0xff]  ;;  %v81_v28 = vld [vmem:[%s642_s1 + $0x1a8] sm:$0xff]  ;;  %v50_v35 = vld [vmem:[%s642_s1 + $0xb0] sm:$0xff] }
   0x8   :  { %372 = vmatprep.subr.bf16.mxu1 %v371_v17  ;;  %v32_v29 = vld [vmem:[%s642_s1 + $0x20] sm:$0xff]  ;;  %v375_v30 = vpack.c.bf16 %v81_v28, %v80_v27  ;;  %v33_v31 = vld [vmem:[%s642_s1 + $0x28] sm:$0xff]  ;;  %v51_v36 = vld [vmem:[%s642_s1 + $0xb8] sm:$0xff] }
   0x9   :  { %v64_v32 = vld [vmem:[%s642_s1 + $0x120] sm:$0xff]  ;;  %v65_v33 = vld [vmem:[%s642_s1 + $0x128] sm:$0xff]  ;;  %v345_v34 = vpack.c.bf16 %v33_v31, %v32_v29  ;;  %v82_v37 = vld [vmem:[%s642_s1 + $0x1b0] sm:$0xff]  ;;  %v347_v39 = vpack.c.bf16 %v51_v36, %v50_v35  ;;  %v400_v36 = vmov 0.0  }
   0xa   :  { %342 = vmatpush3.bf16.msra.mxu0 %v341_v21  ;;  %v377_v38 = vpack.c.bf16 %v65_v33, %v64_v32  ;;  %v83_v40 = vld [vmem:[%s642_s1 + $0x1b8] sm:$0xff]  ;;  %v34_v41 = vld [vmem:[%s642_s1 + $0x30] sm:$0xff]  ;;  %v52_v46 = vld [vmem:[%s642_s1 + $0xc0] sm:$0xff]  ;;  %22 = vst.msk [vmem:[#allocation2] sm:$0xff] %vm21_vm0, %v400_v36 }
   0xb   :  { %374 = vmatpush3.bf16.msra.mxu1 %v373_v25  ;;  %344 = vmatprep.subr.bf16.mxu0 %v343_v26  ;;  %v35_v42 = vld [vmem:[%s642_s1 + $0x38] sm:$0xff]  ;;  %v379_v43 = vpack.c.bf16 %v83_v40, %v82_v37  ;;  %v66_v44 = vld [vmem:[%s642_s1 + $0x130] sm:$0xff]  ;;  %v53_v47 = vld [vmem:[%s642_s1 + $0xc8] sm:$0xff] }
   0xc   :  { %376 = vmatprep.subr.bf16.mxu1 %v375_v30  ;;  %v67_v45 = vld [vmem:[%s642_s1 + $0x138] sm:$0xff]  ;;  %v84_v48 = vld [vmem:[%s642_s1 + $0x1c0] sm:$0xff]  ;;  %v85_v49 = vld [vmem:[%s642_s1 + $0x1c8] sm:$0xff]  ;;  %v349_v50 = vpack.c.bf16 %v35_v42, %v34_v41  ;;  %v351_v52 = vpack.c.bf16 %v53_v47, %v52_v46 }
   0xd   :  { %v381_v51 = vpack.c.bf16 %v67_v45, %v66_v44  ;;  %v36_v53 = vld [vmem:[%s642_s1 + $0x40] sm:$0xff]  ;;  %v37_v54 = vld [vmem:[%s642_s1 + $0x48] sm:$0xff]  ;;  %v383_v56 = vpack.c.bf16 %v85_v49, %v84_v48  ;;  %v54_v58 = vld [vmem:[%s642_s1 + $0xd0] sm:$0xff] }
   0xe   :  { %346 = vmatpush3.bf16.msra.mxu0 %v345_v34  ;;  %v68_v55 = vld [vmem:[%s642_s1 + $0x140] sm:$0xff]  ;;  %v69_v57 = vld [vmem:[%s642_s1 + $0x148] sm:$0xff]  ;;  %v55_v59 = vld [vmem:[%s642_s1 + $0xd8] sm:$0xff]  ;;  %v353_v62 = vpack.c.bf16 %v37_v54, %v36_v53 }
   0xf   :  { %378 = vmatpush3.bf16.msra.mxu1 %v377_v38  ;;  %348 = vmatprep.subr.bf16.mxu0 %v347_v39  ;;  %v86_v60 = vld [vmem:[%s642_s1 + $0x1d0] sm:$0xff]  ;;  %v87_v61 = vld [vmem:[%s642_s1 + $0x1d8] sm:$0xff]  ;;  %v385_v63 = vpack.c.bf16 %v69_v57, %v68_v55  ;;  %v355_v0 = vpack.c.bf16 %v55_v59, %v54_v58  ;;  %v56_v6 = vld [vmem:[%s642_s1 + $0xe0] sm:$0xff] }
  0x10   :  { %380 = vmatprep.subr.bf16.mxu1 %v379_v43  ;;  %v38_v1 = vld [vmem:[%s642_s1 + $0x50] sm:$0xff]  ;;  %v39_v2 = vld [vmem:[%s642_s1 + $0x58] sm:$0xff]  ;;  %v387_v4 = vpack.c.bf16 %v87_v61, %v86_v60  ;;  %v57_v7 = vld [vmem:[%s642_s1 + $0xe8] sm:$0xff] }
  0x11   :  { %v70_v3 = vld [vmem:[%s642_s1 + $0x150] sm:$0xff]  ;;  %v71_v5 = vld [vmem:[%s642_s1 + $0x158] sm:$0xff]  ;;  %v88_v8 = vld [vmem:[%s642_s1 + $0x1e0] sm:$0xff]  ;;  %v357_v10 = vpack.c.bf16 %v39_v2, %v38_v1  ;;  %v359_v14 = vpack.c.bf16 %v57_v7, %v56_v6 }
  0x12   :  { %350 = vmatpush3.bf16.msra.mxu0 %v349_v50  ;;  %v89_v9 = vld [vmem:[%s642_s1 + $0x1e8] sm:$0xff]  ;;  %v40_v11 = vld [vmem:[%s642_s1 + $0x60] sm:$0xff]  ;;  %v389_v13 = vpack.c.bf16 %v71_v5, %v70_v3  ;;  %v27_v17 = vld [vmem:[%s643_s0 + $0x18] sm:$0xff] }
  0x13   :  { %382 = vmatpush3.bf16.msra.mxu1 %v381_v51  ;;  %352 = vmatprep.subr.bf16.mxu0 %v351_v52  ;;  %v41_v12 = vld [vmem:[%s642_s1 + $0x68] sm:$0xff]  ;;  %v72_v15 = vld [vmem:[%s642_s1 + $0x160] sm:$0xff]  ;;  %v391_v18 = vpack.c.bf16 %v89_v9, %v88_v8  ;;  %v58_v20 = vld [vmem:[%s642_s1 + $0xf0] sm:$0xff] }
  0x14   :  { %384 = vmatprep.subr.bf16.mxu1 %v383_v56  ;;  %v25_v16 = vld [vmem:[%s643_s0 + $0x8] sm:$0xff]  ;;  %v59_v21 = vld [vmem:[%s642_s1 + $0xf8] sm:$0xff]  ;;  %v90_v22 = vld [vmem:[%s642_s1 + $0x1f0] sm:$0xff]  ;;  %226 = vmatprep.mubr.f32.mxu1 %v27_v17  ;;  %v361_v24 = vpack.c.bf16 %v41_v12, %v40_v11 }
  0x15   :  { %v73_v19 = vld [vmem:[%s642_s1 + $0x168] sm:$0xff]  ;;  %156 = vmatprep.mubr.f32.mxu0 %v25_v16  ;;  %v91_v23 = vld [vmem:[%s642_s1 + $0x1f8] sm:$0xff]  ;;  %v363_v26 = vpack.c.bf16 %v59_v21, %v58_v20  ;;  %v42_v27 = vld [vmem:[%s642_s1 + $0x70] sm:$0xff] }
  0x16   :  { %354 = vmatpush3.bf16.msra.mxu0 %v353_v62  ;;  %v393_v25 = vpack.c.bf16 %v73_v19, %v72_v15  ;;  %v43_v28 = vld [vmem:[%s642_s1 + $0x78] sm:$0xff]  ;;  %v395_v29 = vpack.c.bf16 %v91_v23, %v90_v22  ;;  %v74_v30 = vld [vmem:[%s642_s1 + $0x170] sm:$0xff]  ;;  %v24_v34 = vld [vmem:[%s643_s0] sm:$0xff] }
  0x17   :  { %386 = vmatpush3.bf16.msra.mxu1 %v385_v63  ;;  %356 = vmatprep.subr.bf16.mxu0 %v355_v0  ;;  %v75_v31 = vld [vmem:[%s642_s1 + $0x178] sm:$0xff]  ;;  %v365_v32 = vpack.c.bf16 %v43_v28, %v42_v27  ;;  %v26_v35 = vld [vmem:[%s643_s0 + $0x10] sm:$0xff]  ;;  %v23_v43 = vld [vmem:[#allocation2] sm:$0xff] }
  0x18   :  { %388 = vmatprep.subr.bf16.mxu1 %v387_v4  ;;  %v397_v33 = vpack.c.bf16 %v75_v31, %v74_v30  ;;  %v263_v46 = vld [vmem:[%s644_s2] ss:$0 sm:$0xff] }
  0x19   :  { %v264_v48 = vld [vmem:[%s645_s3] ss:$0 sm:$0xff] }
  0x1a   :  { %358 = vmatpush3.bf16.msra.mxu0 %v357_v10 }
  0x1b   :  { %390 = vmatpush3.bf16.msra.mxu1 %v389_v13  ;;  %360 = vmatprep.subr.bf16.mxu0 %v359_v14 }
  0x1c   :  { %392 = vmatprep.subr.bf16.mxu1 %v391_v18 }
  0x1e   :  { %362 = vmatpush3.bf16.msra.mxu0 %v361_v24 }
  0x1f   :  { %394 = vmatpush3.bf16.msra.mxu1 %v393_v25  ;;  %364 = vmatprep.subr.bf16.mxu0 %v363_v26 }
  0x20   :  { %396 = vmatprep.subr.bf16.mxu1 %v395_v29 }
  0x22   :  { %366 = vmatpush3.bf16.msra.mxu0 %v365_v32 }
  0x23   :  { %398 = vmatpush3.bf16.msra.mxu1 %v397_v33 }
  0x25   :  { %157 = vmatmul.mubr.f32.vlgmr.msra.gmra.mrb[0].mxu0 %v24_v34 }
  0x26   :  { %227 = vmatmul.mubr.f32.vlgmr.msra.gmra.mrb[0].mxu1 %v26_v35 }
  0xf8   :  { %v297_v37 = vpop.f32.mrb[0].mxu0 }
  0xf9   :  { %v332_v38 = vpop.f32.mrb[0].mxu1  ;;  %v298_v39 = vpop.f32.mrb[1].mxu0 }
  0xfa   :  { %v299_v40 = vadd.f32 %v298_v39, %v297_v37  ;;  %v333_v41 = vpop.f32.mrb[1].mxu1 }
  0xfb   :  { %v334_v42 = vadd.f32 %v333_v41, %v332_v38 }
  0xfd   :  { %v229_v44 = vadd.f32 %v334_v42, %v299_v40 }
  0xff   :  { %v232_v45 = vadd.f32 %v229_v44, %v23_v43 }
 0x101   :  { %234 = vst.msk [vmem:[#allocation2] sm:$0xff] %vm21_vm0, %v232_v45 }
 0x108   :  { %v238_v47 = vld [vmem:[#allocation2] sm:$0xff] }
 0x109   :  { %v246_v49 = vmul.f32 %v263_v46, %v238_v47 }
 0x10b   :  { %v254_v50 = vadd.f32 %v264_v48, %v246_v49 }
 0x10d   :  { %vm255_vm1 = vcmp.ge.f32.partialorder %v254_v50, 0.0  ;;  %v256_v51 = vmul.f32 0.2, %v254_v50 }
 0x10f   :  { %v257_v52 = vsel %vm255_vm1, %v254_v50, %v256_v51 }
 0x110   :  { %258 = vst.msk [vmem:[%s646_s4] sm:$0xff] %vm21_vm0, %v257_v52 }

// kernel: _lambda_.16
= control target key start
LH: loop header
LB: loop body
LE: loop exit
PB: predicated region body
PF: predicated region fallthrough
CT: control target
= control target key end

     0   :  { %s916_s18 = smov 0   ;;  %s918_s19 = smov 0   ;;  %s1036_s0 = inlined_call_operand.vmem [shape: f32[2,128,9,1,1], index: 0, kind: input, shape index: {}, may-alias: {0,5}]   ;;  %s1037_s1 = inlined_call_operand.vmem [shape: f32[2,1024], index: 1, kind: input, shape index: {}]   ;;  %s1038_s2 = inlined_call_operand.vmem [shape: f32[1024,128], index: 2, kind: input, shape index: {}]   ;;  %s1039_s3 = inlined_call_operand.vmem [shape: f32[1,128], index: 3, kind: input, shape index: {}]   ;;  %s1040_s4 = inlined_call_operand.vmem [shape: f32[1,128], index: 4, kind: input, shape index: {}]   ;;  %s1041_s5 = inlined_call_operand.vmem [shape: f32[2,128,9,1,1], index: 5, kind: output, shape index: {}, may-alias: {0,5}]  }
   0x1   :  { %s920_s0 = smov 0  }
   0x2 LB: > { %s681_s20 = sadd.s32 4294967295, %s882_s0   ;;  %s28_s21 = sadd.s32 1, %s878_s19  ;;  %s882_s0 = sphi %s920_s0, %s16_s0   ;;  %s878_s19 = sphi %s918_s19, %s1043_s19   ;;  %s874_s18 = sphi %s916_s18, %s1042_s18  }
   0x3   : > { %p29_p0 = scmp.ge.s32.totalorder %s28_s21, 2  ;;  %p686_p1 = scmp.ge.s32.totalorder %s882_s0, 1 }
   0x4   : > { %p224_p2 = scmp.lt.s32.totalorder %s882_s0, 3 }
   0x5   : > { %s1045_s21 = smov (%p29_p0, %s28_s21), 0 }
   0x6   : > { %p225_p3 = pnand %p686_p1, %p224_p2 }
   0x7   : > { %s687_s22 = sshll.u32 (!%p225_p3), %s874_s18, 2  ;;  %s689_s23 = sshll.u32 (!%p225_p3), %s874_s18, 6 }
   0x8   : > { %228 = sbr.rel (%p225_p3) target bundleno = 306 (0x132), region = 36  ;;  %p266_p4 = scmp.lt.s32.totalorder (!%p225_p3), %s687_s22, 7 }
   0x9   : > { %p274_p5 = scmp.lt.s32.totalorder (!%p225_p3), %s689_s23, 127  ;;  %p691_p6 = scmp.ne.s32.totalorder (!%p225_p3), %s874_s18, 0 }
   0xf   : > { %s1047_s22 = smov (!%p266_p4, %s687_s22), 7  ;;  %s1049_s23 = smov (!%p274_p5, %s689_s23), 127 }
  0x10   : > { %s688_s24 = sshll.u32 %s1047_s22, 1  ;;  %s690_s28 = sshll.u32 %s1049_s23, 3  ;;  %v884_v0 = vmov (!%p691_p6), 0.0  }
  0x11   : > { %s942_s27 = scalar_lea.vmem %s1037_s1, %s688_s24  ;;  %s947_s6 = scalar_lea.vmem %s1038_s2, %s690_s28  ;;  %292 = vst [vmem:[#allocation2] sm:$0x3] (!%p691_p6), %v884_v0 }
  0x12   : > { %291 = sbr.rel (%p691_p6) target bundleno = 25 (0x19), region = 40 }
  0x19 PF: > { %v311_v1 = vld [vmem:[%s947_s6 + $0x80] sm:$0xff]  ;;  %v312_v2 = vld [vmem:[%s947_s6 + $0x88] sm:$0xff]  ;;  %v313_v12 = vld [vmem:[%s947_s6 + $0x90] sm:$0xff]  ;;  %v885_v48 = vmov 1983009808   ;;  %v364_v50 = vlaneseq  ;;  %p692_p7 = scmp.ne.s32.totalorder %s874_s18, 1 }
  0x1a   : > { %v343_v3 = vld [vmem:[%s947_s6 + $0x180] sm:$0xff]  ;;  %v769_v4 = vpack.c.bf16 %v312_v2, %v311_v1  ;;  %v344_v5 = vld [vmem:[%s947_s6 + $0x188] sm:$0xff]  ;;  %v314_v14 = vld [vmem:[%s947_s6 + $0x98] sm:$0xff]  ;;  %v362_v49 = vunpack.c.l.s4 %v885_v48 }
  0x1b   : > { %v295_v6 = vld [vmem:[%s947_s6] sm:$0xff]  ;;  %v296_v7 = vld [vmem:[%s947_s6 + $0x8] sm:$0xff]  ;;  %v801_v8 = vpack.c.bf16 %v344_v5, %v343_v3  ;;  %v345_v15 = vld [vmem:[%s947_s6 + $0x190] sm:$0xff]  ;;  %v773_v17 = vpack.c.bf16 %v314_v14, %v313_v12  ;;  %v365_v1 = vshrl.u32 %v364_v50, 7 }
  0x1c   : > { %v771_v9 = vpack.c.bf16 %v296_v7, %v295_v6  ;;  %v327_v10 = vld [vmem:[%s947_s6 + $0x100] sm:$0xff]  ;;  %v328_v11 = vld [vmem:[%s947_s6 + $0x108] sm:$0xff]  ;;  %770 = vmatprep.subr.bf16.mxu0 %v769_v4  ;;  %v346_v16 = vld [vmem:[%s947_s6 + $0x198] sm:$0xff]  ;;  %v363_v0 = vunpack.c.0.s8 %v362_v49 }
  0x1d   : > { %v803_v13 = vpack.c.bf16 %v328_v11, %v327_v10  ;;  %802 = vmatprep.subr.bf16.mxu1 %v801_v8  ;;  %v805_v18 = vpack.c.bf16 %v346_v16, %v345_v15  ;;  %v297_v19 = vld [vmem:[%s947_s6 + $0x10] sm:$0xff]  ;;  %v298_v20 = vld [vmem:[%s947_s6 + $0x18] sm:$0xff]  ;;  %v315_v24 = vld [vmem:[%s947_s6 + $0xa0] sm:$0xff] }
  0x1e   : > { %772 = vmatpush3.bf16.msra.mxu0 %v771_v9  ;;  %v329_v21 = vld [vmem:[%s947_s6 + $0x110] sm:$0xff]  ;;  %v775_v22 = vpack.c.bf16 %v298_v20, %v297_v19  ;;  %v330_v23 = vld [vmem:[%s947_s6 + $0x118] sm:$0xff]  ;;  %v316_v25 = vld [vmem:[%s947_s6 + $0xa8] sm:$0xff]  ;;  %v366_v14 = vsub.s32 %v363_v0, %v365_v1 }
  0x1f   : > { %804 = vmatpush3.bf16.msra.mxu1 %v803_v13  ;;  %774 = vmatprep.subr.bf16.mxu0 %v773_v17  ;;  %v807_v26 = vpack.c.bf16 %v330_v23, %v329_v21  ;;  %v777_v27 = vpack.c.bf16 %v316_v25, %v315_v24  ;;  %v347_v28 = vld [vmem:[%s947_s6 + $0x1a0] sm:$0xff]  ;;  %v348_v29 = vld [vmem:[%s947_s6 + $0x1a8] sm:$0xff]  ;;  %v317_v36 = vld [vmem:[%s947_s6 + $0xb0] sm:$0xff] }
  0x20   : > { %806 = vmatprep.subr.bf16.mxu1 %v805_v18  ;;  %v299_v30 = vld [vmem:[%s947_s6 + $0x20] sm:$0xff]  ;;  %v809_v31 = vpack.c.bf16 %v348_v29, %v347_v28  ;;  %v300_v32 = vld [vmem:[%s947_s6 + $0x28] sm:$0xff]  ;;  %v318_v37 = vld [vmem:[%s947_s6 + $0xb8] sm:$0xff] }
  0x21   : > { %v331_v33 = vld [vmem:[%s947_s6 + $0x120] sm:$0xff]  ;;  %v332_v34 = vld [vmem:[%s947_s6 + $0x128] sm:$0xff]  ;;  %v779_v35 = vpack.c.bf16 %v300_v32, %v299_v30  ;;  %v349_v38 = vld [vmem:[%s947_s6 + $0x1b0] sm:$0xff]  ;;  %v781_v40 = vpack.c.bf16 %v318_v37, %v317_v36 }
  0x22   : > { %776 = vmatpush3.bf16.msra.mxu0 %v775_v22  ;;  %v811_v39 = vpack.c.bf16 %v332_v34, %v331_v33  ;;  %v350_v41 = vld [vmem:[%s947_s6 + $0x1b8] sm:$0xff]  ;;  %v301_v42 = vld [vmem:[%s947_s6 + $0x30] sm:$0xff]  ;;  %v319_v47 = vld [vmem:[%s947_s6 + $0xc0] sm:$0xff] }
  0x23   : > { %808 = vmatpush3.bf16.msra.mxu1 %v807_v26  ;;  %778 = vmatprep.subr.bf16.mxu0 %v777_v27  ;;  %v302_v43 = vld [vmem:[%s947_s6 + $0x38] sm:$0xff]  ;;  %v813_v44 = vpack.c.bf16 %v350_v41, %v349_v38  ;;  %v333_v45 = vld [vmem:[%s947_s6 + $0x130] sm:$0xff]  ;;  %v320_v51 = vld [vmem:[%s947_s6 + $0xc8] sm:$0xff] }
  0x24   : > { %810 = vmatprep.subr.bf16.mxu1 %v809_v31  ;;  %v334_v46 = vld [vmem:[%s947_s6 + $0x138] sm:$0xff]  ;;  %v351_v52 = vld [vmem:[%s947_s6 + $0x1c0] sm:$0xff]  ;;  %v352_v53 = vld [vmem:[%s947_s6 + $0x1c8] sm:$0xff]  ;;  %v783_v54 = vpack.c.bf16 %v302_v43, %v301_v42  ;;  %v785_v56 = vpack.c.bf16 %v320_v51, %v319_v47 }
  0x25   : > { %v815_v55 = vpack.c.bf16 %v334_v46, %v333_v45  ;;  %v303_v57 = vld [vmem:[%s947_s6 + $0x40] sm:$0xff]  ;;  %v304_v58 = vld [vmem:[%s947_s6 + $0x48] sm:$0xff]  ;;  %v817_v60 = vpack.c.bf16 %v352_v53, %v351_v52  ;;  %v321_v62 = vld [vmem:[%s947_s6 + $0xd0] sm:$0xff] }
  0x26   : > { %780 = vmatpush3.bf16.msra.mxu0 %v779_v35  ;;  %v335_v59 = vld [vmem:[%s947_s6 + $0x140] sm:$0xff]  ;;  %v336_v61 = vld [vmem:[%s947_s6 + $0x148] sm:$0xff]  ;;  %v322_v63 = vld [vmem:[%s947_s6 + $0xd8] sm:$0xff]  ;;  %v787_v4 = vpack.c.bf16 %v304_v58, %v303_v57 }
  0x27   : > { %812 = vmatpush3.bf16.msra.mxu1 %v811_v39  ;;  %782 = vmatprep.subr.bf16.mxu0 %v781_v40  ;;  %v353_v2 = vld [vmem:[%s947_s6 + $0x1d0] sm:$0xff]  ;;  %v354_v3 = vld [vmem:[%s947_s6 + $0x1d8] sm:$0xff]  ;;  %v819_v5 = vpack.c.bf16 %v336_v61, %v335_v59  ;;  %v789_v6 = vpack.c.bf16 %v322_v63, %v321_v62  ;;  %v323_v12 = vld [vmem:[%s947_s6 + $0xe0] sm:$0xff] }
  0x28   : > { %814 = vmatprep.subr.bf16.mxu1 %v813_v44  ;;  %v305_v7 = vld [vmem:[%s947_s6 + $0x50] sm:$0xff]  ;;  %v306_v8 = vld [vmem:[%s947_s6 + $0x58] sm:$0xff]  ;;  %v821_v10 = vpack.c.bf16 %v354_v3, %v353_v2  ;;  %v324_v13 = vld [vmem:[%s947_s6 + $0xe8] sm:$0xff] }
  0x29   : > { %v337_v9 = vld [vmem:[%s947_s6 + $0x150] sm:$0xff]  ;;  %v338_v11 = vld [vmem:[%s947_s6 + $0x158] sm:$0xff]  ;;  %v355_v15 = vld [vmem:[%s947_s6 + $0x1e0] sm:$0xff]  ;;  %v791_v17 = vpack.c.bf16 %v306_v8, %v305_v7  ;;  %v793_v20 = vpack.c.bf16 %v324_v13, %v323_v12 }
  0x2a   : > { %784 = vmatpush3.bf16.msra.mxu0 %v783_v54  ;;  %v356_v16 = vld [vmem:[%s947_s6 + $0x1e8] sm:$0xff]  ;;  %v307_v18 = vld [vmem:[%s947_s6 + $0x60] sm:$0xff]  ;;  %v823_v19 = vpack.c.bf16 %v338_v11, %v337_v9  ;;  %v325_v26 = vld [vmem:[%s947_s6 + $0xf0] sm:$0xff] }
  0x2b   : > { %816 = vmatpush3.bf16.msra.mxu1 %v815_v55  ;;  %786 = vmatprep.subr.bf16.mxu0 %v785_v56  ;;  %v308_v21 = vld [vmem:[%s947_s6 + $0x68] sm:$0xff]  ;;  %v339_v22 = vld [vmem:[%s947_s6 + $0x160] sm:$0xff]  ;;  %v825_v24 = vpack.c.bf16 %v356_v16, %v355_v15  ;;  %v326_v27 = vld [vmem:[%s947_s6 + $0xf8] sm:$0xff] }
  0x2c   : > { %818 = vmatprep.subr.bf16.mxu1 %v817_v60  ;;  %v294_v23 = vld [vmem:[%s942_s27] sm:$0xff]  ;;  %v340_v25 = vld [vmem:[%s947_s6 + $0x168] sm:$0xff]  ;;  %v357_v30 = vld [vmem:[%s947_s6 + $0x1f0] sm:$0xff]  ;;  %v795_v32 = vpack.c.bf16 %v308_v21, %v307_v18  ;;  %v797_v36 = vpack.c.bf16 %v326_v27, %v325_v26 }
  0x2d   : > { %v367_v28 = vrot.slane %v294_v23, %v366_v14  ;;  %v360_v29 = vcombine.high %v294_v23, %v294_v23  ;;  %v358_v31 = vld [vmem:[%s947_s6 + $0x1f8] sm:$0xff]  ;;  %v827_v35 = vpack.c.bf16 %v340_v25, %v339_v22  ;;  %v309_v37 = vld [vmem:[%s947_s6 + $0x70] sm:$0xff]  ;;  %v293_v51 = vld [vmem:[#allocation2] sm:$0x3] }
  0x2e   : > { %788 = vmatpush3.bf16.msra.mxu0 %v787_v4  ;;  %v310_v38 = vld [vmem:[%s947_s6 + $0x78] sm:$0xff]  ;;  %v829_v39 = vpack.c.bf16 %v358_v31, %v357_v30  ;;  %v341_v40 = vld [vmem:[%s947_s6 + $0x170] sm:$0xff]  ;;  %v693_v55 = vld [vmem:[%s1039_s3] ss:$0 sm:$0xff] (!%p692_p7) }
  0x2f   : > { %820 = vmatpush3.bf16.msra.mxu1 %v819_v5  ;;  %790 = vmatprep.subr.bf16.mxu0 %v789_v6  ;;  %v375_v33 = vcombine.high %v367_v28, %v367_v28  ;;  %v374_v34 = vrot.slane %v360_v29, %v366_v14  ;;  %v342_v41 = vld [vmem:[%s947_s6 + $0x178] sm:$0xff]  ;;  %v799_v43 = vpack.c.bf16 %v310_v38, %v309_v37  ;;  %v694_v56 = vld [vmem:[%s1040_s4] ss:$0 sm:$0xff] (!%p692_p7) }
  0x30   : > { %822 = vmatprep.subr.bf16.mxu1 %v821_v10  ;;  %v831_v44 = vpack.c.bf16 %v342_v41, %v341_v40 }
  0x31   : > { %445 = vmatprep.mubr.f32.mxu0 %v375_v33  ;;  %v376_v42 = vcombine.high %v374_v34, %v374_v34 }
  0x32   : > { %792 = vmatpush3.bf16.msra.mxu0 %v791_v17 }
  0x33   : > { %824 = vmatpush3.bf16.msra.mxu1 %v823_v19  ;;  %794 = vmatprep.subr.bf16.mxu0 %v793_v20 }
  0x34   : > { %826 = vmatprep.subr.bf16.mxu1 %v825_v24  ;;  %515 = vmatprep.mubr.f32.mxu1 %v376_v42 }
  0x36   : > { %796 = vmatpush3.bf16.msra.mxu0 %v795_v32 }
  0x37   : > { %828 = vmatpush3.bf16.msra.mxu1 %v827_v35  ;;  %798 = vmatprep.subr.bf16.mxu0 %v797_v36 }
  0x38   : > { %830 = vmatprep.subr.bf16.mxu1 %v829_v39 }
  0x3a   : > { %800 = vmatpush3.bf16.msra.mxu0 %v799_v43 }
  0x3b   : > { %832 = vmatpush3.bf16.msra.mxu1 %v831_v44 }
  0x3d   : > { %446 = vmatmul.mubr.f32.vlgmr.msra.gmra.mrb[0].mxu0 %v367_v28 }
  0x3e   : > { %516 = vmatmul.mubr.f32.vlgmr.msra.gmra.mrb[0].mxu1 %v374_v34 }
 0x110   : > { %v731_v45 = vpop.f32.mrb[0].mxu0 }
 0x111   : > { %v766_v46 = vpop.f32.mrb[0].mxu1  ;;  %v732_v47 = vpop.f32.mrb[1].mxu0 }
 0x112   : > { %v733_v48 = vadd.f32 %v732_v47, %v731_v45  ;;  %v767_v49 = vpop.f32.mrb[1].mxu1 }
 0x113   : > { %v768_v50 = vadd.f32 %v767_v49, %v766_v46  ;;  %526 = sbr.rel (%p692_p7) target bundleno = 297 (0x129), region = 44 }
 0x115   : > { %v518_v52 = vadd.f32 %v768_v50, %v733_v48 }
 0x117   : > { %v521_v53 = vadd.f32 %v518_v52, %v293_v51 }
 0x119   : > { %522 = vst [vmem:[#allocation2] sm:$0x3] %v521_v53 }
 0x120   : > { %v527_v54 = vld [vmem:[#allocation2] sm:$0x3] }
 0x121   : > { %v535_v57 = vmul.f32 %v693_v55, %v527_v54 }
 0x123   : > { %v543_v58 = vadd.f32 %v694_v56, %v535_v57 }
 0x125   : > { %vm544_vm0 = vcmp.ge.f32.partialorder %v543_v58, 0.0  ;;  %v545_v59 = vmul.f32 0.2, %v543_v58 }
 0x127   : > { %v546_v60 = vsel %vm544_vm0, %v543_v58, %v545_v59 }
 0x128   : > { %547 = vst [vmem:[#allocation3] sm:$0x3] %v546_v60 }
 0x129 PF: > { %p695_p8 = scmp.ne.s32.totalorder %s681_s20, 1 }
 0x12b   : > { %550 = sbr.rel (%p695_p8) target bundleno = 306 (0x132), region = 48 }
 0x12f   : > { %v569_v61 = vld [vmem:[#allocation3] sm:$0x3] (!%p695_p8) }
 0x130   : > { %696 = vst [vmem:[%s1041_s5 + $0x8] sm:$0x3] (!%p695_p8), %v569_v61 }
 0x132 PF: > { %s16_s0 = sadd.s32 1, %s882_s0   ;;  %s1042_s18 = smov %s878_s19 }
 0x133   : > { %p13_p9 = scmp.ge.s32.totalorder %s16_s0, 4   ;;  %s1043_s19 = smov %s1045_s21 }
 0x135   :  { %15 = sbr.rel (!%p13_p9) target bundleno = 2 (0x2), region = 115 }

// kernel: _lambda_.17
= control target key start
LH: loop header
LB: loop body
LE: loop exit
PB: predicated region body
PF: predicated region fallthrough
CT: control target
= control target key end

     0   :  { %s913_s18 = smov 0   ;;  %s915_s19 = smov 0   ;;  %s1025_s0 = inlined_call_operand.vmem [shape: f32[2,64,9,1,1], index: 0, kind: input, shape index: {}, may-alias: {0,5}]   ;;  %s1026_s1 = inlined_call_operand.vmem [shape: f32[2,1152], index: 1, kind: input, shape index: {}]   ;;  %s1027_s2 = inlined_call_operand.vmem [shape: f32[1152,64], index: 2, kind: input, shape index: {}]   ;;  %s1028_s3 = inlined_call_operand.vmem [shape: f32[1,64], index: 3, kind: input, shape index: {}]   ;;  %s1029_s4 = inlined_call_operand.vmem [shape: f32[1,64], index: 4, kind: input, shape index: {}]   ;;  %s1030_s5 = inlined_call_operand.vmem [shape: f32[2,64,9,1,1], index: 5, kind: output, shape index: {}, may-alias: {0,5}]  }
   0x1   :  { %s917_s0 = smov 0  }
   0x2 LB: > { %s665_s20 = sadd.s32 4294967295, %s876_s0   ;;  %s28_s21 = sadd.s32 1, %s872_s19  ;;  %s876_s0 = sphi %s917_s0, %s16_s0   ;;  %s872_s19 = sphi %s915_s19, %s1032_s19   ;;  %s868_s18 = sphi %s913_s18, %s1031_s18  }
   0x3   : > { %p29_p0 = scmp.ge.s32.totalorder %s28_s21, 3  ;;  %p670_p1 = scmp.ge.s32.totalorder %s876_s0, 1 }
   0x4   : > { %p224_p2 = scmp.lt.s32.totalorder %s876_s0, 4 }
   0x5   : > { %s1034_s21 = smov (%p29_p0, %s28_s21), 0 }
   0x6   : > { %p225_p3 = pnand %p670_p1, %p224_p2 }
   0x7   : > { %s263_s22 = smul.u32 (!%p225_p3), 3, %s868_s18  ;;  %p673_p6 = scmp.ne.s32.totalorder (!%p225_p3), %s868_s18, 0 }
   0x8   : > { %228 = sbr.rel (%p225_p3) target bundleno = 304 (0x130), region = 36 }
   0x9   : > { %s273_s23 = smul.u32 (!%p225_p3), 48, %s868_s18  ;;  %p266_p4 = scmp.lt.s32.totalorder (!%p225_p3), %s263_s22, 8 }
   0xb   : > { %p274_p5 = scmp.lt.s32.totalorder (!%p225_p3), %s273_s23, 143 }
   0xf   : > { %s1036_s22 = smov (!%p266_p4, %s263_s22), 8  ;;  %s1038_s23 = smov (!%p274_p5, %s273_s23), 143 }
  0x10   : > { %s671_s24 = sshll.u32 %s1036_s22, 1  ;;  %s672_s28 = sshll.u32 %s1038_s23, 3  ;;  %vm292_vm0 = vcmask (!%p673_p6), 517120   ;;  %v878_v0 = vmov (!%p673_p6), 0.0  }
  0x11   : > { %s939_s27 = scalar_lea.vmem %s1026_s1, %s671_s24  ;;  %s944_s6 = scalar_lea.vmem %s1027_s2, %s672_s28  ;;  %293 = vst.msk [vmem:[#allocation2] sm:$0x3] (!%p673_p6), %vm292_vm0, %v878_v0 }
  0x12   : > { %291 = sbr.rel (%p673_p6) target bundleno = 25 (0x19), region = 40 }
  0x19 PF: > { %v312_v1 = vld [vmem:[%s944_s6 + $0x80] sm:$0xff]  ;;  %v313_v2 = vld [vmem:[%s944_s6 + $0x88] sm:$0xff]  ;;  %v879_v6 = vmov 0.0|0.0   ;;  %v314_v11 = vld [vmem:[%s944_s6 + $0x90] sm:$0xff]  ;;  %vm880_vm1 = vmmov 0   ;;  %v881_v14 = vmov 0.0   ;;  %v349_v26 = vlaneseq }
  0x1a   : > { %v296_v3 = vld [vmem:[%s944_s6] sm:$0xff]  ;;  %v768_v4 = vpack.c.bf16 %v313_v2, %v312_v1  ;;  %v297_v5 = vld [vmem:[%s944_s6 + $0x8] sm:$0xff]  ;;  %800 = vmatprep.subr.bf16.mxu1 %v879_v6  ;;  %v315_v12 = vld [vmem:[%s944_s6 + $0x98] sm:$0xff]  ;;  %765 = vmatprep.mubr.msk.f32.mxu1 %vm880_vm1, %v881_v14  ;;  %v882_v24 = vmov 1983009808   ;;  %vm505_vm2 = vcmask 517120  }
  0x1b   : > { %v328_v7 = vld [vmem:[%s944_s6 + $0x100] sm:$0xff]  ;;  %v329_v8 = vld [vmem:[%s944_s6 + $0x108] sm:$0xff]  ;;  %v770_v9 = vpack.c.bf16 %v297_v5, %v296_v3  ;;  %v298_v13 = vld [vmem:[%s944_s6 + $0x10] sm:$0xff]  ;;  %v772_v15 = vpack.c.bf16 %v315_v12, %v314_v11  ;;  %v347_v25 = vunpack.c.l.s4 %v882_v24  ;;  %v350_v37 = vshrl.u32 %v349_v26, 7  ;;  %p674_p7 = scmp.ne.s32.totalorder %s868_s18, 2 }
  0x1c   : > { %v801_v10 = vpack.c.bf16 %v329_v8, %v328_v7  ;;  %769 = vmatprep.subr.bf16.mxu0 %v768_v4  ;;  %v299_v16 = vld [vmem:[%s944_s6 + $0x18] sm:$0xff]  ;;  %v330_v17 = vld [vmem:[%s944_s6 + $0x110] sm:$0xff]  ;;  %v316_v21 = vld [vmem:[%s944_s6 + $0xa0] sm:$0xff] }
  0x1d   : > { %v331_v18 = vld [vmem:[%s944_s6 + $0x118] sm:$0xff]  ;;  %771 = vmatpush3.bf16.msra.mxu0 %v770_v9  ;;  %v774_v19 = vpack.c.bf16 %v299_v16, %v298_v13  ;;  %v317_v22 = vld [vmem:[%s944_s6 + $0xa8] sm:$0xff]  ;;  %v300_v23 = vld [vmem:[%s944_s6 + $0x20] sm:$0xff]  ;;  %v348_v36 = vunpack.c.0.s8 %v347_v25 }
  0x1e   : > { %802 = vmatpush3.bf16.msra.mxu1 %v801_v10  ;;  %v804_v20 = vpack.c.bf16 %v331_v18, %v330_v17  ;;  %773 = vmatprep.subr.bf16.mxu0 %v772_v15  ;;  %v776_v27 = vpack.c.bf16 %v317_v22, %v316_v21  ;;  %v301_v28 = vld [vmem:[%s944_s6 + $0x28] sm:$0xff]  ;;  %v332_v29 = vld [vmem:[%s944_s6 + $0x120] sm:$0xff]  ;;  %v318_v31 = vld [vmem:[%s944_s6 + $0xb0] sm:$0xff] }
  0x1f   : > { %803 = vmatprep.subr.bf16.mxu1 %v879_v6  ;;  %v333_v30 = vld [vmem:[%s944_s6 + $0x128] sm:$0xff]  ;;  %v319_v32 = vld [vmem:[%s944_s6 + $0xb8] sm:$0xff]  ;;  %v778_v33 = vpack.c.bf16 %v301_v28, %v300_v23  ;;  %v302_v35 = vld [vmem:[%s944_s6 + $0x30] sm:$0xff]  ;;  %v351_v47 = vsub.s32 %v348_v36, %v350_v37 }
  0x20   : > { %v807_v34 = vpack.c.bf16 %v333_v30, %v332_v29  ;;  %v780_v38 = vpack.c.bf16 %v319_v32, %v318_v31  ;;  %v303_v39 = vld [vmem:[%s944_s6 + $0x38] sm:$0xff]  ;;  %v334_v40 = vld [vmem:[%s944_s6 + $0x130] sm:$0xff]  ;;  %v320_v42 = vld [vmem:[%s944_s6 + $0xc0] sm:$0xff] }
  0x21   : > { %775 = vmatpush3.bf16.msra.mxu0 %v774_v19  ;;  %v335_v41 = vld [vmem:[%s944_s6 + $0x138] sm:$0xff]  ;;  %v321_v43 = vld [vmem:[%s944_s6 + $0xc8] sm:$0xff]  ;;  %v782_v44 = vpack.c.bf16 %v303_v39, %v302_v35  ;;  %v304_v46 = vld [vmem:[%s944_s6 + $0x40] sm:$0xff] }
  0x22   : > { %805 = vmatpush3.bf16.msra.mxu1 %v804_v20  ;;  %777 = vmatprep.subr.bf16.mxu0 %v776_v27  ;;  %v810_v45 = vpack.c.bf16 %v335_v41, %v334_v40  ;;  %v784_v48 = vpack.c.bf16 %v321_v43, %v320_v42  ;;  %v305_v49 = vld [vmem:[%s944_s6 + $0x48] sm:$0xff]  ;;  %v336_v50 = vld [vmem:[%s944_s6 + $0x140] sm:$0xff]  ;;  %v322_v52 = vld [vmem:[%s944_s6 + $0xd0] sm:$0xff] }
  0x23   : > { %806 = vmatprep.subr.bf16.mxu1 %v879_v6  ;;  %v337_v51 = vld [vmem:[%s944_s6 + $0x148] sm:$0xff]  ;;  %v323_v53 = vld [vmem:[%s944_s6 + $0xd8] sm:$0xff]  ;;  %v295_v54 = vld [vmem:[%s939_s27] sm:$0x3f]  ;;  %v786_v55 = vpack.c.bf16 %v305_v49, %v304_v46 }
  0x24   : > { %v813_v56 = vpack.c.bf16 %v337_v51, %v336_v50  ;;  %v306_v57 = vld [vmem:[%s944_s6 + $0x50] sm:$0xff]  ;;  %v352_v58 = vrot.slane %v295_v54, %v351_v47  ;;  %v788_v59 = vpack.c.bf16 %v323_v53, %v322_v52  ;;  %v307_v60 = vld [vmem:[%s944_s6 + $0x58] sm:$0xff]  ;;  %v324_v63 = vld [vmem:[%s944_s6 + $0xe0] sm:$0xff]  ;;  %v345_v19 = vcombine.high %v295_v54, %v295_v54 }
  0x25   : > { %779 = vmatpush3.bf16.msra.mxu0 %v778_v33  ;;  %v338_v61 = vld [vmem:[%s944_s6 + $0x150] sm:$0xff]  ;;  %v339_v62 = vld [vmem:[%s944_s6 + $0x158] sm:$0xff]  ;;  %v325_v0 = vld [vmem:[%s944_s6 + $0xe8] sm:$0xff]  ;;  %v790_v2 = vpack.c.bf16 %v307_v60, %v306_v57 }
  0x26   : > { %808 = vmatpush3.bf16.msra.mxu1 %v807_v34  ;;  %781 = vmatprep.subr.bf16.mxu0 %v780_v38  ;;  %v360_v1 = vcombine.high %v352_v58, %v352_v58  ;;  %v816_v3 = vpack.c.bf16 %v339_v62, %v338_v61  ;;  %v308_v4 = vld [vmem:[%s944_s6 + $0x60] sm:$0xff]  ;;  %v792_v5 = vpack.c.bf16 %v325_v0, %v324_v63  ;;  %v309_v7 = vld [vmem:[%s944_s6 + $0x68] sm:$0xff]  ;;  %v326_v10 = vld [vmem:[%s944_s6 + $0xf0] sm:$0xff] }
  0x27   : > { %809 = vmatprep.subr.bf16.mxu1 %v879_v6  ;;  %v340_v8 = vld [vmem:[%s944_s6 + $0x160] sm:$0xff]  ;;  %v341_v9 = vld [vmem:[%s944_s6 + $0x168] sm:$0xff]  ;;  %v327_v11 = vld [vmem:[%s944_s6 + $0xf8] sm:$0xff]  ;;  %v794_v12 = vpack.c.bf16 %v309_v7, %v308_v4  ;;  %v359_v22 = vrot.slane %v345_v19, %v351_v47 }
  0x28   : > { %428 = vmatprep.mubr.f32.mxu0 %v360_v1  ;;  %v819_v13 = vpack.c.bf16 %v341_v9, %v340_v8  ;;  %v310_v14 = vld [vmem:[%s944_s6 + $0x70] sm:$0xff]  ;;  %v796_v15 = vpack.c.bf16 %v327_v11, %v326_v10  ;;  %v311_v16 = vld [vmem:[%s944_s6 + $0x78] sm:$0xff]  ;;  %v294_v28 = vld [vmem:[#allocation2] sm:$0x3] }
  0x29   : > { %783 = vmatpush3.bf16.msra.mxu0 %v782_v44  ;;  %v342_v17 = vld [vmem:[%s944_s6 + $0x170] sm:$0xff]  ;;  %v343_v18 = vld [vmem:[%s944_s6 + $0x178] sm:$0xff]  ;;  %v798_v20 = vpack.c.bf16 %v311_v16, %v310_v14  ;;  %v676_v32 = vld [vmem:[%s1029_s4] ss:$0 sm:$0xff] (!%p674_p7) }
  0x2a   : > { %811 = vmatpush3.bf16.msra.mxu1 %v810_v45  ;;  %785 = vmatprep.subr.bf16.mxu0 %v784_v48  ;;  %v822_v21 = vpack.c.bf16 %v343_v18, %v342_v17 }
  0x2b   : > { %812 = vmatprep.subr.bf16.mxu1 %v879_v6 }
  0x2d   : > { %787 = vmatpush3.bf16.msra.mxu0 %v786_v55 }
  0x2e   : > { %814 = vmatpush3.bf16.msra.mxu1 %v813_v56  ;;  %789 = vmatprep.subr.bf16.mxu0 %v788_v59 }
  0x2f   : > { %815 = vmatprep.subr.bf16.mxu1 %v879_v6 }
  0x31   : > { %791 = vmatpush3.bf16.msra.mxu0 %v790_v2 }
  0x32   : > { %817 = vmatpush3.bf16.msra.mxu1 %v816_v3  ;;  %793 = vmatprep.subr.bf16.mxu0 %v792_v5 }
  0x33   : > { %818 = vmatprep.subr.bf16.mxu1 %v879_v6 }
  0x35   : > { %795 = vmatpush3.bf16.msra.mxu0 %v794_v12 }
  0x36   : > { %820 = vmatpush3.bf16.msra.mxu1 %v819_v13  ;;  %797 = vmatprep.subr.bf16.mxu0 %v796_v15 }
  0x37   : > { %821 = vmatprep.subr.bf16.mxu1 %v879_v6  ;;  %v675_v6 = vld [vmem:[%s1028_s3] ss:$0 sm:$0xff] (!%p674_p7) }
  0x39   : > { %799 = vmatpush3.bf16.msra.mxu0 %v798_v20 }
  0x3a   : > { %823 = vmatpush3.bf16.msra.mxu1 %v822_v21 }
  0x3c   : > { %429 = vmatmul.mubr.f32.vlgmr.msra.gmra.mrb[0].mxu0 %v352_v58 }
  0x3d   : > { %766 = vmatmul.mubr.f32.vlgmr.msra.gmra.mrb[0].mxu1 %v359_v22 }
 0x10f   : > { %v713_v23 = vpop.f32.mrb[0].mxu0 }
 0x110   : > { %v500_v24 = vpop.f32.mrb[0].mxu1  ;;  %v714_v25 = vpop.f32.mrb[1].mxu0 }
 0x111   : > { %v767_v26 = vpop.f32.mrb[1].mxu1  ;;  %v715_v27 = vadd.f32 %v714_v25, %v713_v23  ;;  %510 = sbr.rel (%p674_p7) target bundleno = 295 (0x127), region = 44 }
 0x113   : > { %v501_v29 = vadd.f32 %v715_v27, %v500_v24 }
 0x115   : > { %v504_v30 = vadd.f32 %v501_v29, %v294_v28 }
 0x117   : > { %506 = vst.msk [vmem:[#allocation2] sm:$0x3] %vm505_vm2, %v504_v30 }
 0x11e   : > { %v511_v31 = vld [vmem:[#allocation2] sm:$0x3] }
 0x11f   : > { %v519_v33 = vmul.f32 %v675_v6, %v511_v31 }
 0x121   : > { %v527_v34 = vadd.f32 %v676_v32, %v519_v33 }
 0x123   : > { %vm528_vm3 = vcmp.ge.f32.partialorder %v527_v34, 0.0  ;;  %v529_v35 = vmul.f32 0.2, %v527_v34 }
 0x125   : > { %v530_v36 = vsel %vm528_vm3, %v527_v34, %v529_v35 }
 0x126   : > { %531 = vst.msk [vmem:[#allocation3] sm:$0x3] %vm505_vm2, %v530_v36 }
 0x127 PF: > { %p677_p8 = scmp.ne.s32.totalorder %s665_s20, 2 }
 0x129   : > { %534 = sbr.rel (%p677_p8) target bundleno = 304 (0x130), region = 48 }
 0x12d   : > { %v553_v37 = vld [vmem:[#allocation3] sm:$0x3] (!%p677_p8) }
 0x12e   : > { %678 = vst [vmem:[%s1030_s5 + $0x8] sm:$0x3] (!%p677_p8), %v553_v37 }
 0x130 PF: > { %s16_s0 = sadd.s32 1, %s876_s0   ;;  %s1031_s18 = smov %s872_s19 }
 0x131   : > { %p13_p9 = scmp.ge.s32.totalorder %s16_s0, 5   ;;  %s1032_s19 = smov %s1034_s21 }
 0x133   :  { %15 = sbr.rel (!%p13_p9) target bundleno = 2 (0x2), region = 115 }

// kernel: _lambda_.15
= control target key start
LH: loop header
LB: loop body
LE: loop exit
PB: predicated region body
PF: predicated region fallthrough
CT: control target
= control target key end

     0   :  { %v591_v47 = vmov 1983009808   ;;  %v105_v49 = vlaneseq  ;;  %s864_s0 = inlined_call_operand.vmem [shape: f32[2,576], index: 0, kind: input, shape index: {}]   ;;  %s865_s1 = inlined_call_operand.vmem [shape: f32[576,32], index: 1, kind: input, shape index: {}]   ;;  %s866_s2 = inlined_call_operand.vmem [shape: f32[1,32], index: 2, kind: input, shape index: {}]   ;;  %s867_s3 = inlined_call_operand.vmem [shape: f32[1,32], index: 3, kind: input, shape index: {}]   ;;  %s868_s4 = inlined_call_operand.hbm [shape: f32[2,32], index: 4, kind: output, shape index: {}]  }
   0x1   :  { %v43_v0 = vld [vmem:[%s865_s1 + $0x80] sm:$0xff]  ;;  %v44_v1 = vld [vmem:[%s865_s1 + $0x88] sm:$0xff]  ;;  %v45_v11 = vld [vmem:[%s865_s1 + $0x90] sm:$0xff]  ;;  %v103_v48 = vunpack.c.l.s4 %v591_v47 }
   0x2   :  { %v75_v2 = vld [vmem:[%s865_s1 + $0x180] sm:$0xff]  ;;  %v485_v3 = vpack.c.bf16 %v44_v1, %v43_v0  ;;  %v76_v4 = vld [vmem:[%s865_s1 + $0x188] sm:$0xff]  ;;  %v46_v13 = vld [vmem:[%s865_s1 + $0x98] sm:$0xff]  ;;  %v106_v0 = vshrl.u32 %v105_v49, 7 }
   0x3   :  { %v27_v5 = vld [vmem:[%s865_s1] sm:$0xff]  ;;  %v28_v6 = vld [vmem:[%s865_s1 + $0x8] sm:$0xff]  ;;  %v517_v7 = vpack.c.bf16 %v76_v4, %v75_v2  ;;  %v77_v14 = vld [vmem:[%s865_s1 + $0x190] sm:$0xff]  ;;  %v489_v16 = vpack.c.bf16 %v46_v13, %v45_v11  ;;  %v104_v63 = vunpack.c.0.s8 %v103_v48 }
   0x4   :  { %v487_v8 = vpack.c.bf16 %v28_v6, %v27_v5  ;;  %v59_v9 = vld [vmem:[%s865_s1 + $0x100] sm:$0xff]  ;;  %v60_v10 = vld [vmem:[%s865_s1 + $0x108] sm:$0xff]  ;;  %486 = vmatprep.subr.bf16.mxu0 %v485_v3  ;;  %v78_v15 = vld [vmem:[%s865_s1 + $0x198] sm:$0xff] }
   0x5   :  { %v519_v12 = vpack.c.bf16 %v60_v10, %v59_v9  ;;  %518 = vmatprep.subr.bf16.mxu1 %v517_v7  ;;  %v521_v17 = vpack.c.bf16 %v78_v15, %v77_v14  ;;  %v29_v18 = vld [vmem:[%s865_s1 + $0x10] sm:$0xff]  ;;  %v30_v19 = vld [vmem:[%s865_s1 + $0x18] sm:$0xff]  ;;  %v47_v23 = vld [vmem:[%s865_s1 + $0xa0] sm:$0xff]  ;;  %v107_v13 = vsub.s32 %v104_v63, %v106_v0 }
   0x6   :  { %488 = vmatpush3.bf16.msra.mxu0 %v487_v8  ;;  %v61_v20 = vld [vmem:[%s865_s1 + $0x110] sm:$0xff]  ;;  %v491_v21 = vpack.c.bf16 %v30_v19, %v29_v18  ;;  %v62_v22 = vld [vmem:[%s865_s1 + $0x118] sm:$0xff]  ;;  %v48_v24 = vld [vmem:[%s865_s1 + $0xa8] sm:$0xff] }
   0x7   :  { %520 = vmatpush3.bf16.msra.mxu1 %v519_v12  ;;  %490 = vmatprep.subr.bf16.mxu0 %v489_v16  ;;  %v523_v25 = vpack.c.bf16 %v62_v22, %v61_v20  ;;  %v493_v26 = vpack.c.bf16 %v48_v24, %v47_v23  ;;  %v79_v27 = vld [vmem:[%s865_s1 + $0x1a0] sm:$0xff]  ;;  %v80_v28 = vld [vmem:[%s865_s1 + $0x1a8] sm:$0xff]  ;;  %v49_v35 = vld [vmem:[%s865_s1 + $0xb0] sm:$0xff] }
   0x8   :  { %522 = vmatprep.subr.bf16.mxu1 %v521_v17  ;;  %v31_v29 = vld [vmem:[%s865_s1 + $0x20] sm:$0xff]  ;;  %v525_v30 = vpack.c.bf16 %v80_v28, %v79_v27  ;;  %v32_v31 = vld [vmem:[%s865_s1 + $0x28] sm:$0xff]  ;;  %v50_v36 = vld [vmem:[%s865_s1 + $0xb8] sm:$0xff] }
   0x9   :  { %v63_v32 = vld [vmem:[%s865_s1 + $0x120] sm:$0xff]  ;;  %v64_v33 = vld [vmem:[%s865_s1 + $0x128] sm:$0xff]  ;;  %v495_v34 = vpack.c.bf16 %v32_v31, %v31_v29  ;;  %v81_v37 = vld [vmem:[%s865_s1 + $0x1b0] sm:$0xff]  ;;  %v497_v39 = vpack.c.bf16 %v50_v36, %v49_v35 }
   0xa   :  { %492 = vmatpush3.bf16.msra.mxu0 %v491_v21  ;;  %v527_v38 = vpack.c.bf16 %v64_v33, %v63_v32  ;;  %v82_v40 = vld [vmem:[%s865_s1 + $0x1b8] sm:$0xff]  ;;  %v33_v41 = vld [vmem:[%s865_s1 + $0x30] sm:$0xff]  ;;  %v51_v46 = vld [vmem:[%s865_s1 + $0xc0] sm:$0xff] }
   0xb   :  { %524 = vmatpush3.bf16.msra.mxu1 %v523_v25  ;;  %494 = vmatprep.subr.bf16.mxu0 %v493_v26  ;;  %v34_v42 = vld [vmem:[%s865_s1 + $0x38] sm:$0xff]  ;;  %v529_v43 = vpack.c.bf16 %v82_v40, %v81_v37  ;;  %v65_v44 = vld [vmem:[%s865_s1 + $0x130] sm:$0xff]  ;;  %v52_v50 = vld [vmem:[%s865_s1 + $0xc8] sm:$0xff] }
   0xc   :  { %526 = vmatprep.subr.bf16.mxu1 %v525_v30  ;;  %v66_v45 = vld [vmem:[%s865_s1 + $0x138] sm:$0xff]  ;;  %v83_v51 = vld [vmem:[%s865_s1 + $0x1c0] sm:$0xff]  ;;  %v84_v52 = vld [vmem:[%s865_s1 + $0x1c8] sm:$0xff]  ;;  %v499_v53 = vpack.c.bf16 %v34_v42, %v33_v41  ;;  %v501_v55 = vpack.c.bf16 %v52_v50, %v51_v46 }
   0xd   :  { %v531_v54 = vpack.c.bf16 %v66_v45, %v65_v44  ;;  %v35_v56 = vld [vmem:[%s865_s1 + $0x40] sm:$0xff]  ;;  %v36_v57 = vld [vmem:[%s865_s1 + $0x48] sm:$0xff]  ;;  %v533_v59 = vpack.c.bf16 %v84_v52, %v83_v51  ;;  %v53_v61 = vld [vmem:[%s865_s1 + $0xd0] sm:$0xff] }
   0xe   :  { %496 = vmatpush3.bf16.msra.mxu0 %v495_v34  ;;  %v67_v58 = vld [vmem:[%s865_s1 + $0x140] sm:$0xff]  ;;  %v68_v60 = vld [vmem:[%s865_s1 + $0x148] sm:$0xff]  ;;  %v54_v62 = vld [vmem:[%s865_s1 + $0xd8] sm:$0xff]  ;;  %v503_v3 = vpack.c.bf16 %v36_v57, %v35_v56 }
   0xf   :  { %528 = vmatpush3.bf16.msra.mxu1 %v527_v38  ;;  %498 = vmatprep.subr.bf16.mxu0 %v497_v39  ;;  %v85_v1 = vld [vmem:[%s865_s1 + $0x1d0] sm:$0xff]  ;;  %v86_v2 = vld [vmem:[%s865_s1 + $0x1d8] sm:$0xff]  ;;  %v535_v4 = vpack.c.bf16 %v68_v60, %v67_v58  ;;  %v505_v5 = vpack.c.bf16 %v54_v62, %v53_v61  ;;  %v55_v11 = vld [vmem:[%s865_s1 + $0xe0] sm:$0xff] }
  0x10   :  { %530 = vmatprep.subr.bf16.mxu1 %v529_v43  ;;  %v37_v6 = vld [vmem:[%s865_s1 + $0x50] sm:$0xff]  ;;  %v38_v7 = vld [vmem:[%s865_s1 + $0x58] sm:$0xff]  ;;  %v537_v9 = vpack.c.bf16 %v86_v2, %v85_v1  ;;  %v56_v12 = vld [vmem:[%s865_s1 + $0xe8] sm:$0xff] }
  0x11   :  { %v69_v8 = vld [vmem:[%s865_s1 + $0x150] sm:$0xff]  ;;  %v70_v10 = vld [vmem:[%s865_s1 + $0x158] sm:$0xff]  ;;  %v87_v14 = vld [vmem:[%s865_s1 + $0x1e0] sm:$0xff]  ;;  %v507_v16 = vpack.c.bf16 %v38_v7, %v37_v6  ;;  %v509_v19 = vpack.c.bf16 %v56_v12, %v55_v11 }
  0x12   :  { %500 = vmatpush3.bf16.msra.mxu0 %v499_v53  ;;  %v88_v15 = vld [vmem:[%s865_s1 + $0x1e8] sm:$0xff]  ;;  %v39_v17 = vld [vmem:[%s865_s1 + $0x60] sm:$0xff]  ;;  %v539_v18 = vpack.c.bf16 %v70_v10, %v69_v8  ;;  %v57_v25 = vld [vmem:[%s865_s1 + $0xf0] sm:$0xff] }
  0x13   :  { %532 = vmatpush3.bf16.msra.mxu1 %v531_v54  ;;  %502 = vmatprep.subr.bf16.mxu0 %v501_v55  ;;  %v40_v20 = vld [vmem:[%s865_s1 + $0x68] sm:$0xff]  ;;  %v71_v21 = vld [vmem:[%s865_s1 + $0x160] sm:$0xff]  ;;  %v541_v23 = vpack.c.bf16 %v88_v15, %v87_v14  ;;  %v58_v26 = vld [vmem:[%s865_s1 + $0xf8] sm:$0xff] }
  0x14   :  { %534 = vmatprep.subr.bf16.mxu1 %v533_v59  ;;  %v25_v22 = vld [vmem:[%s864_s0] sm:$0xff]  ;;  %v72_v24 = vld [vmem:[%s865_s1 + $0x168] sm:$0xff]  ;;  %v89_v29 = vld [vmem:[%s865_s1 + $0x1f0] sm:$0xff]  ;;  %v511_v31 = vpack.c.bf16 %v40_v20, %v39_v17  ;;  %v513_v35 = vpack.c.bf16 %v58_v26, %v57_v25 }
  0x15   :  { %v108_v27 = vrot.slane %v25_v22, %v107_v13  ;;  %v101_v28 = vcombine.high %v25_v22, %v25_v22  ;;  %v90_v30 = vld [vmem:[%s865_s1 + $0x1f8] sm:$0xff]  ;;  %v543_v34 = vpack.c.bf16 %v72_v24, %v71_v21  ;;  %v41_v36 = vld [vmem:[%s865_s1 + $0x70] sm:$0xff] }
  0x16   :  { %504 = vmatpush3.bf16.msra.mxu0 %v503_v3  ;;  %v42_v37 = vld [vmem:[%s865_s1 + $0x78] sm:$0xff] }
  0x17   :  { %536 = vmatpush3.bf16.msra.mxu1 %v535_v4  ;;  %506 = vmatprep.subr.bf16.mxu0 %v505_v5  ;;  %v116_v32 = vcombine.high %v108_v27, %v108_v27  ;;  %v115_v33 = vrot.slane %v101_v28, %v107_v13 }
  0x18   :  { %538 = vmatprep.subr.bf16.mxu1 %v537_v9 }
  0x1a   :  { %508 = vmatpush3.bf16.msra.mxu0 %v507_v16 }
  0x1b   :  { %540 = vmatpush3.bf16.msra.mxu1 %v539_v18  ;;  %510 = vmatprep.subr.bf16.mxu0 %v509_v19 }
  0x1c   :  { %9 = vsyncpa [#allocation4], 0  ;;  %542 = vmatprep.subr.bf16.mxu1 %v541_v23  ;;  %v545_v38 = vpack.c.bf16 %v90_v30, %v89_v29  ;;  %v73_v39 = vld [vmem:[%s865_s1 + $0x170] sm:$0xff]  ;;  %v74_v40 = vld [vmem:[%s865_s1 + $0x178] sm:$0xff]  ;;  %196 = vmatprep.mubr.f32.mxu0 %v116_v32  ;;  %v117_v41 = vcombine.high %v115_v33, %v115_v33  ;;  %v515_v42 = vpack.c.bf16 %v42_v37, %v41_v36  ;;  %v592_v47 = vmov 0.0|0.0   ;;  %s595_s9 = smov [#allocation3]  }
  0x1d   :  { %v547_v43 = vpack.c.bf16 %v74_v40, %v73_v39  ;;  %v91_v44 = vld [vmem:[%s865_s1 + $0x200] sm:$0xff]  ;;  %v92_v45 = vld [vmem:[%s865_s1 + $0x208] sm:$0xff]  ;;  %v93_v48 = vld [vmem:[%s865_s1 + $0x210] sm:$0xff]  ;;  %vm593_vm0 = vmmov 0   ;;  %v594_v53 = vmov 0.0   ;;  %vm129_vm1 = vcmask 523264  }
  0x1e   :  { %512 = vmatpush3.bf16.msra.mxu0 %v511_v31  ;;  %266 = vmatprep.mubr.f32.mxu1 %v117_v41  ;;  %v550_v46 = vpack.c.bf16 %v92_v45, %v91_v44  ;;  %v94_v49 = vld [vmem:[%s865_s1 + $0x218] sm:$0xff]  ;;  %v95_v51 = vld [vmem:[%s865_s1 + $0x220] sm:$0xff]  ;;  %v96_v52 = vld [vmem:[%s865_s1 + $0x228] sm:$0xff]  ;;  %vm22_vm2 = vcmask 254976   ;;  %s375_s10 = sshll.u32 %s595_s9, 4  ;;  %s376_s10 = int_to_ptr.vmem [resolvable:$true] %s375_s10 }
  0x1f   :  { %544 = vmatpush3.bf16.msra.mxu1 %v543_v34  ;;  %514 = vmatprep.subr.bf16.mxu0 %v513_v35  ;;  %v553_v50 = vpack.c.bf16 %v94_v49, %v93_v48  ;;  %v556_v54 = vpack.c.bf16 %v96_v52, %v95_v51  ;;  %v97_v55 = vld [vmem:[%s865_s1 + $0x230] sm:$0xff]  ;;  %v98_v56 = vld [vmem:[%s865_s1 + $0x238] sm:$0xff]  ;;  %v383_v58 = vld.sshfl [vmem:[%s864_s0 + $0x8] sm:$0x3 pattern:$0x76325410]  ;;  %p572_p1 = scmp.lt.s32.totalorder %s376_s10, %s376_s10 }
  0x20   :  { %546 = vmatprep.subr.bf16.mxu1 %v545_v38  ;;  %v559_v57 = vpack.c.bf16 %v98_v56, %v97_v55  ;;  %23 = vst.msk [vmem:[#allocation2] sm:$0x3] %vm22_vm2, %v594_v53  ;;  %v385_v7 = vld [vmem:[%s866_s2] ss:$0 sm:$0xff]  ;;  %s567_s11 = scalar_lea.vmem %s376_s10, 32 }
  0x21   :  { %v386_v9 = vld [vmem:[%s867_s3] ss:$0 sm:$0xff]  ;;  %p568_p0 = scmp.ne.s32.totalorder %s376_s10, %s567_s11  ;;  %p573_p2 = scmp.lt.s32.totalorder %s567_s11, %s567_s11 }
  0x22   :  { %516 = vmatpush3.bf16.msra.mxu0 %v515_v42 }
  0x23   :  { %548 = vmatpush3.bf16.msra.mxu1 %v547_v43  ;;  %549 = vmatprep.subr.bf16.mxu0 %v592_v47  ;;  %p574_p3 = por %p573_p2, %p572_p1 }
  0x25   :  { %197 = vmatmul.mubr.f32.vlgmr.msra.gmra.mrb[0].mxu0 %v108_v27  ;;  %p575_p4 = pnand %p574_p3, %p568_p0 }
  0x26   :  { %267 = vmatmul.mubr.f32.vlgmr.msra.gmra.mrb[0].mxu1 %v115_v33  ;;  %551 = vmatpush3.bf16.msra.mxu0 %v550_v46 }
  0x27   :  { %552 = vmatprep.subr.bf16.mxu0 %v592_v47  ;;  %482 = vmatprep.mubr.msk.f32.mxu0 %vm593_vm0, %v594_v53  ;;  %v24_v2 = vld [vmem:[#allocation2] sm:$0x3] }
  0x2a   :  { %554 = vmatpush3.bf16.msra.mxu0 %v553_v50 }
  0x2b   :  { %555 = vmatprep.subr.bf16.mxu0 %v592_v47 }
  0x2e   :  { %557 = vmatpush3.bf16.msra.mxu0 %v556_v54 }
  0x2f   :  { %558 = vmatprep.subr.bf16.mxu0 %v592_v47 }
  0x32   :  { %560 = vmatpush3.bf16.msra.mxu0 %v559_v57 }
  0x35   :  { %483 = vmatmul.mubr.msk.f32.vlgmr.msra.gmra.mrb[2].mxu0 %vm129_vm1, %v383_v58 }
  0xf8   :  { %v419_v59 = vpop.f32.mrb[0].mxu0 }
  0xf9   :  { %v454_v60 = vpop.f32.mrb[0].mxu1  ;;  %v420_v61 = vpop.f32.mrb[1].mxu0 }
  0xfa   :  { %v421_v62 = vadd.f32 %v420_v61, %v419_v59  ;;  %v455_v63 = vpop.f32.mrb[1].mxu1 }
  0xfb   :  { %v456_v0 = vadd.f32 %v455_v63, %v454_v60 }
  0xfd   :  { %v269_v1 = vadd.f32 %v456_v0, %v421_v62 }
 0x108   :  { %v338_v3 = vpop.f32.mrb[2].mxu0 }
 0x109   :  { %v339_v4 = vadd.f32 %v338_v3, %v269_v1  ;;  %v484_v5 = vpop.f32.mrb[3].mxu0 }
 0x10b   :  { %v342_v6 = vadd.f32 %v339_v4, %v24_v2 }
 0x10d   :  { %344 = vst.msk [vmem:[#allocation2] sm:$0x3] %vm22_vm2, %v342_v6 }
 0x114   :  { %v348_v8 = vld [vmem:[#allocation2] sm:$0x3] }
 0x115   :  { %v356_v10 = vmul.f32 %v385_v7, %v348_v8 }
 0x117   :  { %v364_v11 = vadd.f32 %v386_v9, %v356_v10 }
 0x119   :  { %vm365_vm3 = vcmp.ge.f32.partialorder %v364_v11, 0.0  ;;  %v366_v12 = vmul.f32 0.2, %v364_v11 }
 0x11b   :  { %v367_v13 = vsel %vm365_vm3, %v364_v11, %v366_v12 }
 0x11c   :  { %368 = vst.msk [vmem:[#allocation3] sm:$0x3] %vm22_vm2, %v367_v13 }
 0x11d   :  { %578 = shalt.err (!%p575_p4)
}
 0x11e   :  { %s579_s3 = scalar_lea.hbm %s868_s4, 32 }
 0x11f   :  { %p580_p5 = scmp.ne.s32.totalorder %s868_s4, %s579_s3  ;;  %p583_p6 = scmp.lt.u32.totalorder %s579_s3, %s868_s4 }
 0x121   :  { %p585_p7 = pnand %p583_p6, %p580_p5 }
 0x123   :  { %588 = shalt.err (!%p585_p7)
}
 0x124   :  { %378 = dma.vmem_to_hbm [thread:$0]  %s376_s10, 32, %s868_s4, [#allocation4]  }
 0x125   :  { %589 = dma.done.wait [#allocation4], 32  }
 0x126   :  { %590 = vsyncadd [#allocation4], 4294967264 }
 0x127   :  { %382 = vsyncpa [#allocation4], 1 }

</bundles_post_ra>
